<compile_context>
chip_gen: v6e
topology: v6e:2x2x1
jax: 0.10.0
libtpu: 0.0.40
codegen_flags: <defaults>
</compile_context>

<pallas_src>
import math

import jax
import jax.numpy as jnp
from jax import lax
from jax.experimental import pallas as pl
from jax.experimental.pallas import tpu as pltpu


# ----------------------------- fused Pallas kernel -----------------------------

def _build_fused_kernel(T, Bp, H, num_layers, compute_dtype):
    """Build the fused (all layers + FC) kernel for static T, padded batch Bp, H."""
    L = num_layers

    def kernel(*refs):
        # inputs : x2, then per layer (wih, whh, bi_fold, bhn), then fc_w, fc_b
        # outputs: out2
        # scratch: h_seq (N,H) f32, gi (3,N,H) f32
        x_ref = refs[0]
        layer_refs = refs[1:1 + 4 * L]
        fc_w_ref = refs[1 + 4 * L]
        fc_b_ref = refs[2 + 4 * L]
        out_ref = refs[3 + 4 * L]
        h_seq_ref = refs[4 + 4 * L]
        gi_ref = refs[5 + 4 * L]

        cd = compute_dtype

        for l in range(L):
            wih_ref, whh_ref, bi_ref, bhn_ref = layer_refs[4 * l: 4 * l + 4]

            # ---- hoisted input projection: one (T*Bp, D) x (D, H) matmul per gate,
            #      biases folded (r/z: b_ih+b_hh; n: b_in only).
            if l == 0:
                act_c = x_ref[...]                    # already compute dtype
            else:
                act_c = h_seq_ref[...].astype(cd)     # previous layer outputs (f32->cd)
            for g in range(3):                        # gate order: r, z, n
                gi_ref[g] = (
                    jnp.dot(act_c, wih_ref[g], preferred_element_type=jnp.float32)
                    + bi_ref[g]
                )

            # Hidden weights loaded from VMEM once per layer, reused every timestep
            # (live in vregs across the whole recurrence).
            w_hr = whh_ref[0]
            w_hz = whh_ref[1]
            w_hn = whh_ref[2]
            b_hn = bhn_ref[...]                       # (1, H) f32

            def step(t, h_prev, w_hr=w_hr, w_hz=w_hz, w_hn=w_hn, b_hn=b_hn):
                rows = pl.ds(pl.multiple_of(t * Bp, 8), Bp)
                h_c = h_prev.astype(cd)
                gh_r = jnp.dot(h_c, w_hr, preferred_element_type=jnp.float32)
                gh_z = jnp.dot(h_c, w_hz, preferred_element_type=jnp.float32)
                gh_n = jnp.dot(h_c, w_hn, preferred_element_type=jnp.float32) + b_hn
                r = jax.nn.sigmoid(gi_ref[0, rows, :] + gh_r)
                z = jax.nn.sigmoid(gi_ref[1, rows, :] + gh_z)
                n = jnp.tanh(gi_ref[2, rows, :] + r * gh_n)
                h_new = n + z * (h_prev - n)          # == (1-z)*n + z*h_prev
                h_seq_ref[rows, :] = h_new
                return h_new

            h0 = jnp.zeros((Bp, H), jnp.float32)
            lax.fori_loop(0, T, step, h0, unroll=True)

        # ---- fused final Linear over the whole sequence: one (N, H) x (H, O) matmul
        hs = h_seq_ref[...].astype(cd)
        out_ref[...] = (
            jnp.dot(hs, fc_w_ref[...], preferred_element_type=jnp.float32)
            + fc_b_ref[...]
        ).astype(out_ref.dtype)

    return kernel


# ----------------------------- param prep (done once) -----------------------------

def prepare_params(params, compute_dtype=jnp.bfloat16):
    """Transpose to gate-major layout, fold biases, cast weights. Call once."""
    layers = []
    for (w_ih, w_hh, b_ih, b_hh) in params["layers"]:
        H = w_hh.shape[1]
        D = w_ih.shape[1]
        wih_gm = jnp.transpose(w_ih.reshape(3, H, D), (0, 2, 1)).astype(compute_dtype)  # (3,D,H)
        whh_gm = jnp.transpose(w_hh.reshape(3, H, H), (0, 2, 1)).astype(compute_dtype)  # (3,H,H)
        bi = b_ih.reshape(3, H).astype(jnp.float32)
        bh = b_hh.reshape(3, H).astype(jnp.float32)
        # r/z: input+hidden biases fold into the hoisted gi; n: only b_in folds,
        # b_hn must stay inside the r*(...) term.
        bi_fold = jnp.stack([bi[0] + bh[0], bi[1] + bh[1], bi[2]], axis=0).reshape(3, 1, H)
        bhn = bh[2].reshape(1, H)
        layers.append((wih_gm, whh_gm, bi_fold, bhn))
    fc_wT = jnp.transpose(params["fc_w"]).astype(compute_dtype)        # (H, O)
    fc_b2 = params["fc_b"].reshape(1, -1).astype(jnp.float32)          # (1, O)
    return {"layers": layers, "fc_wT": fc_wT, "fc_b2": fc_b2}


# ----------------------------- forward wrapper -----------------------------

def gru_model_forward(x, prep):
    """x: (B, T, input_size) f32 -> (B, T, output_size) f32 (PyTorch batch_first)."""
    B, T, D = x.shape
    L = len(prep["layers"])
    H = prep["layers"][0][1].shape[-1]
    O = prep["fc_wT"].shape[-1]
    compute_dtype = prep["layers"][0][0].dtype

    Bp = ((B + 7) // 8) * 8                  # pad batch to sublane multiple
    N = T * Bp

    # Layout plumbing on the wrapper side (cheap, one-time): time-major, batch-padded,
    # flattened to (T*Bp, D), pre-cast to the MXU compute dtype.
    xt = jnp.swapaxes(x, 0, 1)               # (T, B, D)
    xt = jnp.pad(xt, ((0, 0), (0, Bp - B), (0, 0)))
    x2 = xt.reshape(N, D).astype(compute_dtype)

    kernel = _build_fused_kernel(T, Bp, H, L, compute_dtype)

    flat_inputs = [x2]
    in_specs = [pl.BlockSpec((N, D), lambda i: (0, 0))]
    for (wih, whh, bi, bhn) in prep["layers"]:
        Dl = wih.shape[1]
        flat_inputs += [wih, whh, bi, bhn]
        in_specs += [
            pl.BlockSpec((3, Dl, H), lambda i: (0, 0, 0)),
            pl.BlockSpec((3, H, H), lambda i: (0, 0, 0)),
            pl.BlockSpec((3, 1, H), lambda i: (0, 0, 0)),
            pl.BlockSpec((1, H), lambda i: (0, 0)),
        ]
    flat_inputs += [prep["fc_wT"], prep["fc_b2"]]
    in_specs += [
        pl.BlockSpec((H, O), lambda i: (0, 0)),
        pl.BlockSpec((1, O), lambda i: (0, 0)),
    ]

    out2 = pl.pallas_call(
        kernel,
        out_shape=jax.ShapeDtypeStruct((N, O), jnp.float32),
        grid=(1,),
        in_specs=in_specs,
        out_specs=pl.BlockSpec((N, O), lambda i: (0, 0)),
        scratch_shapes=[
            pltpu.VMEM((N, H), jnp.float32),     # per-layer hidden-state sequence
            pltpu.VMEM((3, N, H), jnp.float32),  # hoisted input projections (per gate)
        ],
        compiler_params=pltpu.CompilerParams(
            dimension_semantics=("arbitrary",),
        ),
    )(*flat_inputs)

    out = out2.reshape(T, Bp, O)[:, :B, :]    # drop batch padding
    return jnp.swapaxes(out, 0, 1)            # (B, T, O)


# ----------------------------- reference (pure JAX, f32) -----------------------------

def gru_model_ref(x, params):
    h_seq = x                                 # (B, T, D)
    for (w_ih, w_hh, b_ih, b_hh) in params["layers"]:
        H = w_hh.shape[1]

        def step(h, x_t, w_ih=w_ih, w_hh=w_hh, b_ih=b_ih, b_hh=b_hh, H=H):
            gi = x_t @ w_ih.T + b_ih
            gh = h @ w_hh.T + b_hh
            r = jax.nn.sigmoid(gi[:, :H] + gh[:, :H])
            z = jax.nn.sigmoid(gi[:, H:2 * H] + gh[:, H:2 * H])
            n = jnp.tanh(gi[:, 2 * H:] + r * gh[:, 2 * H:])
            h_new = (1.0 - z) * n + z * h
            return h_new, h_new

        h0 = jnp.zeros((h_seq.shape[0], H), jnp.float32)
        _, ys = jax.lax.scan(step, h0, jnp.swapaxes(h_seq, 0, 1))
        h_seq = jnp.swapaxes(ys, 0, 1)
    return h_seq @ params["fc_w"].T + params["fc_b"]


# ----------------------------- param init (PyTorch-style) -----------------------------

def init_params(key, input_size, hidden_size, num_layers, output_size):
    bound = 1.0 / math.sqrt(hidden_size)
    layers = []
    for layer in range(num_layers):
        in_sz = input_size if layer == 0 else hidden_size
        key, k1, k2, k3, k4 = jax.random.split(key, 5)
        layers.append((
            jax.random.uniform(k1, (3 * hidden_size, in_sz), jnp.float32, -bound, bound),
            jax.random.uniform(k2, (3 * hidden_size, hidden_size), jnp.float32, -bound, bound),
            jax.random.uniform(k3, (3 * hidden_size,), jnp.float32, -bound, bound),
            jax.random.uniform(k4, (3 * hidden_size,), jnp.float32, -bound, bound),
        ))
    key, kw, kb = jax.random.split(key, 3)
    fc_bound = 1.0 / math.sqrt(hidden_size)
    fc_w = jax.random.uniform(kw, (output_size, hidden_size), jnp.float32, -fc_bound, fc_bound)
    fc_b = jax.random.uniform(kb, (output_size,), jnp.float32, -fc_bound, fc_bound)
    return {"layers": layers, "fc_w": fc_w, "fc_b": fc_b}


# ----------------------------- main -----------------------------

if __name__ == "__main__":
    input_size, hidden_size, num_layers, output_size = 16, 32, 2, 8
    B, T = 2, 8

    key = jax.random.PRNGKey(0)
    key, kx = jax.random.split(key)
    params = init_params(key, input_size, hidden_size, num_layers, output_size)
    x = jax.random.normal(kx, (B, T, input_size), dtype=jnp.float32)

    ref = gru_model_ref(x, params)

    fwd = jax.jit(gru_model_forward)

    # 1) exactness check: f32 compute path must match the pure-JAX reference tightly
    prep_f32 = prepare_params(params, compute_dtype=jnp.float32)
    out_f32 = jax.block_until_ready(fwd(x, prep_f32))
    assert out_f32.shape == (B, T, output_size), out_f32.shape
    assert jnp.allclose(out_f32, ref, atol=1e-4, rtol=1e-4), \
        float(jnp.max(jnp.abs(out_f32 - ref)))

    # 2) fast path: bf16 weights / MXU inputs, f32 accumulation + f32 gate math
    prep_bf16 = prepare_params(params, compute_dtype=jnp.bfloat16)
    out_bf16 = jax.block_until_ready(fwd(x, prep_bf16))
    assert out_bf16.shape == (B, T, output_size), out_bf16.shape
    assert jnp.allclose(out_bf16, ref, atol=5e-2, rtol=5e-2), \
        float(jnp.max(jnp.abs(out_bf16 - ref)))

    print("KERNEL_OK")
</pallas_src>

<mosaic_0001>
module attributes {stable_mosaic.version = 11 : i64} {
  func.func @kernel(%arg0: i32, %arg1: memref<64x16xf32, #tpu.memory_space<vmem>>, %arg2: memref<3x16x32xf32, #tpu.memory_space<vmem>>, %arg3: memref<3x32x32xf32, #tpu.memory_space<vmem>>, %arg4: memref<3x1x32xf32, #tpu.memory_space<vmem>>, %arg5: memref<1x32xf32, #tpu.memory_space<vmem>>, %arg6: memref<3x32x32xf32, #tpu.memory_space<vmem>>, %arg7: memref<3x32x32xf32, #tpu.memory_space<vmem>>, %arg8: memref<3x1x32xf32, #tpu.memory_space<vmem>>, %arg9: memref<1x32xf32, #tpu.memory_space<vmem>>, %arg10: memref<32x8xf32, #tpu.memory_space<vmem>>, %arg11: memref<1x8xf32, #tpu.memory_space<vmem>>, %arg12: memref<64x8xf32, #tpu.memory_space<vmem>>, %arg13: memref<64x32xf32, #tpu.memory_space<vmem>>, %arg14: memref<3x64x32xf32, #tpu.memory_space<vmem>>) attributes {dimension_semantics = [#tpu.dimension_semantics<arbitrary>], iteration_bounds = array<i64: 1>, scalar_prefetch = 0 : i64, scratch_operands = 2 : i64, tpu.core_type = #tpu.core_type<tc>, window_params = [{pipeline_mode = #tpu.pipeline_mode<synchronous>, transform_indices = @transform_0, window_bounds = array<i64: 64, 16>}, {pipeline_mode = #tpu.pipeline_mode<synchronous>, transform_indices = @transform_1, window_bounds = array<i64: 3, 16, 32>}, {pipeline_mode = #tpu.pipeline_mode<synchronous>, transform_indices = @transform_2, window_bounds = array<i64: 3, 32, 32>}, {pipeline_mode = #tpu.pipeline_mode<synchronous>, transform_indices = @transform_3, window_bounds = array<i64: 3, 1, 32>}, {pipeline_mode = #tpu.pipeline_mode<synchronous>, transform_indices = @transform_4, window_bounds = array<i64: 1, 32>}, {pipeline_mode = #tpu.pipeline_mode<synchronous>, transform_indices = @transform_5, window_bounds = array<i64: 3, 32, 32>}, {pipeline_mode = #tpu.pipeline_mode<synchronous>, transform_indices = @transform_6, window_bounds = array<i64: 3, 32, 32>}, {pipeline_mode = #tpu.pipeline_mode<synchronous>, transform_indices = @transform_7, window_bounds = array<i64: 3, 1, 32>}, {pipeline_mode = #tpu.pipeline_mode<synchronous>, transform_indices = @transform_8, window_bounds = array<i64: 1, 32>}, {pipeline_mode = #tpu.pipeline_mode<synchronous>, transform_indices = @transform_9, window_bounds = array<i64: 32, 8>}, {pipeline_mode = #tpu.pipeline_mode<synchronous>, transform_indices = @transform_10, window_bounds = array<i64: 1, 8>}, {pipeline_mode = #tpu.pipeline_mode<synchronous>, transform_indices = @transform_11, window_bounds = array<i64: 64, 8>}]} {
    %c0 = arith.constant 0 : index
    %c0_0 = arith.constant 0 : index
    %0 = vector.load %arg1[%c0, %c0_0] : memref<64x16xf32, #tpu.memory_space<vmem>>, vector<64x16xf32>
    %c0_1 = arith.constant 0 : index
    %c0_2 = arith.constant 0 : index
    %c0_3 = arith.constant 0 : index
    %1 = vector.load %arg2[%c0_1, %c0_2, %c0_3] : memref<3x16x32xf32, #tpu.memory_space<vmem>>, vector<1x16x32xf32>
    %2 = vector.shape_cast %1 : vector<1x16x32xf32> to vector<16x32xf32>
    %cst = arith.constant dense<0.000000e+00> : vector<64x32xf32>
    %3 = tpu.matmul %0, %2, %cst {dimension_numbers = #tpu.dot_dimension_numbers<[1], [0], [0], [1], [0, 0, 1, 1], [], []>} : vector<64x16xf32>, vector<16x32xf32>, vector<64x32xf32> -> vector<64x32xf32>
    %c0_4 = arith.constant 0 : index
    %c0_5 = arith.constant 0 : index
    %c0_6 = arith.constant 0 : index
    %4 = vector.load %arg4[%c0_4, %c0_5, %c0_6] : memref<3x1x32xf32, #tpu.memory_space<vmem>>, vector<1x1x32xf32>
    %5 = vector.shape_cast %4 : vector<1x1x32xf32> to vector<1x32xf32>
    %6 = vector.broadcast %5 : vector<1x32xf32> to vector<64x32xf32>
    %7 = arith.addf %3, %6 : vector<64x32xf32>
    %c0_7 = arith.constant 0 : index
    %c0_8 = arith.constant 0 : index
    %c0_9 = arith.constant 0 : index
    %8 = vector.load %arg14[%c0_7, %c0_8, %c0_9] : memref<3x64x32xf32, #tpu.memory_space<vmem>>, vector<1x64x32xf32>
    %9 = vector.shape_cast %8 : vector<1x64x32xf32> to vector<64x32xf32>
    %10 = vector.shape_cast %7 : vector<64x32xf32> to vector<1x64x32xf32>
    tpu.vector_store %arg14[%c0_7, %c0_8, %c0_9], %10 {strides = array<i32>} : memref<3x64x32xf32, #tpu.memory_space<vmem>>, vector<1x64x32xf32>,
    %c1 = arith.constant 1 : index
    %c0_10 = arith.constant 0 : index
    %c0_11 = arith.constant 0 : index
    %11 = vector.load %arg2[%c1, %c0_10, %c0_11] : memref<3x16x32xf32, #tpu.memory_space<vmem>>, vector<1x16x32xf32>
    %12 = vector.shape_cast %11 : vector<1x16x32xf32> to vector<16x32xf32>
    %cst_12 = arith.constant dense<0.000000e+00> : vector<64x32xf32>
    %13 = tpu.matmul %0, %12, %cst_12 {dimension_numbers = #tpu.dot_dimension_numbers<[1], [0], [0], [1], [0, 0, 1, 1], [], []>} : vector<64x16xf32>, vector<16x32xf32>, vector<64x32xf32> -> vector<64x32xf32>
    %c1_13 = arith.constant 1 : index
    %c0_14 = arith.constant 0 : index
    %c0_15 = arith.constant 0 : index
    %14 = vector.load %arg4[%c1_13, %c0_14, %c0_15] : memref<3x1x32xf32, #tpu.memory_space<vmem>>, vector<1x1x32xf32>
    %15 = vector.shape_cast %14 : vector<1x1x32xf32> to vector<1x32xf32>
    %16 = vector.broadcast %15 : vector<1x32xf32> to vector<64x32xf32>
    %17 = arith.addf %13, %16 : vector<64x32xf32>
    %c1_16 = arith.constant 1 : index
    %c0_17 = arith.constant 0 : index
    %c0_18 = arith.constant 0 : index
    %18 = vector.load %arg14[%c1_16, %c0_17, %c0_18] : memref<3x64x32xf32, #tpu.memory_space<vmem>>, vector<1x64x32xf32>
    %19 = vector.shape_cast %18 : vector<1x64x32xf32> to vector<64x32xf32>
    %20 = vector.shape_cast %17 : vector<64x32xf32> to vector<1x64x32xf32>
    tpu.vector_store %arg14[%c1_16, %c0_17, %c0_18], %20 {strides = array<i32>} : memref<3x64x32xf32, #tpu.memory_space<vmem>>, vector<1x64x32xf32>,
    %c2 = arith.constant 2 : index
    %c0_19 = arith.constant 0 : index
    %c0_20 = arith.constant 0 : index
    %21 = vector.load %arg2[%c2, %c0_19, %c0_20] : memref<3x16x32xf32, #tpu.memory_space<vmem>>, vector<1x16x32xf32>
    %22 = vector.shape_cast %21 : vector<1x16x32xf32> to vector<16x32xf32>
    %cst_21 = arith.constant dense<0.000000e+00> : vector<64x32xf32>
    %23 = tpu.matmul %0, %22, %cst_21 {dimension_numbers = #tpu.dot_dimension_numbers<[1], [0], [0], [1], [0, 0, 1, 1], [], []>} : vector<64x16xf32>, vector<16x32xf32>, vector<64x32xf32> -> vector<64x32xf32>
    %c2_22 = arith.constant 2 : index
    %c0_23 = arith.constant 0 : index
    %c0_24 = arith.constant 0 : index
    %24 = vector.load %arg4[%c2_22, %c0_23, %c0_24] : memref<3x1x32xf32, #tpu.memory_space<vmem>>, vector<1x1x32xf32>
    %25 = vector.shape_cast %24 : vector<1x1x32xf32> to vector<1x32xf32>
    %26 = vector.broadcast %25 : vector<1x32xf32> to vector<64x32xf32>
    %27 = arith.addf %23, %26 : vector<64x32xf32>
    %c2_25 = arith.constant 2 : index
    %c0_26 = arith.constant 0 : index
    %c0_27 = arith.constant 0 : index
    %28 = vector.load %arg14[%c2_25, %c0_26, %c0_27] : memref<3x64x32xf32, #tpu.memory_space<vmem>>, vector<1x64x32xf32>
    %29 = vector.shape_cast %28 : vector<1x64x32xf32> to vector<64x32xf32>
    %30 = vector.shape_cast %27 : vector<64x32xf32> to vector<1x64x32xf32>
    tpu.vector_store %arg14[%c2_25, %c0_26, %c0_27], %30 {strides = array<i32>} : memref<3x64x32xf32, #tpu.memory_space<vmem>>, vector<1x64x32xf32>,
    %c0_28 = arith.constant 0 : index
    %c0_29 = arith.constant 0 : index
    %c0_30 = arith.constant 0 : index
    %31 = vector.load %arg3[%c0_28, %c0_29, %c0_30] : memref<3x32x32xf32, #tpu.memory_space<vmem>>, vector<1x32x32xf32>
    %32 = vector.shape_cast %31 : vector<1x32x32xf32> to vector<32x32xf32>
    %c1_31 = arith.constant 1 : index
    %c0_32 = arith.constant 0 : index
    %c0_33 = arith.constant 0 : index
    %33 = vector.load %arg3[%c1_31, %c0_32, %c0_33] : memref<3x32x32xf32, #tpu.memory_space<vmem>>, vector<1x32x32xf32>
    %34 = vector.shape_cast %33 : vector<1x32x32xf32> to vector<32x32xf32>
    %c2_34 = arith.constant 2 : index
    %c0_35 = arith.constant 0 : index
    %c0_36 = arith.constant 0 : index
    %35 = vector.load %arg3[%c2_34, %c0_35, %c0_36] : memref<3x32x32xf32, #tpu.memory_space<vmem>>, vector<1x32x32xf32>
    %36 = vector.shape_cast %35 : vector<1x32x32xf32> to vector<32x32xf32>
    %c0_37 = arith.constant 0 : index
    %c0_38 = arith.constant 0 : index
    %37 = vector.load %arg5[%c0_37, %c0_38] : memref<1x32xf32, #tpu.memory_space<vmem>>, vector<1x32xf32>
    %cst_39 = arith.constant 0.000000e+00 : f32
    %38 = vector.broadcast %cst_39 : f32 to vector<8x32xf32>
    %c0_i32 = arith.constant 0 : i32
    %c8_i32 = arith.constant 8 : i32
    %39 = arith.muli %c0_i32, %c8_i32 : i32
    %40 = tpu.assume_multiple %39, 8 : i32
    %cst_40 = arith.constant dense<0.000000e+00> : vector<8x32xf32>
    %41 = tpu.matmul %38, %32, %cst_40 {dimension_numbers = #tpu.dot_dimension_numbers<[1], [0], [0], [1], [0, 0, 1, 1], [], []>} : vector<8x32xf32>, vector<32x32xf32>, vector<8x32xf32> -> vector<8x32xf32>
    %cst_41 = arith.constant dense<0.000000e+00> : vector<8x32xf32>
    %42 = tpu.matmul %38, %34, %cst_41 {dimension_numbers = #tpu.dot_dimension_numbers<[1], [0], [0], [1], [0, 0, 1, 1], [], []>} : vector<8x32xf32>, vector<32x32xf32>, vector<8x32xf32> -> vector<8x32xf32>
    %cst_42 = arith.constant dense<0.000000e+00> : vector<8x32xf32>
    %43 = tpu.matmul %38, %36, %cst_42 {dimension_numbers = #tpu.dot_dimension_numbers<[1], [0], [0], [1], [0, 0, 1, 1], [], []>} : vector<8x32xf32>, vector<32x32xf32>, vector<8x32xf32> -> vector<8x32xf32>
    %44 = vector.broadcast %37 : vector<1x32xf32> to vector<8x32xf32>
    %45 = arith.addf %43, %44 : vector<8x32xf32>
    %c0_43 = arith.constant 0 : index
    %46 = arith.index_cast %40 : i32 to index
    %c0_44 = arith.constant 0 : index
    %47 = vector.load %arg14[%c0_43, %46, %c0_44] : memref<3x64x32xf32, #tpu.memory_space<vmem>>, vector<1x8x32xf32>
    %48 = vector.shape_cast %47 : vector<1x8x32xf32> to vector<8x32xf32>
    %49 = arith.addf %48, %41 : vector<8x32xf32>
    %50 = arith.negf %49 : vector<8x32xf32>
    %51 = math.exp %50 : vector<8x32xf32>
    %cst_45 = arith.constant 1.000000e+00 : f32
    %52 = vector.broadcast %cst_45 : f32 to vector<8x32xf32>
    %53 = arith.addf %52, %51 : vector<8x32xf32>
    %54 = arith.divf %52, %53 : vector<8x32xf32>
    %c1_46 = arith.constant 1 : index
    %55 = arith.index_cast %40 : i32 to index
    %c0_47 = arith.constant 0 : index
    %56 = vector.load %arg14[%c1_46, %55, %c0_47] : memref<3x64x32xf32, #tpu.memory_space<vmem>>, vector<1x8x32xf32>
    %57 = vector.shape_cast %56 : vector<1x8x32xf32> to vector<8x32xf32>
    %58 = arith.addf %57, %42 : vector<8x32xf32>
    %59 = arith.negf %58 : vector<8x32xf32>
    %60 = math.exp %59 : vector<8x32xf32>
    %cst_48 = arith.constant 1.000000e+00 : f32
    %61 = vector.broadcast %cst_48 : f32 to vector<8x32xf32>
    %62 = arith.addf %61, %60 : vector<8x32xf32>
    %63 = arith.divf %61, %62 : vector<8x32xf32>
    %c2_49 = arith.constant 2 : index
    %64 = arith.index_cast %40 : i32 to index
    %c0_50 = arith.constant 0 : index
    %65 = vector.load %arg14[%c2_49, %64, %c0_50] : memref<3x64x32xf32, #tpu.memory_space<vmem>>, vector<1x8x32xf32>
    %66 = vector.shape_cast %65 : vector<1x8x32xf32> to vector<8x32xf32>
    %67 = arith.mulf %54, %45 : vector<8x32xf32>
    %68 = arith.addf %66, %67 : vector<8x32xf32>
    %69 = math.tanh %68 : vector<8x32xf32>
    %70 = arith.subf %38, %69 : vector<8x32xf32>
    %71 = arith.mulf %63, %70 : vector<8x32xf32>
    %72 = arith.addf %69, %71 : vector<8x32xf32>
    %73 = arith.index_cast %40 : i32 to index
    %c0_51 = arith.constant 0 : index
    %74 = vector.load %arg13[%73, %c0_51] : memref<64x32xf32, #tpu.memory_space<vmem>>, vector<8x32xf32>
    tpu.vector_store %arg13[%73, %c0_51], %72 {strides = array<i32>} : memref<64x32xf32, #tpu.memory_space<vmem>>, vector<8x32xf32>,
    %c1_i32 = arith.constant 1 : i32
    %c8_i32_52 = arith.constant 8 : i32
    %75 = arith.muli %c1_i32, %c8_i32_52 : i32
    %76 = tpu.assume_multiple %75, 8 : i32
    %cst_53 = arith.constant dense<0.000000e+00> : vector<8x32xf32>
    %77 = tpu.matmul %72, %32, %cst_53 {dimension_numbers = #tpu.dot_dimension_numbers<[1], [0], [0], [1], [0, 0, 1, 1], [], []>} : vector<8x32xf32>, vector<32x32xf32>, vector<8x32xf32> -> vector<8x32xf32>
    %cst_54 = arith.constant dense<0.000000e+00> : vector<8x32xf32>
    %78 = tpu.matmul %72, %34, %cst_54 {dimension_numbers = #tpu.dot_dimension_numbers<[1], [0], [0], [1], [0, 0, 1, 1], [], []>} : vector<8x32xf32>, vector<32x32xf32>, vector<8x32xf32> -> vector<8x32xf32>
    %cst_55 = arith.constant dense<0.000000e+00> : vector<8x32xf32>
    %79 = tpu.matmul %72, %36, %cst_55 {dimension_numbers = #tpu.dot_dimension_numbers<[1], [0], [0], [1], [0, 0, 1, 1], [], []>} : vector<8x32xf32>, vector<32x32xf32>, vector<8x32xf32> -> vector<8x32xf32>
    %80 = vector.broadcast %37 : vector<1x32xf32> to vector<8x32xf32>
    %81 = arith.addf %79, %80 : vector<8x32xf32>
    %c0_56 = arith.constant 0 : index
    %82 = arith.index_cast %76 : i32 to index
    %c0_57 = arith.constant 0 : index
    %83 = vector.load %arg14[%c0_56, %82, %c0_57] : memref<3x64x32xf32, #tpu.memory_space<vmem>>, vector<1x8x32xf32>
    %84 = vector.shape_cast %83 : vector<1x8x32xf32> to vector<8x32xf32>
    %85 = arith.addf %84, %77 : vector<8x32xf32>
    %86 = arith.negf %85 : vector<8x32xf32>
    %87 = math.exp %86 : vector<8x32xf32>
    %cst_58 = arith.constant 1.000000e+00 : f32
    %88 = vector.broadcast %cst_58 : f32 to vector<8x32xf32>
    %89 = arith.addf %88, %87 : vector<8x32xf32>
    %90 = arith.divf %88, %89 : vector<8x32xf32>
    %c1_59 = arith.constant 1 : index
    %91 = arith.index_cast %76 : i32 to index
    %c0_60 = arith.constant 0 : index
    %92 = vector.load %arg14[%c1_59, %91, %c0_60] : memref<3x64x32xf32, #tpu.memory_space<vmem>>, vector<1x8x32xf32>
    %93 = vector.shape_cast %92 : vector<1x8x32xf32> to vector<8x32xf32>
    %94 = arith.addf %93, %78 : vector<8x32xf32>
    %95 = arith.negf %94 : vector<8x32xf32>
    %96 = math.exp %95 : vector<8x32xf32>
    %cst_61 = arith.constant 1.000000e+00 : f32
    %97 = vector.broadcast %cst_61 : f32 to vector<8x32xf32>
    %98 = arith.addf %97, %96 : vector<8x32xf32>
    %99 = arith.divf %97, %98 : vector<8x32xf32>
    %c2_62 = arith.constant 2 : index
    %100 = arith.index_cast %76 : i32 to index
    %c0_63 = arith.constant 0 : index
    %101 = vector.load %arg14[%c2_62, %100, %c0_63] : memref<3x64x32xf32, #tpu.memory_space<vmem>>, vector<1x8x32xf32>
    %102 = vector.shape_cast %101 : vector<1x8x32xf32> to vector<8x32xf32>
    %103 = arith.mulf %90, %81 : vector<8x32xf32>
    %104 = arith.addf %102, %103 : vector<8x32xf32>
    %105 = math.tanh %104 : vector<8x32xf32>
    %106 = arith.subf %72, %105 : vector<8x32xf32>
    %107 = arith.mulf %99, %106 : vector<8x32xf32>
    %108 = arith.addf %105, %107 : vector<8x32xf32>
    %109 = arith.index_cast %76 : i32 to index
    %c0_64 = arith.constant 0 : index
    %110 = vector.load %arg13[%109, %c0_64] : memref<64x32xf32, #tpu.memory_space<vmem>>, vector<8x32xf32>
    tpu.vector_store %arg13[%109, %c0_64], %108 {strides = array<i32>} : memref<64x32xf32, #tpu.memory_space<vmem>>, vector<8x32xf32>,
    %c2_i32 = arith.constant 2 : i32
    %c8_i32_65 = arith.constant 8 : i32
    %111 = arith.muli %c2_i32, %c8_i32_65 : i32
    %112 = tpu.assume_multiple %111, 8 : i32
    %cst_66 = arith.constant dense<0.000000e+00> : vector<8x32xf32>
    %113 = tpu.matmul %108, %32, %cst_66 {dimension_numbers = #tpu.dot_dimension_numbers<[1], [0], [0], [1], [0, 0, 1, 1], [], []>} : vector<8x32xf32>, vector<32x32xf32>, vector<8x32xf32> -> vector<8x32xf32>
    %cst_67 = arith.constant dense<0.000000e+00> : vector<8x32xf32>
    %114 = tpu.matmul %108, %34, %cst_67 {dimension_numbers = #tpu.dot_dimension_numbers<[1], [0], [0], [1], [0, 0, 1, 1], [], []>} : vector<8x32xf32>, vector<32x32xf32>, vector<8x32xf32> -> vector<8x32xf32>
    %cst_68 = arith.constant dense<0.000000e+00> : vector<8x32xf32>
    %115 = tpu.matmul %108, %36, %cst_68 {dimension_numbers = #tpu.dot_dimension_numbers<[1], [0], [0], [1], [0, 0, 1, 1], [], []>} : vector<8x32xf32>, vector<32x32xf32>, vector<8x32xf32> -> vector<8x32xf32>
    %116 = vector.broadcast %37 : vector<1x32xf32> to vector<8x32xf32>
    %117 = arith.addf %115, %116 : vector<8x32xf32>
    %c0_69 = arith.constant 0 : index
    %118 = arith.index_cast %112 : i32 to index
    %c0_70 = arith.constant 0 : index
    %119 = vector.load %arg14[%c0_69, %118, %c0_70] : memref<3x64x32xf32, #tpu.memory_space<vmem>>, vector<1x8x32xf32>
    %120 = vector.shape_cast %119 : vector<1x8x32xf32> to vector<8x32xf32>
    %121 = arith.addf %120, %113 : vector<8x32xf32>
    %122 = arith.negf %121 : vector<8x32xf32>
    %123 = math.exp %122 : vector<8x32xf32>
    %cst_71 = arith.constant 1.000000e+00 : f32
    %124 = vector.broadcast %cst_71 : f32 to vector<8x32xf32>
    %125 = arith.addf %124, %123 : vector<8x32xf32>
    %126 = arith.divf %124, %125 : vector<8x32xf32>
    %c1_72 = arith.constant 1 : index
    %127 = arith.index_cast %112 : i32 to index
    %c0_73 = arith.constant 0 : index
    %128 = vector.load %arg14[%c1_72, %127, %c0_73] : memref<3x64x32xf32, #tpu.memory_space<vmem>>, vector<1x8x32xf32>
    %129 = vector.shape_cast %128 : vector<1x8x32xf32> to vector<8x32xf32>
    %130 = arith.addf %129, %114 : vector<8x32xf32>
    %131 = arith.negf %130 : vector<8x32xf32>
    %132 = math.exp %131 : vector<8x32xf32>
    %cst_74 = arith.constant 1.000000e+00 : f32
    %133 = vector.broadcast %cst_74 : f32 to vector<8x32xf32>
    %134 = arith.addf %133, %132 : vector<8x32xf32>
    %135 = arith.divf %133, %134 : vector<8x32xf32>
    %c2_75 = arith.constant 2 : index
    %136 = arith.index_cast %112 : i32 to index
    %c0_76 = arith.constant 0 : index
    %137 = vector.load %arg14[%c2_75, %136, %c0_76] : memref<3x64x32xf32, #tpu.memory_space<vmem>>, vector<1x8x32xf32>
    %138 = vector.shape_cast %137 : vector<1x8x32xf32> to vector<8x32xf32>
    %139 = arith.mulf %126, %117 : vector<8x32xf32>
    %140 = arith.addf %138, %139 : vector<8x32xf32>
    %141 = math.tanh %140 : vector<8x32xf32>
    %142 = arith.subf %108, %141 : vector<8x32xf32>
    %143 = arith.mulf %135, %142 : vector<8x32xf32>
    %144 = arith.addf %141, %143 : vector<8x32xf32>
    %145 = arith.index_cast %112 : i32 to index
    %c0_77 = arith.constant 0 : index
    %146 = vector.load %arg13[%145, %c0_77] : memref<64x32xf32, #tpu.memory_space<vmem>>, vector<8x32xf32>
    tpu.vector_store %arg13[%145, %c0_77], %144 {strides = array<i32>} : memref<64x32xf32, #tpu.memory_space<vmem>>, vector<8x32xf32>,
    %c3_i32 = arith.constant 3 : i32
    %c8_i32_78 = arith.constant 8 : i32
    %147 = arith.muli %c3_i32, %c8_i32_78 : i32
    %148 = tpu.assume_multiple %147, 8 : i32
    %cst_79 = arith.constant dense<0.000000e+00> : vector<8x32xf32>
    %149 = tpu.matmul %144, %32, %cst_79 {dimension_numbers = #tpu.dot_dimension_numbers<[1], [0], [0], [1], [0, 0, 1, 1], [], []>} : vector<8x32xf32>, vector<32x32xf32>, vector<8x32xf32> -> vector<8x32xf32>
    %cst_80 = arith.constant dense<0.000000e+00> : vector<8x32xf32>
    %150 = tpu.matmul %144, %34, %cst_80 {dimension_numbers = #tpu.dot_dimension_numbers<[1], [0], [0], [1], [0, 0, 1, 1], [], []>} : vector<8x32xf32>, vector<32x32xf32>, vector<8x32xf32> -> vector<8x32xf32>
    %cst_81 = arith.constant dense<0.000000e+00> : vector<8x32xf32>
    %151 = tpu.matmul %144, %36, %cst_81 {dimension_numbers = #tpu.dot_dimension_numbers<[1], [0], [0], [1], [0, 0, 1, 1], [], []>} : vector<8x32xf32>, vector<32x32xf32>, vector<8x32xf32> -> vector<8x32xf32>
    %152 = vector.broadcast %37 : vector<1x32xf32> to vector<8x32xf32>
    %153 = arith.addf %151, %152 : vector<8x32xf32>
    %c0_82 = arith.constant 0 : index
    %154 = arith.index_cast %148 : i32 to index
    %c0_83 = arith.constant 0 : index
    %155 = vector.load %arg14[%c0_82, %154, %c0_83] : memref<3x64x32xf32, #tpu.memory_space<vmem>>, vector<1x8x32xf32>
    %156 = vector.shape_cast %155 : vector<1x8x32xf32> to vector<8x32xf32>
    %157 = arith.addf %156, %149 : vector<8x32xf32>
    %158 = arith.negf %157 : vector<8x32xf32>
    %159 = math.exp %158 : vector<8x32xf32>
    %cst_84 = arith.constant 1.000000e+00 : f32
    %160 = vector.broadcast %cst_84 : f32 to vector<8x32xf32>
    %161 = arith.addf %160, %159 : vector<8x32xf32>
    %162 = arith.divf %160, %161 : vector<8x32xf32>
    %c1_85 = arith.constant 1 : index
    %163 = arith.index_cast %148 : i32 to index
    %c0_86 = arith.constant 0 : index
    %164 = vector.load %arg14[%c1_85, %163, %c0_86] : memref<3x64x32xf32, #tpu.memory_space<vmem>>, vector<1x8x32xf32>
    %165 = vector.shape_cast %164 : vector<1x8x32xf32> to vector<8x32xf32>
    %166 = arith.addf %165, %150 : vector<8x32xf32>
    %167 = arith.negf %166 : vector<8x32xf32>
    %168 = math.exp %167 : vector<8x32xf32>
    %cst_87 = arith.constant 1.000000e+00 : f32
    %169 = vector.broadcast %cst_87 : f32 to vector<8x32xf32>
    %170 = arith.addf %169, %168 : vector<8x32xf32>
    %171 = arith.divf %169, %170 : vector<8x32xf32>
    %c2_88 = arith.constant 2 : index
    %172 = arith.index_cast %148 : i32 to index
    %c0_89 = arith.constant 0 : index
    %173 = vector.load %arg14[%c2_88, %172, %c0_89] : memref<3x64x32xf32, #tpu.memory_space<vmem>>, vector<1x8x32xf32>
    %174 = vector.shape_cast %173 : vector<1x8x32xf32> to vector<8x32xf32>
    %175 = arith.mulf %162, %153 : vector<8x32xf32>
    %176 = arith.addf %174, %175 : vector<8x32xf32>
    %177 = math.tanh %176 : vector<8x32xf32>
    %178 = arith.subf %144, %177 : vector<8x32xf32>
    %179 = arith.mulf %171, %178 : vector<8x32xf32>
    %180 = arith.addf %177, %179 : vector<8x32xf32>
    %181 = arith.index_cast %148 : i32 to index
    %c0_90 = arith.constant 0 : index
    %182 = vector.load %arg13[%181, %c0_90] : memref<64x32xf32, #tpu.memory_space<vmem>>, vector<8x32xf32>
    tpu.vector_store %arg13[%181, %c0_90], %180 {strides = array<i32>} : memref<64x32xf32, #tpu.memory_space<vmem>>, vector<8x32xf32>,
    %c4_i32 = arith.constant 4 : i32
    %c8_i32_91 = arith.constant 8 : i32
    %183 = arith.muli %c4_i32, %c8_i32_91 : i32
    %184 = tpu.assume_multiple %183, 8 : i32
    %cst_92 = arith.constant dense<0.000000e+00> : vector<8x32xf32>
    %185 = tpu.matmul %180, %32, %cst_92 {dimension_numbers = #tpu.dot_dimension_numbers<[1], [0], [0], [1], [0, 0, 1, 1], [], []>} : vector<8x32xf32>, vector<32x32xf32>, vector<8x32xf32> -> vector<8x32xf32>
    %cst_93 = arith.constant dense<0.000000e+00> : vector<8x32xf32>
    %186 = tpu.matmul %180, %34, %cst_93 {dimension_numbers = #tpu.dot_dimension_numbers<[1], [0], [0], [1], [0, 0, 1, 1], [], []>} : vector<8x32xf32>, vector<32x32xf32>, vector<8x32xf32> -> vector<8x32xf32>
    %cst_94 = arith.constant dense<0.000000e+00> : vector<8x32xf32>
    %187 = tpu.matmul %180, %36, %cst_94 {dimension_numbers = #tpu.dot_dimension_numbers<[1], [0], [0], [1], [0, 0, 1, 1], [], []>} : vector<8x32xf32>, vector<32x32xf32>, vector<8x32xf32> -> vector<8x32xf32>
    %188 = vector.broadcast %37 : vector<1x32xf32> to vector<8x32xf32>
    %189 = arith.addf %187, %188 : vector<8x32xf32>
    %c0_95 = arith.constant 0 : index
    %190 = arith.index_cast %184 : i32 to index
    %c0_96 = arith.constant 0 : index
    %191 = vector.load %arg14[%c0_95, %190, %c0_96] : memref<3x64x32xf32, #tpu.memory_space<vmem>>, vector<1x8x32xf32>
    %192 = vector.shape_cast %191 : vector<1x8x32xf32> to vector<8x32xf32>
    %193 = arith.addf %192, %185 : vector<8x32xf32>
    %194 = arith.negf %193 : vector<8x32xf32>
    %195 = math.exp %194 : vector<8x32xf32>
    %cst_97 = arith.constant 1.000000e+00 : f32
    %196 = vector.broadcast %cst_97 : f32 to vector<8x32xf32>
    %197 = arith.addf %196, %195 : vector<8x32xf32>
    %198 = arith.divf %196, %197 : vector<8x32xf32>
    %c1_98 = arith.constant 1 : index
    %199 = arith.index_cast %184 : i32 to index
    %c0_99 = arith.constant 0 : index
    %200 = vector.load %arg14[%c1_98, %199, %c0_99] : memref<3x64x32xf32, #tpu.memory_space<vmem>>, vector<1x8x32xf32>
    %201 = vector.shape_cast %200 : vector<1x8x32xf32> to vector<8x32xf32>
    %202 = arith.addf %201, %186 : vector<8x32xf32>
    %203 = arith.negf %202 : vector<8x32xf32>
    %204 = math.exp %203 : vector<8x32xf32>
    %cst_100 = arith.constant 1.000000e+00 : f32
    %205 = vector.broadcast %cst_100 : f32 to vector<8x32xf32>
    %206 = arith.addf %205, %204 : vector<8x32xf32>
    %207 = arith.divf %205, %206 : vector<8x32xf32>
    %c2_101 = arith.constant 2 : index
    %208 = arith.index_cast %184 : i32 to index
    %c0_102 = arith.constant 0 : index
    %209 = vector.load %arg14[%c2_101, %208, %c0_102] : memref<3x64x32xf32, #tpu.memory_space<vmem>>, vector<1x8x32xf32>
    %210 = vector.shape_cast %209 : vector<1x8x32xf32> to vector<8x32xf32>
    %211 = arith.mulf %198, %189 : vector<8x32xf32>
    %212 = arith.addf %210, %211 : vector<8x32xf32>
    %213 = math.tanh %212 : vector<8x32xf32>
    %214 = arith.subf %180, %213 : vector<8x32xf32>
    %215 = arith.mulf %207, %214 : vector<8x32xf32>
    %216 = arith.addf %213, %215 : vector<8x32xf32>
    %217 = arith.index_cast %184 : i32 to index
    %c0_103 = arith.constant 0 : index
    %218 = vector.load %arg13[%217, %c0_103] : memref<64x32xf32, #tpu.memory_space<vmem>>, vector<8x32xf32>
    tpu.vector_store %arg13[%217, %c0_103], %216 {strides = array<i32>} : memref<64x32xf32, #tpu.memory_space<vmem>>, vector<8x32xf32>,
    %c5_i32 = arith.constant 5 : i32
    %c8_i32_104 = arith.constant 8 : i32
    %219 = arith.muli %c5_i32, %c8_i32_104 : i32
    %220 = tpu.assume_multiple %219, 8 : i32
    %cst_105 = arith.constant dense<0.000000e+00> : vector<8x32xf32>
    %221 = tpu.matmul %216, %32, %cst_105 {dimension_numbers = #tpu.dot_dimension_numbers<[1], [0], [0], [1], [0, 0, 1, 1], [], []>} : vector<8x32xf32>, vector<32x32xf32>, vector<8x32xf32> -> vector<8x32xf32>
    %cst_106 = arith.constant dense<0.000000e+00> : vector<8x32xf32>
    %222 = tpu.matmul %216, %34, %cst_106 {dimension_numbers = #tpu.dot_dimension_numbers<[1], [0], [0], [1], [0, 0, 1, 1], [], []>} : vector<8x32xf32>, vector<32x32xf32>, vector<8x32xf32> -> vector<8x32xf32>
    %cst_107 = arith.constant dense<0.000000e+00> : vector<8x32xf32>
    %223 = tpu.matmul %216, %36, %cst_107 {dimension_numbers = #tpu.dot_dimension_numbers<[1], [0], [0], [1], [0, 0, 1, 1], [], []>} : vector<8x32xf32>, vector<32x32xf32>, vector<8x32xf32> -> vector<8x32xf32>
    %224 = vector.broadcast %37 : vector<1x32xf32> to vector<8x32xf32>
    %225 = arith.addf %223, %224 : vector<8x32xf32>
    %c0_108 = arith.constant 0 : index
    %226 = arith.index_cast %220 : i32 to index
    %c0_109 = arith.constant 0 : index
    %227 = vector.load %arg14[%c0_108, %226, %c0_109] : memref<3x64x32xf32, #tpu.memory_space<vmem>>, vector<1x8x32xf32>
    %228 = vector.shape_cast %227 : vector<1x8x32xf32> to vector<8x32xf32>
    %229 = arith.addf %228, %221 : vector<8x32xf32>
    %230 = arith.negf %229 : vector<8x32xf32>
    %231 = math.exp %230 : vector<8x32xf32>
    %cst_110 = arith.constant 1.000000e+00 : f32
    %232 = vector.broadcast %cst_110 : f32 to vector<8x32xf32>
    %233 = arith.addf %232, %231 : vector<8x32xf32>
    %234 = arith.divf %232, %233 : vector<8x32xf32>
    %c1_111 = arith.constant 1 : index
    %235 = arith.index_cast %220 : i32 to index
    %c0_112 = arith.constant 0 : index
    %236 = vector.load %arg14[%c1_111, %235, %c0_112] : memref<3x64x32xf32, #tpu.memory_space<vmem>>, vector<1x8x32xf32>
    %237 = vector.shape_cast %236 : vector<1x8x32xf32> to vector<8x32xf32>
    %238 = arith.addf %237, %222 : vector<8x32xf32>
    %239 = arith.negf %238 : vector<8x32xf32>
    %240 = math.exp %239 : vector<8x32xf32>
    %cst_113 = arith.constant 1.000000e+00 : f32
    %241 = vector.broadcast %cst_113 : f32 to vector<8x32xf32>
    %242 = arith.addf %241, %240 : vector<8x32xf32>
    %243 = arith.divf %241, %242 : vector<8x32xf32>
    %c2_114 = arith.constant 2 : index
    %244 = arith.index_cast %220 : i32 to index
    %c0_115 = arith.constant 0 : index
    %245 = vector.load %arg14[%c2_114, %244, %c0_115] : memref<3x64x32xf32, #tpu.memory_space<vmem>>, vector<1x8x32xf32>
    %246 = vector.shape_cast %245 : vector<1x8x32xf32> to vector<8x32xf32>
    %247 = arith.mulf %234, %225 : vector<8x32xf32>
    %248 = arith.addf %246, %247 : vector<8x32xf32>
    %249 = math.tanh %248 : vector<8x32xf32>
    %250 = arith.subf %216, %249 : vector<8x32xf32>
    %251 = arith.mulf %243, %250 : vector<8x32xf32>
    %252 = arith.addf %249, %251 : vector<8x32xf32>
    %253 = arith.index_cast %220 : i32 to index
    %c0_116 = arith.constant 0 : index
    %254 = vector.load %arg13[%253, %c0_116] : memref<64x32xf32, #tpu.memory_space<vmem>>, vector<8x32xf32>
    tpu.vector_store %arg13[%253, %c0_116], %252 {strides = array<i32>} : memref<64x32xf32, #tpu.memory_space<vmem>>, vector<8x32xf32>,
    %c6_i32 = arith.constant 6 : i32
    %c8_i32_117 = arith.constant 8 : i32
    %255 = arith.muli %c6_i32, %c8_i32_117 : i32
    %256 = tpu.assume_multiple %255, 8 : i32
    %cst_118 = arith.constant dense<0.000000e+00> : vector<8x32xf32>
    %257 = tpu.matmul %252, %32, %cst_118 {dimension_numbers = #tpu.dot_dimension_numbers<[1], [0], [0], [1], [0, 0, 1, 1], [], []>} : vector<8x32xf32>, vector<32x32xf32>, vector<8x32xf32> -> vector<8x32xf32>
    %cst_119 = arith.constant dense<0.000000e+00> : vector<8x32xf32>
    %258 = tpu.matmul %252, %34, %cst_119 {dimension_numbers = #tpu.dot_dimension_numbers<[1], [0], [0], [1], [0, 0, 1, 1], [], []>} : vector<8x32xf32>, vector<32x32xf32>, vector<8x32xf32> -> vector<8x32xf32>
    %cst_120 = arith.constant dense<0.000000e+00> : vector<8x32xf32>
    %259 = tpu.matmul %252, %36, %cst_120 {dimension_numbers = #tpu.dot_dimension_numbers<[1], [0], [0], [1], [0, 0, 1, 1], [], []>} : vector<8x32xf32>, vector<32x32xf32>, vector<8x32xf32> -> vector<8x32xf32>
    %260 = vector.broadcast %37 : vector<1x32xf32> to vector<8x32xf32>
    %261 = arith.addf %259, %260 : vector<8x32xf32>
    %c0_121 = arith.constant 0 : index
    %262 = arith.index_cast %256 : i32 to index
    %c0_122 = arith.constant 0 : index
    %263 = vector.load %arg14[%c0_121, %262, %c0_122] : memref<3x64x32xf32, #tpu.memory_space<vmem>>, vector<1x8x32xf32>
    %264 = vector.shape_cast %263 : vector<1x8x32xf32> to vector<8x32xf32>
    %265 = arith.addf %264, %257 : vector<8x32xf32>
    %266 = arith.negf %265 : vector<8x32xf32>
    %267 = math.exp %266 : vector<8x32xf32>
    %cst_123 = arith.constant 1.000000e+00 : f32
    %268 = vector.broadcast %cst_123 : f32 to vector<8x32xf32>
    %269 = arith.addf %268, %267 : vector<8x32xf32>
    %270 = arith.divf %268, %269 : vector<8x32xf32>
    %c1_124 = arith.constant 1 : index
    %271 = arith.index_cast %256 : i32 to index
    %c0_125 = arith.constant 0 : index
    %272 = vector.load %arg14[%c1_124, %271, %c0_125] : memref<3x64x32xf32, #tpu.memory_space<vmem>>, vector<1x8x32xf32>
    %273 = vector.shape_cast %272 : vector<1x8x32xf32> to vector<8x32xf32>
    %274 = arith.addf %273, %258 : vector<8x32xf32>
    %275 = arith.negf %274 : vector<8x32xf32>
    %276 = math.exp %275 : vector<8x32xf32>
    %cst_126 = arith.constant 1.000000e+00 : f32
    %277 = vector.broadcast %cst_126 : f32 to vector<8x32xf32>
    %278 = arith.addf %277, %276 : vector<8x32xf32>
    %279 = arith.divf %277, %278 : vector<8x32xf32>
    %c2_127 = arith.constant 2 : index
    %280 = arith.index_cast %256 : i32 to index
    %c0_128 = arith.constant 0 : index
    %281 = vector.load %arg14[%c2_127, %280, %c0_128] : memref<3x64x32xf32, #tpu.memory_space<vmem>>, vector<1x8x32xf32>
    %282 = vector.shape_cast %281 : vector<1x8x32xf32> to vector<8x32xf32>
    %283 = arith.mulf %270, %261 : vector<8x32xf32>
    %284 = arith.addf %282, %283 : vector<8x32xf32>
    %285 = math.tanh %284 : vector<8x32xf32>
    %286 = arith.subf %252, %285 : vector<8x32xf32>
    %287 = arith.mulf %279, %286 : vector<8x32xf32>
    %288 = arith.addf %285, %287 : vector<8x32xf32>
    %289 = arith.index_cast %256 : i32 to index
    %c0_129 = arith.constant 0 : index
    %290 = vector.load %arg13[%289, %c0_129] : memref<64x32xf32, #tpu.memory_space<vmem>>, vector<8x32xf32>
    tpu.vector_store %arg13[%289, %c0_129], %288 {strides = array<i32>} : memref<64x32xf32, #tpu.memory_space<vmem>>, vector<8x32xf32>,
    %c7_i32 = arith.constant 7 : i32
    %c8_i32_130 = arith.constant 8 : i32
    %291 = arith.muli %c7_i32, %c8_i32_130 : i32
    %292 = tpu.assume_multiple %291, 8 : i32
    %cst_131 = arith.constant dense<0.000000e+00> : vector<8x32xf32>
    %293 = tpu.matmul %288, %32, %cst_131 {dimension_numbers = #tpu.dot_dimension_numbers<[1], [0], [0], [1], [0, 0, 1, 1], [], []>} : vector<8x32xf32>, vector<32x32xf32>, vector<8x32xf32> -> vector<8x32xf32>
    %cst_132 = arith.constant dense<0.000000e+00> : vector<8x32xf32>
    %294 = tpu.matmul %288, %34, %cst_132 {dimension_numbers = #tpu.dot_dimension_numbers<[1], [0], [0], [1], [0, 0, 1, 1], [], []>} : vector<8x32xf32>, vector<32x32xf32>, vector<8x32xf32> -> vector<8x32xf32>
    %cst_133 = arith.constant dense<0.000000e+00> : vector<8x32xf32>
    %295 = tpu.matmul %288, %36, %cst_133 {dimension_numbers = #tpu.dot_dimension_numbers<[1], [0], [0], [1], [0, 0, 1, 1], [], []>} : vector<8x32xf32>, vector<32x32xf32>, vector<8x32xf32> -> vector<8x32xf32>
    %296 = vector.broadcast %37 : vector<1x32xf32> to vector<8x32xf32>
    %297 = arith.addf %295, %296 : vector<8x32xf32>
    %c0_134 = arith.constant 0 : index
    %298 = arith.index_cast %292 : i32 to index
    %c0_135 = arith.constant 0 : index
    %299 = vector.load %arg14[%c0_134, %298, %c0_135] : memref<3x64x32xf32, #tpu.memory_space<vmem>>, vector<1x8x32xf32>
    %300 = vector.shape_cast %299 : vector<1x8x32xf32> to vector<8x32xf32>
    %301 = arith.addf %300, %293 : vector<8x32xf32>
    %302 = arith.negf %301 : vector<8x32xf32>
    %303 = math.exp %302 : vector<8x32xf32>
    %cst_136 = arith.constant 1.000000e+00 : f32
    %304 = vector.broadcast %cst_136 : f32 to vector<8x32xf32>
    %305 = arith.addf %304, %303 : vector<8x32xf32>
    %306 = arith.divf %304, %305 : vector<8x32xf32>
    %c1_137 = arith.constant 1 : index
    %307 = arith.index_cast %292 : i32 to index
    %c0_138 = arith.constant 0 : index
    %308 = vector.load %arg14[%c1_137, %307, %c0_138] : memref<3x64x32xf32, #tpu.memory_space<vmem>>, vector<1x8x32xf32>
    %309 = vector.shape_cast %308 : vector<1x8x32xf32> to vector<8x32xf32>
    %310 = arith.addf %309, %294 : vector<8x32xf32>
    %311 = arith.negf %310 : vector<8x32xf32>
    %312 = math.exp %311 : vector<8x32xf32>
    %cst_139 = arith.constant 1.000000e+00 : f32
    %313 = vector.broadcast %cst_139 : f32 to vector<8x32xf32>
    %314 = arith.addf %313, %312 : vector<8x32xf32>
    %315 = arith.divf %313, %314 : vector<8x32xf32>
    %c2_140 = arith.constant 2 : index
    %316 = arith.index_cast %292 : i32 to index
    %c0_141 = arith.constant 0 : index
    %317 = vector.load %arg14[%c2_140, %316, %c0_141] : memref<3x64x32xf32, #tpu.memory_space<vmem>>, vector<1x8x32xf32>
    %318 = vector.shape_cast %317 : vector<1x8x32xf32> to vector<8x32xf32>
    %319 = arith.mulf %306, %297 : vector<8x32xf32>
    %320 = arith.addf %318, %319 : vector<8x32xf32>
    %321 = math.tanh %320 : vector<8x32xf32>
    %322 = arith.subf %288, %321 : vector<8x32xf32>
    %323 = arith.mulf %315, %322 : vector<8x32xf32>
    %324 = arith.addf %321, %323 : vector<8x32xf32>
    %325 = arith.index_cast %292 : i32 to index
    %c0_142 = arith.constant 0 : index
    %326 = vector.load %arg13[%325, %c0_142] : memref<64x32xf32, #tpu.memory_space<vmem>>, vector<8x32xf32>
    tpu.vector_store %arg13[%325, %c0_142], %324 {strides = array<i32>} : memref<64x32xf32, #tpu.memory_space<vmem>>, vector<8x32xf32>,
    %c8_i32_143 = arith.constant 8 : i32
    %c0_144 = arith.constant 0 : index
    %c0_145 = arith.constant 0 : index
    %327 = vector.load %arg13[%c0_144, %c0_145] : memref<64x32xf32, #tpu.memory_space<vmem>>, vector<64x32xf32>
    %c0_146 = arith.constant 0 : index
    %c0_147 = arith.constant 0 : index
    %c0_148 = arith.constant 0 : index
    %328 = vector.load %arg6[%c0_146, %c0_147, %c0_148] : memref<3x32x32xf32, #tpu.memory_space<vmem>>, vector<1x32x32xf32>
    %329 = vector.shape_cast %328 : vector<1x32x32xf32> to vector<32x32xf32>
    %cst_149 = arith.constant dense<0.000000e+00> : vector<64x32xf32>
    %330 = tpu.matmul %327, %329, %cst_149 {dimension_numbers = #tpu.dot_dimension_numbers<[1], [0], [0], [1], [0, 0, 1, 1], [], []>} : vector<64x32xf32>, vector<32x32xf32>, vector<64x32xf32> -> vector<64x32xf32>
    %c0_150 = arith.constant 0 : index
    %c0_151 = arith.constant 0 : index
    %c0_152 = arith.constant 0 : index
    %331 = vector.load %arg8[%c0_150, %c0_151, %c0_152] : memref<3x1x32xf32, #tpu.memory_space<vmem>>, vector<1x1x32xf32>
    %332 = vector.shape_cast %331 : vector<1x1x32xf32> to vector<1x32xf32>
    %333 = vector.broadcast %332 : vector<1x32xf32> to vector<64x32xf32>
    %334 = arith.addf %330, %333 : vector<64x32xf32>
    %c0_153 = arith.constant 0 : index
    %c0_154 = arith.constant 0 : index
    %c0_155 = arith.constant 0 : index
    %335 = vector.load %arg14[%c0_153, %c0_154, %c0_155] : memref<3x64x32xf32, #tpu.memory_space<vmem>>, vector<1x64x32xf32>
    %336 = vector.shape_cast %335 : vector<1x64x32xf32> to vector<64x32xf32>
    %337 = vector.shape_cast %334 : vector<64x32xf32> to vector<1x64x32xf32>
    tpu.vector_store %arg14[%c0_153, %c0_154, %c0_155], %337 {strides = array<i32>} : memref<3x64x32xf32, #tpu.memory_space<vmem>>, vector<1x64x32xf32>,
    %c1_156 = arith.constant 1 : index
    %c0_157 = arith.constant 0 : index
    %c0_158 = arith.constant 0 : index
    %338 = vector.load %arg6[%c1_156, %c0_157, %c0_158] : memref<3x32x32xf32, #tpu.memory_space<vmem>>, vector<1x32x32xf32>
    %339 = vector.shape_cast %338 : vector<1x32x32xf32> to vector<32x32xf32>
    %cst_159 = arith.constant dense<0.000000e+00> : vector<64x32xf32>
    %340 = tpu.matmul %327, %339, %cst_159 {dimension_numbers = #tpu.dot_dimension_numbers<[1], [0], [0], [1], [0, 0, 1, 1], [], []>} : vector<64x32xf32>, vector<32x32xf32>, vector<64x32xf32> -> vector<64x32xf32>
    %c1_160 = arith.constant 1 : index
    %c0_161 = arith.constant 0 : index
    %c0_162 = arith.constant 0 : index
    %341 = vector.load %arg8[%c1_160, %c0_161, %c0_162] : memref<3x1x32xf32, #tpu.memory_space<vmem>>, vector<1x1x32xf32>
    %342 = vector.shape_cast %341 : vector<1x1x32xf32> to vector<1x32xf32>
    %343 = vector.broadcast %342 : vector<1x32xf32> to vector<64x32xf32>
    %344 = arith.addf %340, %343 : vector<64x32xf32>
    %c1_163 = arith.constant 1 : index
    %c0_164 = arith.constant 0 : index
    %c0_165 = arith.constant 0 : index
    %345 = vector.load %arg14[%c1_163, %c0_164, %c0_165] : memref<3x64x32xf32, #tpu.memory_space<vmem>>, vector<1x64x32xf32>
    %346 = vector.shape_cast %345 : vector<1x64x32xf32> to vector<64x32xf32>
    %347 = vector.shape_cast %344 : vector<64x32xf32> to vector<1x64x32xf32>
    tpu.vector_store %arg14[%c1_163, %c0_164, %c0_165], %347 {strides = array<i32>} : memref<3x64x32xf32, #tpu.memory_space<vmem>>, vector<1x64x32xf32>,
    %c2_166 = arith.constant 2 : index
    %c0_167 = arith.constant 0 : index
    %c0_168 = arith.constant 0 : index
    %348 = vector.load %arg6[%c2_166, %c0_167, %c0_168] : memref<3x32x32xf32, #tpu.memory_space<vmem>>, vector<1x32x32xf32>
    %349 = vector.shape_cast %348 : vector<1x32x32xf32> to vector<32x32xf32>
    %cst_169 = arith.constant dense<0.000000e+00> : vector<64x32xf32>
    %350 = tpu.matmul %327, %349, %cst_169 {dimension_numbers = #tpu.dot_dimension_numbers<[1], [0], [0], [1], [0, 0, 1, 1], [], []>} : vector<64x32xf32>, vector<32x32xf32>, vector<64x32xf32> -> vector<64x32xf32>
    %c2_170 = arith.constant 2 : index
    %c0_171 = arith.constant 0 : index
    %c0_172 = arith.constant 0 : index
    %351 = vector.load %arg8[%c2_170, %c0_171, %c0_172] : memref<3x1x32xf32, #tpu.memory_space<vmem>>, vector<1x1x32xf32>
    %352 = vector.shape_cast %351 : vector<1x1x32xf32> to vector<1x32xf32>
    %353 = vector.broadcast %352 : vector<1x32xf32> to vector<64x32xf32>
    %354 = arith.addf %350, %353 : vector<64x32xf32>
    %c2_173 = arith.constant 2 : index
    %c0_174 = arith.constant 0 : index
    %c0_175 = arith.constant 0 : index
    %355 = vector.load %arg14[%c2_173, %c0_174, %c0_175] : memref<3x64x32xf32, #tpu.memory_space<vmem>>, vector<1x64x32xf32>
    %356 = vector.shape_cast %355 : vector<1x64x32xf32> to vector<64x32xf32>
    %357 = vector.shape_cast %354 : vector<64x32xf32> to vector<1x64x32xf32>
    tpu.vector_store %arg14[%c2_173, %c0_174, %c0_175], %357 {strides = array<i32>} : memref<3x64x32xf32, #tpu.memory_space<vmem>>, vector<1x64x32xf32>,
    %c0_176 = arith.constant 0 : index
    %c0_177 = arith.constant 0 : index
    %c0_178 = arith.constant 0 : index
    %358 = vector.load %arg7[%c0_176, %c0_177, %c0_178] : memref<3x32x32xf32, #tpu.memory_space<vmem>>, vector<1x32x32xf32>
    %359 = vector.shape_cast %358 : vector<1x32x32xf32> to vector<32x32xf32>
    %c1_179 = arith.constant 1 : index
    %c0_180 = arith.constant 0 : index
    %c0_181 = arith.constant 0 : index
    %360 = vector.load %arg7[%c1_179, %c0_180, %c0_181] : memref<3x32x32xf32, #tpu.memory_space<vmem>>, vector<1x32x32xf32>
    %361 = vector.shape_cast %360 : vector<1x32x32xf32> to vector<32x32xf32>
    %c2_182 = arith.constant 2 : index
    %c0_183 = arith.constant 0 : index
    %c0_184 = arith.constant 0 : index
    %362 = vector.load %arg7[%c2_182, %c0_183, %c0_184] : memref<3x32x32xf32, #tpu.memory_space<vmem>>, vector<1x32x32xf32>
    %363 = vector.shape_cast %362 : vector<1x32x32xf32> to vector<32x32xf32>
    %c0_185 = arith.constant 0 : index
    %c0_186 = arith.constant 0 : index
    %364 = vector.load %arg9[%c0_185, %c0_186] : memref<1x32xf32, #tpu.memory_space<vmem>>, vector<1x32xf32>
    %cst_187 = arith.constant 0.000000e+00 : f32
    %365 = vector.broadcast %cst_187 : f32 to vector<8x32xf32>
    %c0_i32_188 = arith.constant 0 : i32
    %c8_i32_189 = arith.constant 8 : i32
    %366 = arith.muli %c0_i32_188, %c8_i32_189 : i32
    %367 = tpu.assume_multiple %366, 8 : i32
    %cst_190 = arith.constant dense<0.000000e+00> : vector<8x32xf32>
    %368 = tpu.matmul %365, %359, %cst_190 {dimension_numbers = #tpu.dot_dimension_numbers<[1], [0], [0], [1], [0, 0, 1, 1], [], []>} : vector<8x32xf32>, vector<32x32xf32>, vector<8x32xf32> -> vector<8x32xf32>
    %cst_191 = arith.constant dense<0.000000e+00> : vector<8x32xf32>
    %369 = tpu.matmul %365, %361, %cst_191 {dimension_numbers = #tpu.dot_dimension_numbers<[1], [0], [0], [1], [0, 0, 1, 1], [], []>} : vector<8x32xf32>, vector<32x32xf32>, vector<8x32xf32> -> vector<8x32xf32>
    %cst_192 = arith.constant dense<0.000000e+00> : vector<8x32xf32>
    %370 = tpu.matmul %365, %363, %cst_192 {dimension_numbers = #tpu.dot_dimension_numbers<[1], [0], [0], [1], [0, 0, 1, 1], [], []>} : vector<8x32xf32>, vector<32x32xf32>, vector<8x32xf32> -> vector<8x32xf32>
    %371 = vector.broadcast %364 : vector<1x32xf32> to vector<8x32xf32>
    %372 = arith.addf %370, %371 : vector<8x32xf32>
    %c0_193 = arith.constant 0 : index
    %373 = arith.index_cast %367 : i32 to index
    %c0_194 = arith.constant 0 : index
    %374 = vector.load %arg14[%c0_193, %373, %c0_194] : memref<3x64x32xf32, #tpu.memory_space<vmem>>, vector<1x8x32xf32>
    %375 = vector.shape_cast %374 : vector<1x8x32xf32> to vector<8x32xf32>
    %376 = arith.addf %375, %368 : vector<8x32xf32>
    %377 = arith.negf %376 : vector<8x32xf32>
    %378 = math.exp %377 : vector<8x32xf32>
    %cst_195 = arith.constant 1.000000e+00 : f32
    %379 = vector.broadcast %cst_195 : f32 to vector<8x32xf32>
    %380 = arith.addf %379, %378 : vector<8x32xf32>
    %381 = arith.divf %379, %380 : vector<8x32xf32>
    %c1_196 = arith.constant 1 : index
    %382 = arith.index_cast %367 : i32 to index
    %c0_197 = arith.constant 0 : index
    %383 = vector.load %arg14[%c1_196, %382, %c0_197] : memref<3x64x32xf32, #tpu.memory_space<vmem>>, vector<1x8x32xf32>
    %384 = vector.shape_cast %383 : vector<1x8x32xf32> to vector<8x32xf32>
    %385 = arith.addf %384, %369 : vector<8x32xf32>
    %386 = arith.negf %385 : vector<8x32xf32>
    %387 = math.exp %386 : vector<8x32xf32>
    %cst_198 = arith.constant 1.000000e+00 : f32
    %388 = vector.broadcast %cst_198 : f32 to vector<8x32xf32>
    %389 = arith.addf %388, %387 : vector<8x32xf32>
    %390 = arith.divf %388, %389 : vector<8x32xf32>
    %c2_199 = arith.constant 2 : index
    %391 = arith.index_cast %367 : i32 to index
    %c0_200 = arith.constant 0 : index
    %392 = vector.load %arg14[%c2_199, %391, %c0_200] : memref<3x64x32xf32, #tpu.memory_space<vmem>>, vector<1x8x32xf32>
    %393 = vector.shape_cast %392 : vector<1x8x32xf32> to vector<8x32xf32>
    %394 = arith.mulf %381, %372 : vector<8x32xf32>
    %395 = arith.addf %393, %394 : vector<8x32xf32>
    %396 = math.tanh %395 : vector<8x32xf32>
    %397 = arith.subf %365, %396 : vector<8x32xf32>
    %398 = arith.mulf %390, %397 : vector<8x32xf32>
    %399 = arith.addf %396, %398 : vector<8x32xf32>
    %400 = arith.index_cast %367 : i32 to index
    %c0_201 = arith.constant 0 : index
    %401 = vector.load %arg13[%400, %c0_201] : memref<64x32xf32, #tpu.memory_space<vmem>>, vector<8x32xf32>
    tpu.vector_store %arg13[%400, %c0_201], %399 {strides = array<i32>} : memref<64x32xf32, #tpu.memory_space<vmem>>, vector<8x32xf32>,
    %c1_i32_202 = arith.constant 1 : i32
    %c8_i32_203 = arith.constant 8 : i32
    %402 = arith.muli %c1_i32_202, %c8_i32_203 : i32
    %403 = tpu.assume_multiple %402, 8 : i32
    %cst_204 = arith.constant dense<0.000000e+00> : vector<8x32xf32>
    %404 = tpu.matmul %399, %359, %cst_204 {dimension_numbers = #tpu.dot_dimension_numbers<[1], [0], [0], [1], [0, 0, 1, 1], [], []>} : vector<8x32xf32>, vector<32x32xf32>, vector<8x32xf32> -> vector<8x32xf32>
    %cst_205 = arith.constant dense<0.000000e+00> : vector<8x32xf32>
    %405 = tpu.matmul %399, %361, %cst_205 {dimension_numbers = #tpu.dot_dimension_numbers<[1], [0], [0], [1], [0, 0, 1, 1], [], []>} : vector<8x32xf32>, vector<32x32xf32>, vector<8x32xf32> -> vector<8x32xf32>
    %cst_206 = arith.constant dense<0.000000e+00> : vector<8x32xf32>
    %406 = tpu.matmul %399, %363, %cst_206 {dimension_numbers = #tpu.dot_dimension_numbers<[1], [0], [0], [1], [0, 0, 1, 1], [], []>} : vector<8x32xf32>, vector<32x32xf32>, vector<8x32xf32> -> vector<8x32xf32>
    %407 = vector.broadcast %364 : vector<1x32xf32> to vector<8x32xf32>
    %408 = arith.addf %406, %407 : vector<8x32xf32>
    %c0_207 = arith.constant 0 : index
    %409 = arith.index_cast %403 : i32 to index
    %c0_208 = arith.constant 0 : index
    %410 = vector.load %arg14[%c0_207, %409, %c0_208] : memref<3x64x32xf32, #tpu.memory_space<vmem>>, vector<1x8x32xf32>
    %411 = vector.shape_cast %410 : vector<1x8x32xf32> to vector<8x32xf32>
    %412 = arith.addf %411, %404 : vector<8x32xf32>
    %413 = arith.negf %412 : vector<8x32xf32>
    %414 = math.exp %413 : vector<8x32xf32>
    %cst_209 = arith.constant 1.000000e+00 : f32
    %415 = vector.broadcast %cst_209 : f32 to vector<8x32xf32>
    %416 = arith.addf %415, %414 : vector<8x32xf32>
    %417 = arith.divf %415, %416 : vector<8x32xf32>
    %c1_210 = arith.constant 1 : index
    %418 = arith.index_cast %403 : i32 to index
    %c0_211 = arith.constant 0 : index
    %419 = vector.load %arg14[%c1_210, %418, %c0_211] : memref<3x64x32xf32, #tpu.memory_space<vmem>>, vector<1x8x32xf32>
    %420 = vector.shape_cast %419 : vector<1x8x32xf32> to vector<8x32xf32>
    %421 = arith.addf %420, %405 : vector<8x32xf32>
    %422 = arith.negf %421 : vector<8x32xf32>
    %423 = math.exp %422 : vector<8x32xf32>
    %cst_212 = arith.constant 1.000000e+00 : f32
    %424 = vector.broadcast %cst_212 : f32 to vector<8x32xf32>
    %425 = arith.addf %424, %423 : vector<8x32xf32>
    %426 = arith.divf %424, %425 : vector<8x32xf32>
    %c2_213 = arith.constant 2 : index
    %427 = arith.index_cast %403 : i32 to index
    %c0_214 = arith.constant 0 : index
    %428 = vector.load %arg14[%c2_213, %427, %c0_214] : memref<3x64x32xf32, #tpu.memory_space<vmem>>, vector<1x8x32xf32>
    %429 = vector.shape_cast %428 : vector<1x8x32xf32> to vector<8x32xf32>
    %430 = arith.mulf %417, %408 : vector<8x32xf32>
    %431 = arith.addf %429, %430 : vector<8x32xf32>
    %432 = math.tanh %431 : vector<8x32xf32>
    %433 = arith.subf %399, %432 : vector<8x32xf32>
    %434 = arith.mulf %426, %433 : vector<8x32xf32>
    %435 = arith.addf %432, %434 : vector<8x32xf32>
    %436 = arith.index_cast %403 : i32 to index
    %c0_215 = arith.constant 0 : index
    %437 = vector.load %arg13[%436, %c0_215] : memref<64x32xf32, #tpu.memory_space<vmem>>, vector<8x32xf32>
    tpu.vector_store %arg13[%436, %c0_215], %435 {strides = array<i32>} : memref<64x32xf32, #tpu.memory_space<vmem>>, vector<8x32xf32>,
    %c2_i32_216 = arith.constant 2 : i32
    %c8_i32_217 = arith.constant 8 : i32
    %438 = arith.muli %c2_i32_216, %c8_i32_217 : i32
    %439 = tpu.assume_multiple %438, 8 : i32
    %cst_218 = arith.constant dense<0.000000e+00> : vector<8x32xf32>
    %440 = tpu.matmul %435, %359, %cst_218 {dimension_numbers = #tpu.dot_dimension_numbers<[1], [0], [0], [1], [0, 0, 1, 1], [], []>} : vector<8x32xf32>, vector<32x32xf32>, vector<8x32xf32> -> vector<8x32xf32>
    %cst_219 = arith.constant dense<0.000000e+00> : vector<8x32xf32>
    %441 = tpu.matmul %435, %361, %cst_219 {dimension_numbers = #tpu.dot_dimension_numbers<[1], [0], [0], [1], [0, 0, 1, 1], [], []>} : vector<8x32xf32>, vector<32x32xf32>, vector<8x32xf32> -> vector<8x32xf32>
    %cst_220 = arith.constant dense<0.000000e+00> : vector<8x32xf32>
    %442 = tpu.matmul %435, %363, %cst_220 {dimension_numbers = #tpu.dot_dimension_numbers<[1], [0], [0], [1], [0, 0, 1, 1], [], []>} : vector<8x32xf32>, vector<32x32xf32>, vector<8x32xf32> -> vector<8x32xf32>
    %443 = vector.broadcast %364 : vector<1x32xf32> to vector<8x32xf32>
    %444 = arith.addf %442, %443 : vector<8x32xf32>
    %c0_221 = arith.constant 0 : index
    %445 = arith.index_cast %439 : i32 to index
    %c0_222 = arith.constant 0 : index
    %446 = vector.load %arg14[%c0_221, %445, %c0_222] : memref<3x64x32xf32, #tpu.memory_space<vmem>>, vector<1x8x32xf32>
    %447 = vector.shape_cast %446 : vector<1x8x32xf32> to vector<8x32xf32>
    %448 = arith.addf %447, %440 : vector<8x32xf32>
    %449 = arith.negf %448 : vector<8x32xf32>
    %450 = math.exp %449 : vector<8x32xf32>
    %cst_223 = arith.constant 1.000000e+00 : f32
    %451 = vector.broadcast %cst_223 : f32 to vector<8x32xf32>
    %452 = arith.addf %451, %450 : vector<8x32xf32>
    %453 = arith.divf %451, %452 : vector<8x32xf32>
    %c1_224 = arith.constant 1 : index
    %454 = arith.index_cast %439 : i32 to index
    %c0_225 = arith.constant 0 : index
    %455 = vector.load %arg14[%c1_224, %454, %c0_225] : memref<3x64x32xf32, #tpu.memory_space<vmem>>, vector<1x8x32xf32>
    %456 = vector.shape_cast %455 : vector<1x8x32xf32> to vector<8x32xf32>
    %457 = arith.addf %456, %441 : vector<8x32xf32>
    %458 = arith.negf %457 : vector<8x32xf32>
    %459 = math.exp %458 : vector<8x32xf32>
    %cst_226 = arith.constant 1.000000e+00 : f32
    %460 = vector.broadcast %cst_226 : f32 to vector<8x32xf32>
    %461 = arith.addf %460, %459 : vector<8x32xf32>
    %462 = arith.divf %460, %461 : vector<8x32xf32>
    %c2_227 = arith.constant 2 : index
    %463 = arith.index_cast %439 : i32 to index
    %c0_228 = arith.constant 0 : index
    %464 = vector.load %arg14[%c2_227, %463, %c0_228] : memref<3x64x32xf32, #tpu.memory_space<vmem>>, vector<1x8x32xf32>
    %465 = vector.shape_cast %464 : vector<1x8x32xf32> to vector<8x32xf32>
    %466 = arith.mulf %453, %444 : vector<8x32xf32>
    %467 = arith.addf %465, %466 : vector<8x32xf32>
    %468 = math.tanh %467 : vector<8x32xf32>
    %469 = arith.subf %435, %468 : vector<8x32xf32>
    %470 = arith.mulf %462, %469 : vector<8x32xf32>
    %471 = arith.addf %468, %470 : vector<8x32xf32>
    %472 = arith.index_cast %439 : i32 to index
    %c0_229 = arith.constant 0 : index
    %473 = vector.load %arg13[%472, %c0_229] : memref<64x32xf32, #tpu.memory_space<vmem>>, vector<8x32xf32>
    tpu.vector_store %arg13[%472, %c0_229], %471 {strides = array<i32>} : memref<64x32xf32, #tpu.memory_space<vmem>>, vector<8x32xf32>,
    %c3_i32_230 = arith.constant 3 : i32
    %c8_i32_231 = arith.constant 8 : i32
    %474 = arith.muli %c3_i32_230, %c8_i32_231 : i32
    %475 = tpu.assume_multiple %474, 8 : i32
    %cst_232 = arith.constant dense<0.000000e+00> : vector<8x32xf32>
    %476 = tpu.matmul %471, %359, %cst_232 {dimension_numbers = #tpu.dot_dimension_numbers<[1], [0], [0], [1], [0, 0, 1, 1], [], []>} : vector<8x32xf32>, vector<32x32xf32>, vector<8x32xf32> -> vector<8x32xf32>
    %cst_233 = arith.constant dense<0.000000e+00> : vector<8x32xf32>
    %477 = tpu.matmul %471, %361, %cst_233 {dimension_numbers = #tpu.dot_dimension_numbers<[1], [0], [0], [1], [0, 0, 1, 1], [], []>} : vector<8x32xf32>, vector<32x32xf32>, vector<8x32xf32> -> vector<8x32xf32>
    %cst_234 = arith.constant dense<0.000000e+00> : vector<8x32xf32>
    %478 = tpu.matmul %471, %363, %cst_234 {dimension_numbers = #tpu.dot_dimension_numbers<[1], [0], [0], [1], [0, 0, 1, 1], [], []>} : vector<8x32xf32>, vector<32x32xf32>, vector<8x32xf32> -> vector<8x32xf32>
    %479 = vector.broadcast %364 : vector<1x32xf32> to vector<8x32xf32>
    %480 = arith.addf %478, %479 : vector<8x32xf32>
    %c0_235 = arith.constant 0 : index
    %481 = arith.index_cast %475 : i32 to index
    %c0_236 = arith.constant 0 : index
    %482 = vector.load %arg14[%c0_235, %481, %c0_236] : memref<3x64x32xf32, #tpu.memory_space<vmem>>, vector<1x8x32xf32>
    %483 = vector.shape_cast %482 : vector<1x8x32xf32> to vector<8x32xf32>
    %484 = arith.addf %483, %476 : vector<8x32xf32>
    %485 = arith.negf %484 : vector<8x32xf32>
    %486 = math.exp %485 : vector<8x32xf32>
    %cst_237 = arith.constant 1.000000e+00 : f32
    %487 = vector.broadcast %cst_237 : f32 to vector<8x32xf32>
    %488 = arith.addf %487, %486 : vector<8x32xf32>
    %489 = arith.divf %487, %488 : vector<8x32xf32>
    %c1_238 = arith.constant 1 : index
    %490 = arith.index_cast %475 : i32 to index
    %c0_239 = arith.constant 0 : index
    %491 = vector.load %arg14[%c1_238, %490, %c0_239] : memref<3x64x32xf32, #tpu.memory_space<vmem>>, vector<1x8x32xf32>
    %492 = vector.shape_cast %491 : vector<1x8x32xf32> to vector<8x32xf32>
    %493 = arith.addf %492, %477 : vector<8x32xf32>
    %494 = arith.negf %493 : vector<8x32xf32>
    %495 = math.exp %494 : vector<8x32xf32>
    %cst_240 = arith.constant 1.000000e+00 : f32
    %496 = vector.broadcast %cst_240 : f32 to vector<8x32xf32>
    %497 = arith.addf %496, %495 : vector<8x32xf32>
    %498 = arith.divf %496, %497 : vector<8x32xf32>
    %c2_241 = arith.constant 2 : index
    %499 = arith.index_cast %475 : i32 to index
    %c0_242 = arith.constant 0 : index
    %500 = vector.load %arg14[%c2_241, %499, %c0_242] : memref<3x64x32xf32, #tpu.memory_space<vmem>>, vector<1x8x32xf32>
    %501 = vector.shape_cast %500 : vector<1x8x32xf32> to vector<8x32xf32>
    %502 = arith.mulf %489, %480 : vector<8x32xf32>
    %503 = arith.addf %501, %502 : vector<8x32xf32>
    %504 = math.tanh %503 : vector<8x32xf32>
    %505 = arith.subf %471, %504 : vector<8x32xf32>
    %506 = arith.mulf %498, %505 : vector<8x32xf32>
    %507 = arith.addf %504, %506 : vector<8x32xf32>
    %508 = arith.index_cast %475 : i32 to index
    %c0_243 = arith.constant 0 : index
    %509 = vector.load %arg13[%508, %c0_243] : memref<64x32xf32, #tpu.memory_space<vmem>>, vector<8x32xf32>
    tpu.vector_store %arg13[%508, %c0_243], %507 {strides = array<i32>} : memref<64x32xf32, #tpu.memory_space<vmem>>, vector<8x32xf32>,
    %c4_i32_244 = arith.constant 4 : i32
    %c8_i32_245 = arith.constant 8 : i32
    %510 = arith.muli %c4_i32_244, %c8_i32_245 : i32
    %511 = tpu.assume_multiple %510, 8 : i32
    %cst_246 = arith.constant dense<0.000000e+00> : vector<8x32xf32>
    %512 = tpu.matmul %507, %359, %cst_246 {dimension_numbers = #tpu.dot_dimension_numbers<[1], [0], [0], [1], [0, 0, 1, 1], [], []>} : vector<8x32xf32>, vector<32x32xf32>, vector<8x32xf32> -> vector<8x32xf32>
    %cst_247 = arith.constant dense<0.000000e+00> : vector<8x32xf32>
    %513 = tpu.matmul %507, %361, %cst_247 {dimension_numbers = #tpu.dot_dimension_numbers<[1], [0], [0], [1], [0, 0, 1, 1], [], []>} : vector<8x32xf32>, vector<32x32xf32>, vector<8x32xf32> -> vector<8x32xf32>
    %cst_248 = arith.constant dense<0.000000e+00> : vector<8x32xf32>
    %514 = tpu.matmul %507, %363, %cst_248 {dimension_numbers = #tpu.dot_dimension_numbers<[1], [0], [0], [1], [0, 0, 1, 1], [], []>} : vector<8x32xf32>, vector<32x32xf32>, vector<8x32xf32> -> vector<8x32xf32>
    %515 = vector.broadcast %364 : vector<1x32xf32> to vector<8x32xf32>
    %516 = arith.addf %514, %515 : vector<8x32xf32>
    %c0_249 = arith.constant 0 : index
    %517 = arith.index_cast %511 : i32 to index
    %c0_250 = arith.constant 0 : index
    %518 = vector.load %arg14[%c0_249, %517, %c0_250] : memref<3x64x32xf32, #tpu.memory_space<vmem>>, vector<1x8x32xf32>
    %519 = vector.shape_cast %518 : vector<1x8x32xf32> to vector<8x32xf32>
    %520 = arith.addf %519, %512 : vector<8x32xf32>
    %521 = arith.negf %520 : vector<8x32xf32>
    %522 = math.exp %521 : vector<8x32xf32>
    %cst_251 = arith.constant 1.000000e+00 : f32
    %523 = vector.broadcast %cst_251 : f32 to vector<8x32xf32>
    %524 = arith.addf %523, %522 : vector<8x32xf32>
    %525 = arith.divf %523, %524 : vector<8x32xf32>
    %c1_252 = arith.constant 1 : index
    %526 = arith.index_cast %511 : i32 to index
    %c0_253 = arith.constant 0 : index
    %527 = vector.load %arg14[%c1_252, %526, %c0_253] : memref<3x64x32xf32, #tpu.memory_space<vmem>>, vector<1x8x32xf32>
    %528 = vector.shape_cast %527 : vector<1x8x32xf32> to vector<8x32xf32>
    %529 = arith.addf %528, %513 : vector<8x32xf32>
    %530 = arith.negf %529 : vector<8x32xf32>
    %531 = math.exp %530 : vector<8x32xf32>
    %cst_254 = arith.constant 1.000000e+00 : f32
    %532 = vector.broadcast %cst_254 : f32 to vector<8x32xf32>
    %533 = arith.addf %532, %531 : vector<8x32xf32>
    %534 = arith.divf %532, %533 : vector<8x32xf32>
    %c2_255 = arith.constant 2 : index
    %535 = arith.index_cast %511 : i32 to index
    %c0_256 = arith.constant 0 : index
    %536 = vector.load %arg14[%c2_255, %535, %c0_256] : memref<3x64x32xf32, #tpu.memory_space<vmem>>, vector<1x8x32xf32>
    %537 = vector.shape_cast %536 : vector<1x8x32xf32> to vector<8x32xf32>
    %538 = arith.mulf %525, %516 : vector<8x32xf32>
    %539 = arith.addf %537, %538 : vector<8x32xf32>
    %540 = math.tanh %539 : vector<8x32xf32>
    %541 = arith.subf %507, %540 : vector<8x32xf32>
    %542 = arith.mulf %534, %541 : vector<8x32xf32>
    %543 = arith.addf %540, %542 : vector<8x32xf32>
    %544 = arith.index_cast %511 : i32 to index
    %c0_257 = arith.constant 0 : index
    %545 = vector.load %arg13[%544, %c0_257] : memref<64x32xf32, #tpu.memory_space<vmem>>, vector<8x32xf32>
    tpu.vector_store %arg13[%544, %c0_257], %543 {strides = array<i32>} : memref<64x32xf32, #tpu.memory_space<vmem>>, vector<8x32xf32>,
    %c5_i32_258 = arith.constant 5 : i32
    %c8_i32_259 = arith.constant 8 : i32
    %546 = arith.muli %c5_i32_258, %c8_i32_259 : i32
    %547 = tpu.assume_multiple %546, 8 : i32
    %cst_260 = arith.constant dense<0.000000e+00> : vector<8x32xf32>
    %548 = tpu.matmul %543, %359, %cst_260 {dimension_numbers = #tpu.dot_dimension_numbers<[1], [0], [0], [1], [0, 0, 1, 1], [], []>} : vector<8x32xf32>, vector<32x32xf32>, vector<8x32xf32> -> vector<8x32xf32>
    %cst_261 = arith.constant dense<0.000000e+00> : vector<8x32xf32>
    %549 = tpu.matmul %543, %361, %cst_261 {dimension_numbers = #tpu.dot_dimension_numbers<[1], [0], [0], [1], [0, 0, 1, 1], [], []>} : vector<8x32xf32>, vector<32x32xf32>, vector<8x32xf32> -> vector<8x32xf32>
    %cst_262 = arith.constant dense<0.000000e+00> : vector<8x32xf32>
    %550 = tpu.matmul %543, %363, %cst_262 {dimension_numbers = #tpu.dot_dimension_numbers<[1], [0], [0], [1], [0, 0, 1, 1], [], []>} : vector<8x32xf32>, vector<32x32xf32>, vector<8x32xf32> -> vector<8x32xf32>
    %551 = vector.broadcast %364 : vector<1x32xf32> to vector<8x32xf32>
    %552 = arith.addf %550, %551 : vector<8x32xf32>
    %c0_263 = arith.constant 0 : index
    %553 = arith.index_cast %547 : i32 to index
    %c0_264 = arith.constant 0 : index
    %554 = vector.load %arg14[%c0_263, %553, %c0_264] : memref<3x64x32xf32, #tpu.memory_space<vmem>>, vector<1x8x32xf32>
    %555 = vector.shape_cast %554 : vector<1x8x32xf32> to vector<8x32xf32>
    %556 = arith.addf %555, %548 : vector<8x32xf32>
    %557 = arith.negf %556 : vector<8x32xf32>
    %558 = math.exp %557 : vector<8x32xf32>
    %cst_265 = arith.constant 1.000000e+00 : f32
    %559 = vector.broadcast %cst_265 : f32 to vector<8x32xf32>
    %560 = arith.addf %559, %558 : vector<8x32xf32>
    %561 = arith.divf %559, %560 : vector<8x32xf32>
    %c1_266 = arith.constant 1 : index
    %562 = arith.index_cast %547 : i32 to index
    %c0_267 = arith.constant 0 : index
    %563 = vector.load %arg14[%c1_266, %562, %c0_267] : memref<3x64x32xf32, #tpu.memory_space<vmem>>, vector<1x8x32xf32>
    %564 = vector.shape_cast %563 : vector<1x8x32xf32> to vector<8x32xf32>
    %565 = arith.addf %564, %549 : vector<8x32xf32>
    %566 = arith.negf %565 : vector<8x32xf32>
    %567 = math.exp %566 : vector<8x32xf32>
    %cst_268 = arith.constant 1.000000e+00 : f32
    %568 = vector.broadcast %cst_268 : f32 to vector<8x32xf32>
    %569 = arith.addf %568, %567 : vector<8x32xf32>
    %570 = arith.divf %568, %569 : vector<8x32xf32>
    %c2_269 = arith.constant 2 : index
    %571 = arith.index_cast %547 : i32 to index
    %c0_270 = arith.constant 0 : index
    %572 = vector.load %arg14[%c2_269, %571, %c0_270] : memref<3x64x32xf32, #tpu.memory_space<vmem>>, vector<1x8x32xf32>
    %573 = vector.shape_cast %572 : vector<1x8x32xf32> to vector<8x32xf32>
    %574 = arith.mulf %561, %552 : vector<8x32xf32>
    %575 = arith.addf %573, %574 : vector<8x32xf32>
    %576 = math.tanh %575 : vector<8x32xf32>
    %577 = arith.subf %543, %576 : vector<8x32xf32>
    %578 = arith.mulf %570, %577 : vector<8x32xf32>
    %579 = arith.addf %576, %578 : vector<8x32xf32>
    %580 = arith.index_cast %547 : i32 to index
    %c0_271 = arith.constant 0 : index
    %581 = vector.load %arg13[%580, %c0_271] : memref<64x32xf32, #tpu.memory_space<vmem>>, vector<8x32xf32>
    tpu.vector_store %arg13[%580, %c0_271], %579 {strides = array<i32>} : memref<64x32xf32, #tpu.memory_space<vmem>>, vector<8x32xf32>,
    %c6_i32_272 = arith.constant 6 : i32
    %c8_i32_273 = arith.constant 8 : i32
    %582 = arith.muli %c6_i32_272, %c8_i32_273 : i32
    %583 = tpu.assume_multiple %582, 8 : i32
    %cst_274 = arith.constant dense<0.000000e+00> : vector<8x32xf32>
    %584 = tpu.matmul %579, %359, %cst_274 {dimension_numbers = #tpu.dot_dimension_numbers<[1], [0], [0], [1], [0, 0, 1, 1], [], []>} : vector<8x32xf32>, vector<32x32xf32>, vector<8x32xf32> -> vector<8x32xf32>
    %cst_275 = arith.constant dense<0.000000e+00> : vector<8x32xf32>
    %585 = tpu.matmul %579, %361, %cst_275 {dimension_numbers = #tpu.dot_dimension_numbers<[1], [0], [0], [1], [0, 0, 1, 1], [], []>} : vector<8x32xf32>, vector<32x32xf32>, vector<8x32xf32> -> vector<8x32xf32>
    %cst_276 = arith.constant dense<0.000000e+00> : vector<8x32xf32>
    %586 = tpu.matmul %579, %363, %cst_276 {dimension_numbers = #tpu.dot_dimension_numbers<[1], [0], [0], [1], [0, 0, 1, 1], [], []>} : vector<8x32xf32>, vector<32x32xf32>, vector<8x32xf32> -> vector<8x32xf32>
    %587 = vector.broadcast %364 : vector<1x32xf32> to vector<8x32xf32>
    %588 = arith.addf %586, %587 : vector<8x32xf32>
    %c0_277 = arith.constant 0 : index
    %589 = arith.index_cast %583 : i32 to index
    %c0_278 = arith.constant 0 : index
    %590 = vector.load %arg14[%c0_277, %589, %c0_278] : memref<3x64x32xf32, #tpu.memory_space<vmem>>, vector<1x8x32xf32>
    %591 = vector.shape_cast %590 : vector<1x8x32xf32> to vector<8x32xf32>
    %592 = arith.addf %591, %584 : vector<8x32xf32>
    %593 = arith.negf %592 : vector<8x32xf32>
    %594 = math.exp %593 : vector<8x32xf32>
    %cst_279 = arith.constant 1.000000e+00 : f32
    %595 = vector.broadcast %cst_279 : f32 to vector<8x32xf32>
    %596 = arith.addf %595, %594 : vector<8x32xf32>
    %597 = arith.divf %595, %596 : vector<8x32xf32>
    %c1_280 = arith.constant 1 : index
    %598 = arith.index_cast %583 : i32 to index
    %c0_281 = arith.constant 0 : index
    %599 = vector.load %arg14[%c1_280, %598, %c0_281] : memref<3x64x32xf32, #tpu.memory_space<vmem>>, vector<1x8x32xf32>
    %600 = vector.shape_cast %599 : vector<1x8x32xf32> to vector<8x32xf32>
    %601 = arith.addf %600, %585 : vector<8x32xf32>
    %602 = arith.negf %601 : vector<8x32xf32>
    %603 = math.exp %602 : vector<8x32xf32>
    %cst_282 = arith.constant 1.000000e+00 : f32
    %604 = vector.broadcast %cst_282 : f32 to vector<8x32xf32>
    %605 = arith.addf %604, %603 : vector<8x32xf32>
    %606 = arith.divf %604, %605 : vector<8x32xf32>
    %c2_283 = arith.constant 2 : index
    %607 = arith.index_cast %583 : i32 to index
    %c0_284 = arith.constant 0 : index
    %608 = vector.load %arg14[%c2_283, %607, %c0_284] : memref<3x64x32xf32, #tpu.memory_space<vmem>>, vector<1x8x32xf32>
    %609 = vector.shape_cast %608 : vector<1x8x32xf32> to vector<8x32xf32>
    %610 = arith.mulf %597, %588 : vector<8x32xf32>
    %611 = arith.addf %609, %610 : vector<8x32xf32>
    %612 = math.tanh %611 : vector<8x32xf32>
    %613 = arith.subf %579, %612 : vector<8x32xf32>
    %614 = arith.mulf %606, %613 : vector<8x32xf32>
    %615 = arith.addf %612, %614 : vector<8x32xf32>
    %616 = arith.index_cast %583 : i32 to index
    %c0_285 = arith.constant 0 : index
    %617 = vector.load %arg13[%616, %c0_285] : memref<64x32xf32, #tpu.memory_space<vmem>>, vector<8x32xf32>
    tpu.vector_store %arg13[%616, %c0_285], %615 {strides = array<i32>} : memref<64x32xf32, #tpu.memory_space<vmem>>, vector<8x32xf32>,
    %c7_i32_286 = arith.constant 7 : i32
    %c8_i32_287 = arith.constant 8 : i32
    %618 = arith.muli %c7_i32_286, %c8_i32_287 : i32
    %619 = tpu.assume_multiple %618, 8 : i32
    %cst_288 = arith.constant dense<0.000000e+00> : vector<8x32xf32>
    %620 = tpu.matmul %615, %359, %cst_288 {dimension_numbers = #tpu.dot_dimension_numbers<[1], [0], [0], [1], [0, 0, 1, 1], [], []>} : vector<8x32xf32>, vector<32x32xf32>, vector<8x32xf32> -> vector<8x32xf32>
    %cst_289 = arith.constant dense<0.000000e+00> : vector<8x32xf32>
    %621 = tpu.matmul %615, %361, %cst_289 {dimension_numbers = #tpu.dot_dimension_numbers<[1], [0], [0], [1], [0, 0, 1, 1], [], []>} : vector<8x32xf32>, vector<32x32xf32>, vector<8x32xf32> -> vector<8x32xf32>
    %cst_290 = arith.constant dense<0.000000e+00> : vector<8x32xf32>
    %622 = tpu.matmul %615, %363, %cst_290 {dimension_numbers = #tpu.dot_dimension_numbers<[1], [0], [0], [1], [0, 0, 1, 1], [], []>} : vector<8x32xf32>, vector<32x32xf32>, vector<8x32xf32> -> vector<8x32xf32>
    %623 = vector.broadcast %364 : vector<1x32xf32> to vector<8x32xf32>
    %624 = arith.addf %622, %623 : vector<8x32xf32>
    %c0_291 = arith.constant 0 : index
    %625 = arith.index_cast %619 : i32 to index
    %c0_292 = arith.constant 0 : index
    %626 = vector.load %arg14[%c0_291, %625, %c0_292] : memref<3x64x32xf32, #tpu.memory_space<vmem>>, vector<1x8x32xf32>
    %627 = vector.shape_cast %626 : vector<1x8x32xf32> to vector<8x32xf32>
    %628 = arith.addf %627, %620 : vector<8x32xf32>
    %629 = arith.negf %628 : vector<8x32xf32>
    %630 = math.exp %629 : vector<8x32xf32>
    %cst_293 = arith.constant 1.000000e+00 : f32
    %631 = vector.broadcast %cst_293 : f32 to vector<8x32xf32>
    %632 = arith.addf %631, %630 : vector<8x32xf32>
    %633 = arith.divf %631, %632 : vector<8x32xf32>
    %c1_294 = arith.constant 1 : index
    %634 = arith.index_cast %619 : i32 to index
    %c0_295 = arith.constant 0 : index
    %635 = vector.load %arg14[%c1_294, %634, %c0_295] : memref<3x64x32xf32, #tpu.memory_space<vmem>>, vector<1x8x32xf32>
    %636 = vector.shape_cast %635 : vector<1x8x32xf32> to vector<8x32xf32>
    %637 = arith.addf %636, %621 : vector<8x32xf32>
    %638 = arith.negf %637 : vector<8x32xf32>
    %639 = math.exp %638 : vector<8x32xf32>
    %cst_296 = arith.constant 1.000000e+00 : f32
    %640 = vector.broadcast %cst_296 : f32 to vector<8x32xf32>
    %641 = arith.addf %640, %639 : vector<8x32xf32>
    %642 = arith.divf %640, %641 : vector<8x32xf32>
    %c2_297 = arith.constant 2 : index
    %643 = arith.index_cast %619 : i32 to index
    %c0_298 = arith.constant 0 : index
    %644 = vector.load %arg14[%c2_297, %643, %c0_298] : memref<3x64x32xf32, #tpu.memory_space<vmem>>, vector<1x8x32xf32>
    %645 = vector.shape_cast %644 : vector<1x8x32xf32> to vector<8x32xf32>
    %646 = arith.mulf %633, %624 : vector<8x32xf32>
    %647 = arith.addf %645, %646 : vector<8x32xf32>
    %648 = math.tanh %647 : vector<8x32xf32>
    %649 = arith.subf %615, %648 : vector<8x32xf32>
    %650 = arith.mulf %642, %649 : vector<8x32xf32>
    %651 = arith.addf %648, %650 : vector<8x32xf32>
    %652 = arith.index_cast %619 : i32 to index
    %c0_299 = arith.constant 0 : index
    %653 = vector.load %arg13[%652, %c0_299] : memref<64x32xf32, #tpu.memory_space<vmem>>, vector<8x32xf32>
    tpu.vector_store %arg13[%652, %c0_299], %651 {strides = array<i32>} : memref<64x32xf32, #tpu.memory_space<vmem>>, vector<8x32xf32>,
    %c8_i32_300 = arith.constant 8 : i32
    %c0_301 = arith.constant 0 : index
    %c0_302 = arith.constant 0 : index
    %654 = vector.load %arg13[%c0_301, %c0_302] : memref<64x32xf32, #tpu.memory_space<vmem>>, vector<64x32xf32>
    %c0_303 = arith.constant 0 : index
    %c0_304 = arith.constant 0 : index
    %655 = vector.load %arg10[%c0_303, %c0_304] : memref<32x8xf32, #tpu.memory_space<vmem>>, vector<32x8xf32>
    %cst_305 = arith.constant dense<0.000000e+00> : vector<64x8xf32>
    %656 = tpu.matmul %654, %655, %cst_305 {dimension_numbers = #tpu.dot_dimension_numbers<[1], [0], [0], [1], [0, 0, 1, 1], [], []>} : vector<64x32xf32>, vector<32x8xf32>, vector<64x8xf32> -> vector<64x8xf32>
    %c0_306 = arith.constant 0 : index
    %c0_307 = arith.constant 0 : index
    %657 = vector.load %arg11[%c0_306, %c0_307] : memref<1x8xf32, #tpu.memory_space<vmem>>, vector<1x8xf32>
    %658 = vector.broadcast %657 : vector<1x8xf32> to vector<64x8xf32>
    %659 = arith.addf %656, %658 : vector<64x8xf32>
    %c0_308 = arith.constant 0 : index
    %c0_309 = arith.constant 0 : index
    %660 = vector.load %arg12[%c0_308, %c0_309] : memref<64x8xf32, #tpu.memory_space<vmem>>, vector<64x8xf32>
    tpu.vector_store %arg12[%c0_308, %c0_309], %659 {strides = array<i32>} : memref<64x8xf32, #tpu.memory_space<vmem>>, vector<64x8xf32>,
    return
  }
  func.func @transform_0(%arg0: i32) -> (i32, i32) {
    %c0_i32 = arith.constant 0 : i32
    %c0_i32_0 = arith.constant 0 : i32
    %c0_i32_1 = arith.constant 0 : i32
    return %c0_i32, %c0_i32_0 : i32, i32
  }
  func.func @transform_1(%arg0: i32) -> (i32, i32, i32) {
    %c0_i32 = arith.constant 0 : i32
    %c0_i32_0 = arith.constant 0 : i32
    %c0_i32_1 = arith.constant 0 : i32
    %c0_i32_2 = arith.constant 0 : i32
    return %c0_i32, %c0_i32_0, %c0_i32_1 : i32, i32, i32
  }
  func.func @transform_2(%arg0: i32) -> (i32, i32, i32) {
    %c0_i32 = arith.constant 0 : i32
    %c0_i32_0 = arith.constant 0 : i32
    %c0_i32_1 = arith.constant 0 : i32
    %c0_i32_2 = arith.constant 0 : i32
    return %c0_i32, %c0_i32_0, %c0_i32_1 : i32, i32, i32
  }
  func.func @transform_3(%arg0: i32) -> (i32, i32, i32) {
    %c0_i32 = arith.constant 0 : i32
    %c0_i32_0 = arith.constant 0 : i32
    %c0_i32_1 = arith.constant 0 : i32
    %c0_i32_2 = arith.constant 0 : i32
    return %c0_i32, %c0_i32_0, %c0_i32_1 : i32, i32, i32
  }
  func.func @transform_4(%arg0: i32) -> (i32, i32) {
    %c0_i32 = arith.constant 0 : i32
    %c0_i32_0 = arith.constant 0 : i32
    %c0_i32_1 = arith.constant 0 : i32
    return %c0_i32, %c0_i32_0 : i32, i32
  }
  func.func @transform_5(%arg0: i32) -> (i32, i32, i32) {
    %c0_i32 = arith.constant 0 : i32
    %c0_i32_0 = arith.constant 0 : i32
    %c0_i32_1 = arith.constant 0 : i32
    %c0_i32_2 = arith.constant 0 : i32
    return %c0_i32, %c0_i32_0, %c0_i32_1 : i32, i32, i32
  }
  func.func @transform_6(%arg0: i32) -> (i32, i32, i32) {
    %c0_i32 = arith.constant 0 : i32
    %c0_i32_0 = arith.constant 0 : i32
    %c0_i32_1 = arith.constant 0 : i32
    %c0_i32_2 = arith.constant 0 : i32
    return %c0_i32, %c0_i32_0, %c0_i32_1 : i32, i32, i32
  }
  func.func @transform_7(%arg0: i32) -> (i32, i32, i32) {
    %c0_i32 = arith.constant 0 : i32
    %c0_i32_0 = arith.constant 0 : i32
    %c0_i32_1 = arith.constant 0 : i32
    %c0_i32_2 = arith.constant 0 : i32
    return %c0_i32, %c0_i32_0, %c0_i32_1 : i32, i32, i32
  }
  func.func @transform_8(%arg0: i32) -> (i32, i32) {
    %c0_i32 = arith.constant 0 : i32
    %c0_i32_0 = arith.constant 0 : i32
    %c0_i32_1 = arith.constant 0 : i32
    return %c0_i32, %c0_i32_0 : i32, i32
  }
  func.func @transform_9(%arg0: i32) -> (i32, i32) {
    %c0_i32 = arith.constant 0 : i32
    %c0_i32_0 = arith.constant 0 : i32
    %c0_i32_1 = arith.constant 0 : i32
    return %c0_i32, %c0_i32_0 : i32, i32
  }
  func.func @transform_10(%arg0: i32) -> (i32, i32) {
    %c0_i32 = arith.constant 0 : i32
    %c0_i32_0 = arith.constant 0 : i32
    %c0_i32_1 = arith.constant 0 : i32
    return %c0_i32, %c0_i32_0 : i32, i32
  }
  func.func @transform_11(%arg0: i32) -> (i32, i32) {
    %c0_i32 = arith.constant 0 : i32
    %c0_i32_0 = arith.constant 0 : i32
    %c0_i32_1 = arith.constant 0 : i32
    return %c0_i32, %c0_i32_0 : i32, i32
  }
}

</mosaic_0001>

<bundles_post_ra>
// kernel: gru_model_forward.1
= control target key start
LH: loop header
LB: loop body
LE: loop exit
PB: predicated region body
PF: predicated region fallthrough
CT: control target
= control target key end

     0   :  { %16 = vsyncpa [#allocation5], 0  ;;  %s7314_s0 = inlined_call_operand.vmem [shape: f32[64,16], index: 0, kind: input, shape index: {}]   ;;  %s7315_s1 = inlined_call_operand.vmem [shape: f32[3,16,32], index: 1, kind: input, shape index: {}]   ;;  %s7316_s2 = inlined_call_operand.vmem [shape: f32[3,32,32], index: 2, kind: input, shape index: {}]   ;;  %s7317_s3 = inlined_call_operand.vmem [shape: f32[3,1,32], index: 3, kind: input, shape index: {}]   ;;  %s7318_s4 = inlined_call_operand.vmem [shape: f32[1,32], index: 4, kind: input, shape index: {}]   ;;  %s7319_s5 = inlined_call_operand.hbm [shape: f32[3,32,32], index: 5, kind: input, shape index: {}]   ;;  %s7320_s6 = inlined_call_operand.hbm [shape: f32[3,32,32], index: 6, kind: input, shape index: {}]   ;;  %s7321_s7 = inlined_call_operand.vmem [shape: f32[3,1,32], index: 7, kind: input, shape index: {}]   ;;  %s7322_s8 = inlined_call_operand.vmem [shape: f32[1,32], index: 8, kind: input, shape index: {}]   ;;  %s7323_s9 = inlined_call_operand.vmem [shape: f32[32,8], index: 9, kind: input, shape index: {}]   ;;  %s7324_s10 = inlined_call_operand.vmem [shape: f32[1,8], index: 10, kind: input, shape index: {}]   ;;  %s7325_s11 = inlined_call_operand.vmem [shape: f32[64,8], index: 11, kind: output, shape index: {}]  }
   0x1   :  { %17 = vsyncpa [#allocation7], 0  ;;  %s6288_s17 = smov [#allocation4]  }
   0x2   :  { %s33_s18 = sshll.u32 %s6288_s17, 4  ;;  %s34_s18 = int_to_ptr.vmem [resolvable:$true] %s33_s18 }
   0x3   :  { %s6252_s19 = scalar_lea.vmem %s34_s18, 1536  ;;  %p6257_p1 = scmp.lt.s32.totalorder %s34_s18, %s34_s18 }
   0x4   :  { %p6253_p0 = scmp.ne.s32.totalorder %s34_s18, %s6252_s19  ;;  %p6258_p2 = scmp.lt.s32.totalorder %s6252_s19, %s6252_s19 }
   0x6   :  { %p6259_p3 = por %p6258_p2, %p6257_p1 }
   0x8   :  { %p6260_p4 = pnand %p6259_p3, %p6253_p0 }
   0xa   :  { %6263 = shalt.err (!%p6260_p4)
}
   0xb   :  { %s6289_s20 = smov 128   ;;  %s6290_s21 = smov 8  }
   0xc   :  { %39 = dma.hbm_to_vmem [thread:$0]  %s7319_s5, 1536, %s34_s18, [#allocation5], %s6289_s20, %s6289_s20, %s6290_s21  }
   0xd   :  { %s6291_s24 = smov [#allocation6]  }
   0xe   :  { %s45_s25 = sshll.u32 %s6291_s24, 4  ;;  %s46_s25 = int_to_ptr.vmem [resolvable:$true] %s45_s25 }
   0xf   :  { %s6272_s26 = scalar_lea.vmem %s46_s25, 1536  ;;  %p6277_p6 = scmp.lt.s32.totalorder %s46_s25, %s46_s25 }
  0x10   :  { %p6273_p5 = scmp.ne.s32.totalorder %s46_s25, %s6272_s26  ;;  %p6278_p7 = scmp.lt.s32.totalorder %s6272_s26, %s6272_s26 }
  0x12   :  { %p6279_p8 = por %p6278_p7, %p6277_p6 }
  0x14   :  { %p6280_p9 = pnand %p6279_p8, %p6273_p5 }
  0x16   :  { %6283 = shalt.err (!%p6280_p9)
}
  0x17   :  { %51 = dma.hbm_to_vmem [thread:$0]  %s7320_s6, 1536, %s46_s25, [#allocation7], %s6289_s20, %s6289_s20, %s6290_s21  }
  0x18   :  { %6284 = dma.done.wait [#allocation5], 1536  }
  0x19   :  { %6285 = vsyncadd [#allocation5], 4294965760 }
  0x1a   :  { %6286 = dma.done.wait [#allocation7], 1536  }
  0x1b   :  { %6287 = vsyncadd [#allocation7], 4294965760  ;;  %vm83_vm0 = vcmask 130048   ;;  %v75_v0 = vld [vmem:[%s7315_s1 + $0x8] sm:$0xff]  ;;  %v74_v1 = vld [vmem:[%s7315_s1] sm:$0xff]  ;;  %v6292_v12 = vmov 0.0  }
  0x1c   :  { %v68_v2 = vld [vmem:[%s7314_s0 + $0x10] sm:$0xff]  ;;  %6065 = vmatprep.subr.mxu1 %v75_v0  ;;  %v69_v3 = vld [vmem:[%s7314_s0 + $0x18] sm:$0xff]  ;;  %5409 = vmatprep.subr.mxu0 %v75_v0  ;;  %v70_v5 = vld [vmem:[%s7314_s0 + $0x20] sm:$0xff]  ;;  %vm6293_vm1 = vmmov 0   ;;  %vm213_vm2 = vcmask 261120   ;;  %vm4905_vm3 = vcmask 64512  }
  0x1d   :  { %5416 = vmatprep.mubr.msk.f32.mxu1 %vm83_vm0, %v68_v2  ;;  %6067 = vmatpush3.msra.mxu1 %v75_v0  ;;  %v4946_v4 = vld [vmem:[%s7315_s1 + $0x18] sm:$0xff]  ;;  %v4945_v6 = vld [vmem:[%s7315_s1 + $0x10] sm:$0xff]  ;;  %v71_v7 = vld [vmem:[%s7314_s0 + $0x28] sm:$0xff] }
  0x1e   :  { %6066 = vmatprep.subr.mxu1 %v74_v1  ;;  %5410 = vmatpush3.msra.mxu0 %v75_v0  ;;  %v72_v8 = vld [vmem:[%s7314_s0 + $0x30] sm:$0xff]  ;;  %v66_v9 = vld [vmem:[%s7314_s0] sm:$0xff]  ;;  %v4958_v10 = vld [vmem:[%s7315_s1 + $0x28] sm:$0xff] }
  0x1f   :  { %6068 = vmatpush3.msra.mxu1 %v74_v1  ;;  %5411 = vmatprep.subr.mxu0 %v74_v1  ;;  %v67_v11 = vld [vmem:[%s7314_s0 + $0x8] sm:$0xff]  ;;  %v73_v13 = vld [vmem:[%s7314_s0 + $0x38] sm:$0xff]  ;;  %v4957_v14 = vld [vmem:[%s7315_s1 + $0x20] sm:$0xff] }
  0x20   :  { %5417 = vmatmul.mubr.msk.f32.vlgmr.msra.gmra.mxu1 %vm83_vm0, %v69_v3  ;;  %5425 = vmatprep.subr.mxu1 %v4946_v4  ;;  %v6415_v15 = vld [vmem:[%s7316_s2 + $0x58] sm:$0xff]  ;;  %v6431_v17 = vld [vmem:[%s7316_s2 + $0x10] sm:$0xff]  ;;  %v6445_v19 = vld [vmem:[%s7316_s2 + $0x8] sm:$0xff] }
  0x21   :  { %5426 = vmatpush3.msra.mxu1 %v4946_v4  ;;  %5419 = vmatprep.mubr.msk.f32.mxu1 %vm83_vm0, %v70_v5  ;;  %v6421_v16 = vld [vmem:[%s7316_s2 + $0x18] sm:$0xff]  ;;  %v6437_v18 = vld [vmem:[%s7316_s2 + $0x50] sm:$0xff]  ;;  %v6455_v20 = vld [vmem:[%s7316_s2] sm:$0xff] }
  0x22   :  { %5427 = vmatprep.subr.mxu1 %v4945_v6  ;;  %5412 = vmatpush3.msra.mxu0 %v74_v1  ;;  %v6466_v21 = vld [vmem:[%s7316_s2 + $0x48] sm:$0xff]  ;;  %v6475_v22 = vld [vmem:[%s7316_s2 + $0x40] sm:$0xff]  ;;  %v6490_v23 = vld [vmem:[%s7316_s2 + $0x38] sm:$0xff] }
  0x23   :  { %5428 = vmatpush3.msra.mxu1 %v4945_v6  ;;  %5413 = vmatprep.mubr.msk.f32.mxu0 %vm83_vm0, %v66_v9  ;;  %v6498_v24 = vld [vmem:[%s7316_s2 + $0x30] sm:$0xff]  ;;  %v6508_v25 = vld [vmem:[%s7316_s2 + $0x28] sm:$0xff]  ;;  %v6517_v26 = vld [vmem:[%s7316_s2 + $0x20] sm:$0xff] }
  0x24   :  { %5420 = vmatmul.mubr.msk.f32.gmra.mxu1 %vm83_vm0, %v71_v7  ;;  %5457 = vmatprep.subr.mxu1 %v6292_v12  ;;  %v4936_v27 = vld [vmem:[%s7317_s3] ss:$0 sm:$0xff]  ;;  %v4960_v41 = vld [vmem:[%s7317_s3 + $0x2] ss:$0 sm:$0xff]  ;;  %v4948_v44 = vld [vmem:[%s7317_s3 + $0x1] ss:$0 sm:$0xff] }
  0x25   :  { %5422 = vmatprep.mubr.msk.f32.mxu1 %vm83_vm0, %v72_v8  ;;  %5414 = vmatmul.mubr.msk.f32.vlgmr.msra.gmra.mxu0 %vm83_vm0, %v67_v11 }
  0x26   :  { %5441 = vmatprep.subr.mxu0 %v4958_v10  ;;  %5445 = vmatprep.mubr.msk.f32.mxu0 %vm83_vm0, %v66_v9 }
  0x27   :  { %5442 = vmatpush3.msra.mxu0 %v4958_v10 }
  0x28   :  { %5423 = vmatmul.mubr.msk.f32.gmra.mxu1 %vm83_vm0, %v73_v13  ;;  %5443 = vmatprep.subr.mxu0 %v4957_v14 }
  0x29   :  { %5429 = vmatprep.mubr.msk.f32.mxu1 %vm83_vm0, %v66_v9  ;;  %5444 = vmatpush3.msra.mxu0 %v4957_v14 }
  0x2a   :  { %5446 = vmatmul.mubr.msk.f32.vlgmr.msra.gmra.mxu0 %vm83_vm0, %v67_v11  ;;  %5479 = vmatprep.subr.mxu0 %v6292_v12 }
  0x2b   :  { %5480 = vmatpush3.msra.mxu0 %v6415_v15  ;;  %5448 = vmatprep.mubr.msk.f32.mxu0 %vm83_vm0, %v68_v2 }
  0x2c   :  { %5430 = vmatmul.mubr.msk.f32.vlgmr.msra.gmra.mxu1 %vm83_vm0, %v67_v11  ;;  %5481 = vmatprep.subr.mxu0 %v6292_v12 }
  0x2d   :  { %5458 = vmatpush3.msra.mxu1 %v6421_v16  ;;  %5432 = vmatprep.mubr.msk.f32.mxu1 %vm83_vm0, %v68_v2 }
  0x2e   :  { %5459 = vmatprep.subr.mxu1 %v6292_v12  ;;  %5449 = vmatmul.mubr.msk.f32.gmra.mxu0 %vm83_vm0, %v69_v3 }
  0x2f   :  { %5460 = vmatpush3.msra.mxu1 %v6431_v17  ;;  %5482 = vmatpush3.msra.mxu0 %v6437_v18 }
  0x30   :  { %5433 = vmatmul.mubr.msk.f32.gmra.mxu1 %vm83_vm0, %v69_v3  ;;  %5461 = vmatprep.subr.mxu1 %v6292_v12 }
  0x31   :  { %5435 = vmatprep.mubr.msk.f32.mxu1 %vm83_vm0, %v70_v5  ;;  %5462 = vmatpush3.msra.mxu1 %v6445_v19 }
  0x32   :  { %5463 = vmatprep.subr.mxu1 %v6292_v12  ;;  %5451 = vmatprep.mubr.msk.f32.mxu0 %vm83_vm0, %v70_v5 }
  0x33   :  { %5464 = vmatpush3.msra.mxu1 %v6455_v20  ;;  %5452 = vmatmul.mubr.msk.f32.gmra.mxu0 %vm83_vm0, %v71_v7 }
  0x34   :  { %5436 = vmatmul.mubr.msk.f32.gmra.mxu1 %vm83_vm0, %v71_v7  ;;  %5468 = vmatprep.subr.mxu1 %v6292_v12 }
  0x35   :  { %5438 = vmatprep.mubr.msk.f32.mxu1 %vm83_vm0, %v72_v8  ;;  %5483 = vmatprep.subr.mxu0 %v6292_v12 }
  0x36   :  { %5484 = vmatpush3.msra.mxu0 %v6466_v21  ;;  %5454 = vmatprep.mubr.msk.f32.mxu0 %vm83_vm0, %v72_v8 }
  0x37   :  { %5455 = vmatmul.mubr.msk.f32.gmra.mxu0 %vm83_vm0, %v73_v13  ;;  %5485 = vmatprep.subr.mxu0 %v6292_v12 }
  0x38   :  { %5439 = vmatmul.mubr.msk.f32.gmra.mxu1 %vm83_vm0, %v73_v13  ;;  %5486 = vmatpush3.msra.mxu0 %v6475_v22 }
  0x39   :  { %5465 = vmatprep.mubr.msk.f32.mxu1 %vm6293_vm1, %v6292_v12  ;;  %5487 = vmatprep.mubr.msk.f32.mxu0 %vm6293_vm1, %v6292_v12 }
  0x3a   :  { %5501 = vmatprep.subr.mxu0 %v6292_v12 }
  0x3b   :  { %5488 = vmatmul.mubr.f32.vlgmr.msra.gmra.mxu0 %v6292_v12 }
  0x3c   :  { %5466 = vmatmul.mubr.f32.vlgmr.msra.gmra.mxu1 %v6292_v12  ;;  %5502 = vmatpush3.msra.mxu0 %v6490_v23 }
  0x3d   :  { %5469 = vmatpush3.msra.mxu1 %v6490_v23  ;;  %5476 = vmatprep.mubr.msk.f32.mxu1 %vm6293_vm1, %v6292_v12 }
  0x3e   :  { %5470 = vmatprep.subr.mxu1 %v6292_v12  ;;  %5503 = vmatprep.subr.mxu0 %v6292_v12 }
  0x3f   :  { %5471 = vmatpush3.msra.mxu1 %v6498_v24  ;;  %5504 = vmatpush3.msra.mxu0 %v6498_v24 }
  0x40   :  { %5472 = vmatprep.subr.mxu1 %v6292_v12  ;;  %5505 = vmatprep.subr.mxu0 %v6292_v12 }
  0x41   :  { %5473 = vmatpush3.msra.mxu1 %v6508_v25  ;;  %5506 = vmatpush3.msra.mxu0 %v6508_v25 }
  0x42   :  { %5474 = vmatprep.subr.mxu1 %v6292_v12  ;;  %5507 = vmatprep.subr.mxu0 %v6292_v12 }
  0x43   :  { %5475 = vmatpush3.msra.mxu1 %v6517_v26  ;;  %5508 = vmatpush3.msra.mxu0 %v6517_v26 }
  0x44   :  { %5477 = vmatmul.mubr.f32.vlgmr.msra.gmra.mxu1 %v6292_v12  ;;  %5490 = vmatprep.subr.mxu1 %v6292_v12 }
  0x45   :  { %5491 = vmatpush3.msra.mxu1 %v6421_v16  ;;  %5498 = vmatprep.mubr.msk.f32.mxu1 %vm6293_vm1, %v6292_v12 }
  0x46   :  { %5492 = vmatprep.subr.mxu1 %v6292_v12  ;;  %5509 = vmatprep.mubr.msk.f32.mxu0 %vm6293_vm1, %v6292_v12 }
  0x47   :  { %5493 = vmatpush3.msra.mxu1 %v6431_v17  ;;  %5523 = vmatprep.subr.mxu0 %v6292_v12 }
  0x48   :  { %5494 = vmatprep.subr.mxu1 %v6292_v12 }
  0x49   :  { %5495 = vmatpush3.msra.mxu1 %v6445_v19 }
  0x4a   :  { %5496 = vmatprep.subr.mxu1 %v6292_v12 }
  0x4b   :  { %5497 = vmatpush3.msra.mxu1 %v6455_v20 }
  0x4c   :  { %5512 = vmatprep.subr.mxu1 %v6292_v12 }
  0xe0   :  { %v5418_v28 = vpop.f32.mrf.mxu1 }
  0xe1   :  { %v190_v29 = vadd.f32 %v5418_v28, %v4936_v27 }
  0xe2   :  { %v184_v30 = vpop.f32.mrf.mxu1 }
  0xe3   :  { %217 = vst.msk [vmem:[#allocation3 + $0x18] sm:$0xff] %vm213_vm2, %v190_v29  ;;  %v185_v31 = vadd.f32 %v4936_v27, %v184_v30 }
  0xe4   :  { %v5421_v32 = vpop.f32.mrf.mxu1 }
  0xe5   :  { %216 = vst.msk [vmem:[#allocation3 + $0x10] sm:$0xff] %vm213_vm2, %v185_v31  ;;  %v200_v33 = vadd.f32 %v5421_v32, %v4936_v27  ;;  %v5415_v34 = vpop.f32.mrf.mxu0 }
  0xe6   :  { %v194_v35 = vpop.f32.mrf.mxu1  ;;  %v180_v36 = vadd.f32 %v5415_v34, %v4936_v27 }
  0xe7   :  { %219 = vst.msk [vmem:[#allocation3 + $0x28] sm:$0xff] %vm213_vm2, %v200_v33  ;;  %v195_v37 = vadd.f32 %v4936_v27, %v194_v35  ;;  %v174_v38 = vpop.f32.mrf.mxu0 }
  0xe8   :  { %v5424_v39 = vpop.f32.mrf.mxu1  ;;  %215 = vst.msk [vmem:[#allocation3 + $0x8] sm:$0xff] %vm213_vm2, %v180_v36  ;;  %v175_v40 = vadd.f32 %v4936_v27, %v174_v38 }
  0xe9   :  { %218 = vst.msk [vmem:[#allocation3 + $0x20] sm:$0xff] %vm213_vm2, %v195_v37  ;;  %v210_v42 = vadd.f32 %v5424_v39, %v4936_v27 }
  0xea   :  { %v204_v43 = vpop.f32.mrf.mxu1  ;;  %214 = vst.msk [vmem:[#allocation3] sm:$0xff] %vm213_vm2, %v175_v40  ;;  %v5447_v45 = vpop.f32.mrf.mxu0 }
  0xeb   :  { %221 = vst.msk [vmem:[#allocation3 + $0x38] sm:$0xff] %vm213_vm2, %v210_v42  ;;  %v205_v46 = vadd.f32 %v4936_v27, %v204_v43  ;;  %v430_v47 = vadd.f32 %v5447_v45, %v4960_v41 }
  0xec   :  { %v5431_v48 = vpop.f32.mrf.mxu1  ;;  %v424_v49 = vpop.f32.mrf.mxu0 }
  0xed   :  { %220 = vst.msk [vmem:[#allocation3 + $0x30] sm:$0xff] %vm213_vm2, %v205_v46  ;;  %v305_v50 = vadd.f32 %v5431_v48, %v4948_v44  ;;  %465 = vst.msk [vmem:[#allocation3 + $0x88] sm:$0xff] %vm213_vm2, %v430_v47  ;;  %v425_v51 = vadd.f32 %v4960_v41, %v424_v49 }
  0xee   :  { %v299_v52 = vpop.f32.mrf.mxu1  ;;  %v5450_v53 = vpop.f32.mrf.mxu0 }
  0xef   :  { %340 = vst.msk [vmem:[#allocation3 + $0x48] sm:$0xff] %vm213_vm2, %v305_v50  ;;  %v300_v54 = vadd.f32 %v4948_v44, %v299_v52  ;;  %464 = vst.msk [vmem:[#allocation3 + $0x80] sm:$0xff] %vm213_vm2, %v425_v51  ;;  %v440_v55 = vadd.f32 %v5450_v53, %v4960_v41 }
  0xf0   :  { %v5434_v56 = vpop.f32.mrf.mxu1  ;;  %v434_v57 = vpop.f32.mrf.mxu0 }
  0xf1   :  { %339 = vst.msk [vmem:[#allocation3 + $0x40] sm:$0xff] %vm213_vm2, %v300_v54  ;;  %v315_v58 = vadd.f32 %v5434_v56, %v4948_v44  ;;  %467 = vst.msk [vmem:[#allocation3 + $0x98] sm:$0xff] %vm213_vm2, %v440_v55  ;;  %v435_v59 = vadd.f32 %v4960_v41, %v434_v57  ;;  %v706_v29 = vld [vmem:[#allocation3] sm:$0xff]  ;;  %v948_v55 = vld [vmem:[#allocation3 + $0x8] sm:$0xff] }
  0xf2   :  { %v309_v60 = vpop.f32.mrf.mxu1 }
  0xf3   :  { %342 = vst.msk [vmem:[#allocation3 + $0x58] sm:$0xff] %vm213_vm2, %v315_v58  ;;  %v310_v61 = vadd.f32 %v4948_v44, %v309_v60  ;;  %466 = vst.msk [vmem:[#allocation3 + $0x90] sm:$0xff] %vm213_vm2, %v435_v59  ;;  %v5453_v62 = vpop.f32.mrf.mxu0 }
  0xf4   :  { %v5437_v63 = vpop.f32.mrf.mxu1  ;;  %v450_v0 = vadd.f32 %v5453_v62, %v4960_v41 }
  0xf5   :  { %341 = vst.msk [vmem:[#allocation3 + $0x50] sm:$0xff] %vm213_vm2, %v310_v61  ;;  %v325_v1 = vadd.f32 %v5437_v63, %v4948_v44  ;;  %v444_v2 = vpop.f32.mrf.mxu0 }
  0xf6   :  { %v319_v3 = vpop.f32.mrf.mxu1  ;;  %469 = vst.msk [vmem:[#allocation3 + $0xa8] sm:$0xff] %vm213_vm2, %v450_v0  ;;  %v445_v4 = vadd.f32 %v4960_v41, %v444_v2  ;;  %v726_v46 = vld [vmem:[#allocation3 + $0x80] sm:$0xff]  ;;  %v958_v63 = vld [vmem:[#allocation3 + $0x48] sm:$0xff] }
  0xf7   :  { %344 = vst.msk [vmem:[#allocation3 + $0x68] sm:$0xff] %vm213_vm2, %v325_v1  ;;  %v320_v5 = vadd.f32 %v4948_v44, %v319_v3  ;;  %v5456_v6 = vpop.f32.mrf.mxu0 }
  0xf8   :  { %v5440_v7 = vpop.f32.mrf.mxu1  ;;  %468 = vst.msk [vmem:[#allocation3 + $0xa0] sm:$0xff] %vm213_vm2, %v445_v4  ;;  %v460_v8 = vadd.f32 %v5456_v6, %v4960_v41  ;;  %v716_v36 = vld [vmem:[#allocation3 + $0x40] sm:$0xff] }
  0xf9   :  { %343 = vst.msk [vmem:[#allocation3 + $0x60] sm:$0xff] %vm213_vm2, %v320_v5  ;;  %v335_v9 = vadd.f32 %v5440_v7, %v4948_v44  ;;  %v454_v10 = vpop.f32.mrf.mxu0 }
  0xfa   :  { %v329_v11 = vpop.f32.mrf.mxu1  ;;  %471 = vst.msk [vmem:[#allocation3 + $0xb8] sm:$0xff] %vm213_vm2, %v460_v8  ;;  %v455_v13 = vadd.f32 %v4960_v41, %v454_v10  ;;  %v6577_v41 = vld [vmem:[%s7318_s4] ss:$0 sm:$0xff]  ;;  %v968_v8 = vld [vmem:[#allocation3 + $0x88] sm:$0xff] }
  0xfb   :  { %346 = vst.msk [vmem:[#allocation3 + $0x78] sm:$0xff] %vm213_vm2, %v335_v9  ;;  %v330_v14 = vadd.f32 %v4948_v44, %v329_v11  ;;  %v702_v27 = vpop.f32.mrf.mxu0 }
  0xfc   :  { %v556_v28 = vpop.f32.mrf.mxu1  ;;  %470 = vst.msk [vmem:[#allocation3 + $0xb0] sm:$0xff] %vm213_vm2, %v455_v13  ;;  %v703_v42 = vadd.f32 %v6577_v41, %v702_v27 }
  0xfd   :  { %345 = vst.msk [vmem:[#allocation3 + $0x70] sm:$0xff] %vm213_vm2, %v330_v14  ;;  %v707_v30 = vadd.f32 %v706_v29, %v556_v28  ;;  %v5489_v31 = vpop.f32.mrf.mxu0 }
  0xfe   :  { %v5467_v32 = vpop.f32.mrf.mxu1 }
  0xff   :  { %v4978_v33 = vmul.f32 -1.442695, %v707_v30  ;;  %v1191_v30 = vld [vmem:[#allocation3 + $0x10] sm:$0xff] }
 0x101   :  { %6075 = vpow2.f32 %v4978_v33 }
 0x104   :  { %v626_v34 = vpop.f32.mrf.mxu1 }
 0x105   :  { %v717_v37 = vadd.f32 %v716_v36, %v626_v34 }
 0x106   :  { %v5478_v35 = vpop.f32.mrf.mxu1 }
 0x107   :  { %v4979_v38 = vmul.f32 -1.442695, %v717_v37 }
 0x109   :  { %6077 = vpow2.f32 %v4979_v38  ;;  %v1201_v38 = vld [vmem:[#allocation3 + $0x50] sm:$0xff] }
 0x10e   :  { %v6076_v39 = vpop.eup %6075 }
 0x10f   :  { %v711_v40 = vadd.f32 1.0, %v6076_v39 }
 0x111   :  { %6079 = vrcp.f32 %v711_v40 }
 0x116   :  { %v6078_v43 = vpop.eup %6077 }
 0x117   :  { %v721_v47 = vadd.f32 1.0, %v6078_v43 }
 0x11e   :  { %v6080_v44 = vpop.eup %6079 }
 0x11f   :  { %v727_v45 = vmul.f32 %v6080_v44, %v703_v42 }
 0x121   :  { %v728_v48 = vadd.f32 %v727_v45, %v726_v46 }
 0x123   :  { %6081 = vtanh.f32 %v728_v48  ;;  %v1211_v48 = vld [vmem:[#allocation3 + $0x90] sm:$0xff] }
 0x124   :  { %6083 = vrcp.f32 %v721_v47 }
 0x130   :  { %v6082_v49 = vpop.eup %6081 }
 0x131   :  { %v730_v50 = vsub.f32 0.0, %v6082_v49  ;;  %v6084_v51 = vpop.eup %6083 }
 0x133   :  { %v731_v52 = vmul.f32 %v6084_v51, %v730_v50 }
 0x135   :  { %v732_v53 = vadd.f32 %v6082_v49, %v731_v52 }
 0x137   :  { %733 = vst.msk [vmem:[#allocation2] sm:$0xff] %vm213_vm2, %v732_v53  ;;  %5499 = vmatmul.mubr.msk.f32.vlgmr.msra.gmra.mxu1 %vm213_vm2, %v732_v53  ;;  %5510 = vmatmul.mubr.msk.f32.vlgmr.msra.gmra.mxu0 %vm213_vm2, %v732_v53 }
 0x138   :  { %5513 = vmatpush3.msra.mxu1 %v6415_v15  ;;  %5520 = vmatprep.mubr.msk.f32.mxu1 %vm6293_vm1, %v6292_v12 }
 0x139   :  { %5514 = vmatprep.subr.mxu1 %v6292_v12  ;;  %5524 = vmatpush3.msra.mxu0 %v6421_v16 }
 0x13a   :  { %5515 = vmatpush3.msra.mxu1 %v6437_v18  ;;  %5525 = vmatprep.subr.mxu0 %v6292_v12 }
 0x13b   :  { %5516 = vmatprep.subr.mxu1 %v6292_v12  ;;  %5526 = vmatpush3.msra.mxu0 %v6431_v17 }
 0x13c   :  { %5517 = vmatpush3.msra.mxu1 %v6466_v21  ;;  %5527 = vmatprep.subr.mxu0 %v6292_v12 }
 0x13d   :  { %5518 = vmatprep.subr.mxu1 %v6292_v12  ;;  %5528 = vmatpush3.msra.mxu0 %v6445_v19 }
 0x13e   :  { %5519 = vmatpush3.msra.mxu1 %v6475_v22  ;;  %5529 = vmatprep.subr.mxu0 %v6292_v12 }
 0x13f   :  { %5521 = vmatmul.mubr.msk.f32.vlgmr.msra.gmra.mxu1 %vm213_vm2, %v732_v53  ;;  %5534 = vmatprep.subr.mxu1 %v6292_v12 }
 0x140   :  { %5535 = vmatpush3.msra.mxu1 %v6490_v23  ;;  %5530 = vmatpush3.msra.mxu0 %v6455_v20 }
 0x141   :  { %5536 = vmatprep.subr.mxu1 %v6292_v12  ;;  %5531 = vmatprep.mubr.msk.f32.mxu0 %vm6293_vm1, %v6292_v12 }
 0x142   :  { %5537 = vmatpush3.msra.mxu1 %v6498_v24  ;;  %5542 = vmatprep.mubr.msk.f32.mxu1 %vm6293_vm1, %v6292_v12 }
 0x143   :  { %5538 = vmatprep.subr.mxu1 %v6292_v12  ;;  %5545 = vmatprep.subr.mxu0 %v6292_v12 }
 0x144   :  { %5539 = vmatpush3.msra.mxu1 %v6508_v25 }
 0x145   :  { %5540 = vmatprep.subr.mxu1 %v6292_v12 }
 0x146   :  { %5541 = vmatpush3.msra.mxu1 %v6517_v26 }
 0x147   :  { %5556 = vmatprep.subr.mxu1 %v6292_v12 }
 0x1f7   :  { %v803_v54 = vpop.f32.mrf.mxu1  ;;  %v873_v56 = vpop.f32.mrf.mxu0 }
 0x1f8   :  { %v949_v57 = vadd.f32 %v948_v55, %v803_v54  ;;  %v959_v0 = vadd.f32 %v958_v63, %v873_v56 }
 0x1f9   :  { %v5500_v58 = vpop.f32.mrf.mxu1  ;;  %v5511_v59 = vpop.f32.mrf.mxu0 }
 0x1fa   :  { %v4983_v60 = vmul.f32 -1.442695, %v949_v57  ;;  %v4984_v1 = vmul.f32 -1.442695, %v959_v0  ;;  %v1434_v57 = vld [vmem:[#allocation3 + $0x18] sm:$0xff] }
 0x1fc   :  { %6085 = vpow2.f32 %v4983_v60 }
 0x1fd   :  { %6087 = vpow2.f32 %v4984_v1  ;;  %v1444_v1 = vld [vmem:[#allocation3 + $0x58] sm:$0xff] }
 0x1ff   :  { %v943_v61 = vpop.f32.mrf.mxu1 }
 0x200   :  { %v944_v5 = vadd.f32 %v6577_v41, %v943_v61 }
 0x201   :  { %v5522_v62 = vpop.f32.mrf.mxu1 }
 0x209   :  { %v6086_v2 = vpop.eup %6085 }
 0x20a   :  { %v953_v3 = vadd.f32 1.0, %v6086_v2  ;;  %v6088_v4 = vpop.eup %6087 }
 0x20b   :  { %v963_v9 = vadd.f32 1.0, %v6088_v4 }
 0x20c   :  { %6089 = vrcp.f32 %v953_v3 }
 0x219   :  { %v6090_v6 = vpop.eup %6089 }
 0x21a   :  { %v969_v7 = vmul.f32 %v6090_v6, %v944_v5 }
 0x21c   :  { %v970_v10 = vadd.f32 %v969_v7, %v968_v8 }
 0x21e   :  { %6091 = vtanh.f32 %v970_v10  ;;  %v1454_v10 = vld [vmem:[#allocation3 + $0x98] sm:$0xff] }
 0x21f   :  { %6093 = vrcp.f32 %v963_v9 }
 0x22b   :  { %v6092_v11 = vpop.eup %6091 }
 0x22c   :  { %v972_v13 = vsub.f32 %v732_v53, %v6092_v11  ;;  %v6094_v14 = vpop.eup %6093 }
 0x22e   :  { %v973_v27 = vmul.f32 %v6094_v14, %v972_v13 }
 0x230   :  { %v974_v28 = vadd.f32 %v6092_v11, %v973_v27 }
 0x232   :  { %976 = vst.msk [vmem:[#allocation2 + $0x8] sm:$0xff] %vm213_vm2, %v974_v28  ;;  %5532 = vmatmul.mubr.msk.f32.vlgmr.msra.gmra.mxu0 %vm213_vm2, %v974_v28  ;;  %5543 = vmatmul.mubr.msk.f32.vlgmr.msra.gmra.mxu1 %vm213_vm2, %v974_v28 }
 0x233   :  { %5546 = vmatpush3.msra.mxu0 %v6415_v15  ;;  %5553 = vmatprep.mubr.msk.f32.mxu0 %vm6293_vm1, %v6292_v12 }
 0x234   :  { %5547 = vmatprep.subr.mxu0 %v6292_v12  ;;  %5557 = vmatpush3.msra.mxu1 %v6421_v16 }
 0x235   :  { %5548 = vmatpush3.msra.mxu0 %v6437_v18  ;;  %5558 = vmatprep.subr.mxu1 %v6292_v12 }
 0x236   :  { %5549 = vmatprep.subr.mxu0 %v6292_v12  ;;  %5559 = vmatpush3.msra.mxu1 %v6431_v17 }
 0x237   :  { %5550 = vmatpush3.msra.mxu0 %v6466_v21  ;;  %5560 = vmatprep.subr.mxu1 %v6292_v12 }
 0x238   :  { %5551 = vmatprep.subr.mxu0 %v6292_v12  ;;  %5561 = vmatpush3.msra.mxu1 %v6445_v19 }
 0x239   :  { %5552 = vmatpush3.msra.mxu0 %v6475_v22  ;;  %5562 = vmatprep.subr.mxu1 %v6292_v12 }
 0x23a   :  { %5554 = vmatmul.mubr.msk.f32.vlgmr.msra.gmra.mxu0 %vm213_vm2, %v974_v28  ;;  %5567 = vmatprep.subr.mxu0 %v6292_v12 }
 0x23b   :  { %5568 = vmatpush3.msra.mxu0 %v6490_v23  ;;  %5563 = vmatpush3.msra.mxu1 %v6455_v20 }
 0x23c   :  { %5569 = vmatprep.subr.mxu0 %v6292_v12  ;;  %5564 = vmatprep.mubr.msk.f32.mxu1 %vm6293_vm1, %v6292_v12 }
 0x23d   :  { %5570 = vmatpush3.msra.mxu0 %v6498_v24  ;;  %5575 = vmatprep.mubr.msk.f32.mxu0 %vm6293_vm1, %v6292_v12 }
 0x23e   :  { %5571 = vmatprep.subr.mxu0 %v6292_v12  ;;  %5578 = vmatprep.subr.mxu1 %v6292_v12 }
 0x23f   :  { %5572 = vmatpush3.msra.mxu0 %v6508_v25 }
 0x240   :  { %5573 = vmatprep.subr.mxu0 %v6292_v12 }
 0x241   :  { %5574 = vmatpush3.msra.mxu0 %v6517_v26 }
 0x242   :  { %5589 = vmatprep.subr.mxu0 %v6292_v12 }
 0x2f2   :  { %v1046_v29 = vpop.f32.mrf.mxu0  ;;  %v1116_v31 = vpop.f32.mrf.mxu1 }
 0x2f3   :  { %v1192_v32 = vadd.f32 %v1191_v30, %v1046_v29  ;;  %v1202_v39 = vadd.f32 %v1201_v38, %v1116_v31 }
 0x2f4   :  { %v5533_v33 = vpop.f32.mrf.mxu0  ;;  %v5544_v34 = vpop.f32.mrf.mxu1 }
 0x2f5   :  { %v4988_v35 = vmul.f32 -1.442695, %v1192_v32  ;;  %v4989_v40 = vmul.f32 -1.442695, %v1202_v39  ;;  %v1677_v32 = vld [vmem:[#allocation3 + $0x20] sm:$0xff] }
 0x2f7   :  { %6095 = vpow2.f32 %v4988_v35 }
 0x2f8   :  { %6097 = vpow2.f32 %v4989_v40  ;;  %v1687_v40 = vld [vmem:[#allocation3 + $0x60] sm:$0xff] }
 0x2fa   :  { %v1186_v36 = vpop.f32.mrf.mxu0 }
 0x2fb   :  { %v1187_v45 = vadd.f32 %v6577_v41, %v1186_v36 }
 0x2fc   :  { %v5555_v37 = vpop.f32.mrf.mxu0 }
 0x304   :  { %v6096_v42 = vpop.eup %6095 }
 0x305   :  { %v1196_v43 = vadd.f32 1.0, %v6096_v42  ;;  %v6098_v44 = vpop.eup %6097 }
 0x306   :  { %v1206_v49 = vadd.f32 1.0, %v6098_v44 }
 0x307   :  { %6099 = vrcp.f32 %v1196_v43 }
 0x314   :  { %v6100_v46 = vpop.eup %6099 }
 0x315   :  { %v1212_v47 = vmul.f32 %v6100_v46, %v1187_v45 }
 0x317   :  { %v1213_v50 = vadd.f32 %v1212_v47, %v1211_v48 }
 0x319   :  { %6101 = vtanh.f32 %v1213_v50  ;;  %v1697_v50 = vld [vmem:[#allocation3 + $0xa0] sm:$0xff] }
 0x31a   :  { %6103 = vrcp.f32 %v1206_v49 }
 0x326   :  { %v6102_v51 = vpop.eup %6101 }
 0x327   :  { %v1215_v52 = vsub.f32 %v974_v28, %v6102_v51  ;;  %v6104_v53 = vpop.eup %6103 }
 0x329   :  { %v1216_v54 = vmul.f32 %v6104_v53, %v1215_v52 }
 0x32b   :  { %v1217_v55 = vadd.f32 %v6102_v51, %v1216_v54 }
 0x32d   :  { %1219 = vst.msk [vmem:[#allocation2 + $0x10] sm:$0xff] %vm213_vm2, %v1217_v55  ;;  %5565 = vmatmul.mubr.msk.f32.vlgmr.msra.gmra.mxu1 %vm213_vm2, %v1217_v55  ;;  %5576 = vmatmul.mubr.msk.f32.vlgmr.msra.gmra.mxu0 %vm213_vm2, %v1217_v55 }
 0x32e   :  { %5579 = vmatpush3.msra.mxu1 %v6415_v15  ;;  %5586 = vmatprep.mubr.msk.f32.mxu1 %vm6293_vm1, %v6292_v12 }
 0x32f   :  { %5580 = vmatprep.subr.mxu1 %v6292_v12  ;;  %5590 = vmatpush3.msra.mxu0 %v6421_v16 }
 0x330   :  { %5581 = vmatpush3.msra.mxu1 %v6437_v18  ;;  %5591 = vmatprep.subr.mxu0 %v6292_v12 }
 0x331   :  { %5582 = vmatprep.subr.mxu1 %v6292_v12  ;;  %5592 = vmatpush3.msra.mxu0 %v6431_v17 }
 0x332   :  { %5583 = vmatpush3.msra.mxu1 %v6466_v21  ;;  %5593 = vmatprep.subr.mxu0 %v6292_v12 }
 0x333   :  { %5584 = vmatprep.subr.mxu1 %v6292_v12  ;;  %5594 = vmatpush3.msra.mxu0 %v6445_v19 }
 0x334   :  { %5585 = vmatpush3.msra.mxu1 %v6475_v22  ;;  %5595 = vmatprep.subr.mxu0 %v6292_v12 }
 0x335   :  { %5587 = vmatmul.mubr.msk.f32.vlgmr.msra.gmra.mxu1 %vm213_vm2, %v1217_v55  ;;  %5600 = vmatprep.subr.mxu1 %v6292_v12 }
 0x336   :  { %5601 = vmatpush3.msra.mxu1 %v6490_v23  ;;  %5596 = vmatpush3.msra.mxu0 %v6455_v20 }
 0x337   :  { %5602 = vmatprep.subr.mxu1 %v6292_v12  ;;  %5597 = vmatprep.mubr.msk.f32.mxu0 %vm6293_vm1, %v6292_v12 }
 0x338   :  { %5603 = vmatpush3.msra.mxu1 %v6498_v24  ;;  %5608 = vmatprep.mubr.msk.f32.mxu1 %vm6293_vm1, %v6292_v12 }
 0x339   :  { %5604 = vmatprep.subr.mxu1 %v6292_v12  ;;  %5611 = vmatprep.subr.mxu0 %v6292_v12 }
 0x33a   :  { %5605 = vmatpush3.msra.mxu1 %v6508_v25 }
 0x33b   :  { %5606 = vmatprep.subr.mxu1 %v6292_v12 }
 0x33c   :  { %5607 = vmatpush3.msra.mxu1 %v6517_v26 }
 0x33d   :  { %5622 = vmatprep.subr.mxu1 %v6292_v12 }
 0x3ed   :  { %v1289_v56 = vpop.f32.mrf.mxu1  ;;  %v1359_v58 = vpop.f32.mrf.mxu0 }
 0x3ee   :  { %v1435_v59 = vadd.f32 %v1434_v57, %v1289_v56  ;;  %v1445_v2 = vadd.f32 %v1444_v1, %v1359_v58 }
 0x3ef   :  { %v5566_v60 = vpop.f32.mrf.mxu1  ;;  %v5577_v61 = vpop.f32.mrf.mxu0 }
 0x3f0   :  { %v4993_v62 = vmul.f32 -1.442695, %v1435_v59  ;;  %v4994_v3 = vmul.f32 -1.442695, %v1445_v2  ;;  %v1920_v59 = vld [vmem:[#allocation3 + $0x28] sm:$0xff] }
 0x3f2   :  { %6105 = vpow2.f32 %v4993_v62 }
 0x3f3   :  { %6107 = vpow2.f32 %v4994_v3  ;;  %v1930_v3 = vld [vmem:[#allocation3 + $0x68] sm:$0xff] }
 0x3f5   :  { %v1429_v63 = vpop.f32.mrf.mxu1 }
 0x3f6   :  { %v1430_v7 = vadd.f32 %v6577_v41, %v1429_v63 }
 0x3f7   :  { %v5588_v0 = vpop.f32.mrf.mxu1 }
 0x3ff   :  { %v6106_v4 = vpop.eup %6105 }
 0x400   :  { %v1439_v5 = vadd.f32 1.0, %v6106_v4  ;;  %v6108_v6 = vpop.eup %6107 }
 0x401   :  { %v1449_v11 = vadd.f32 1.0, %v6108_v6 }
 0x402   :  { %6109 = vrcp.f32 %v1439_v5 }
 0x40f   :  { %v6110_v8 = vpop.eup %6109 }
 0x410   :  { %v1455_v9 = vmul.f32 %v6110_v8, %v1430_v7 }
 0x412   :  { %v1456_v13 = vadd.f32 %v1455_v9, %v1454_v10 }
 0x414   :  { %6111 = vtanh.f32 %v1456_v13  ;;  %v1940_v13 = vld [vmem:[#allocation3 + $0xa8] sm:$0xff] }
 0x415   :  { %6113 = vrcp.f32 %v1449_v11 }
 0x421   :  { %v6112_v14 = vpop.eup %6111 }
 0x422   :  { %v1458_v27 = vsub.f32 %v1217_v55, %v6112_v14  ;;  %v6114_v28 = vpop.eup %6113 }
 0x424   :  { %v1459_v29 = vmul.f32 %v6114_v28, %v1458_v27 }
 0x426   :  { %v1460_v30 = vadd.f32 %v6112_v14, %v1459_v29 }
 0x428   :  { %1462 = vst.msk [vmem:[#allocation2 + $0x18] sm:$0xff] %vm213_vm2, %v1460_v30  ;;  %5598 = vmatmul.mubr.msk.f32.vlgmr.msra.gmra.mxu0 %vm213_vm2, %v1460_v30  ;;  %5609 = vmatmul.mubr.msk.f32.vlgmr.msra.gmra.mxu1 %vm213_vm2, %v1460_v30 }
 0x429   :  { %5612 = vmatpush3.msra.mxu0 %v6415_v15  ;;  %5619 = vmatprep.mubr.msk.f32.mxu0 %vm6293_vm1, %v6292_v12 }
 0x42a   :  { %5613 = vmatprep.subr.mxu0 %v6292_v12  ;;  %5623 = vmatpush3.msra.mxu1 %v6421_v16 }
 0x42b   :  { %5614 = vmatpush3.msra.mxu0 %v6437_v18  ;;  %5624 = vmatprep.subr.mxu1 %v6292_v12 }
 0x42c   :  { %5615 = vmatprep.subr.mxu0 %v6292_v12  ;;  %5625 = vmatpush3.msra.mxu1 %v6431_v17 }
 0x42d   :  { %5616 = vmatpush3.msra.mxu0 %v6466_v21  ;;  %5626 = vmatprep.subr.mxu1 %v6292_v12 }
 0x42e   :  { %5617 = vmatprep.subr.mxu0 %v6292_v12  ;;  %5627 = vmatpush3.msra.mxu1 %v6445_v19 }
 0x42f   :  { %5618 = vmatpush3.msra.mxu0 %v6475_v22  ;;  %5628 = vmatprep.subr.mxu1 %v6292_v12 }
 0x430   :  { %5620 = vmatmul.mubr.msk.f32.vlgmr.msra.gmra.mxu0 %vm213_vm2, %v1460_v30  ;;  %5633 = vmatprep.subr.mxu0 %v6292_v12 }
 0x431   :  { %5634 = vmatpush3.msra.mxu0 %v6490_v23  ;;  %5629 = vmatpush3.msra.mxu1 %v6455_v20 }
 0x432   :  { %5635 = vmatprep.subr.mxu0 %v6292_v12  ;;  %5630 = vmatprep.mubr.msk.f32.mxu1 %vm6293_vm1, %v6292_v12 }
 0x433   :  { %5636 = vmatpush3.msra.mxu0 %v6498_v24  ;;  %5641 = vmatprep.mubr.msk.f32.mxu0 %vm6293_vm1, %v6292_v12 }
 0x434   :  { %5637 = vmatprep.subr.mxu0 %v6292_v12  ;;  %5644 = vmatprep.subr.mxu1 %v6292_v12 }
 0x435   :  { %5638 = vmatpush3.msra.mxu0 %v6508_v25 }
 0x436   :  { %5639 = vmatprep.subr.mxu0 %v6292_v12 }
 0x437   :  { %5640 = vmatpush3.msra.mxu0 %v6517_v26 }
 0x438   :  { %5655 = vmatprep.subr.mxu0 %v6292_v12 }
 0x4e8   :  { %v1532_v31 = vpop.f32.mrf.mxu0  ;;  %v1602_v33 = vpop.f32.mrf.mxu1 }
 0x4e9   :  { %v1678_v34 = vadd.f32 %v1677_v32, %v1532_v31  ;;  %v1688_v42 = vadd.f32 %v1687_v40, %v1602_v33  ;;  %v2173_v33 = vld [vmem:[#allocation3 + $0x70] sm:$0xff] }
 0x4ea   :  { %v5599_v35 = vpop.f32.mrf.mxu0  ;;  %v5610_v36 = vpop.f32.mrf.mxu1  ;;  %v2183_v40 = vld [vmem:[#allocation3 + $0xb0] sm:$0xff] }
 0x4eb   :  { %v4998_v37 = vmul.f32 -1.442695, %v1678_v34  ;;  %v4999_v43 = vmul.f32 -1.442695, %v1688_v42 }
 0x4ed   :  { %6115 = vpow2.f32 %v4998_v37 }
 0x4ee   :  { %6117 = vpow2.f32 %v4999_v43 }
 0x4f0   :  { %v1672_v38 = vpop.f32.mrf.mxu0 }
 0x4f1   :  { %v1673_v47 = vadd.f32 %v6577_v41, %v1672_v38 }
 0x4f2   :  { %v5621_v39 = vpop.f32.mrf.mxu0 }
 0x4fa   :  { %v6116_v44 = vpop.eup %6115 }
 0x4fb   :  { %v1682_v45 = vadd.f32 1.0, %v6116_v44  ;;  %v6118_v46 = vpop.eup %6117 }
 0x4fc   :  { %v1692_v51 = vadd.f32 1.0, %v6118_v46 }
 0x4fd   :  { %6119 = vrcp.f32 %v1682_v45 }
 0x50a   :  { %v6120_v48 = vpop.eup %6119 }
 0x50b   :  { %v1698_v49 = vmul.f32 %v6120_v48, %v1673_v47 }
 0x50d   :  { %v1699_v52 = vadd.f32 %v1698_v49, %v1697_v50  ;;  %v2445_v49 = vld [vmem:[#allocation4 + $0x10] sm:$0xff]  ;;  %v6808_v50 = vld [vmem:[#allocation2] sm:$0xff] }
 0x50f   :  { %6121 = vtanh.f32 %v1699_v52  ;;  %v6236_v52 = vld [vmem:[%s7316_s2 + $0x50] sm:$0xff] }
 0x510   :  { %6123 = vrcp.f32 %v1692_v51  ;;  %v2444_v51 = vld [vmem:[#allocation4 + $0x8] sm:$0xff] }
 0x51c   :  { %v6122_v53 = vpop.eup %6121 }
 0x51d   :  { %v1701_v54 = vsub.f32 %v1460_v30, %v6122_v53  ;;  %v6124_v55 = vpop.eup %6123 }
 0x51f   :  { %v1702_v56 = vmul.f32 %v6124_v55, %v1701_v54  ;;  %v6237_v54 = vld [vmem:[%s7316_s2 + $0x48] sm:$0xff]  ;;  %v6238_v55 = vld [vmem:[%s7316_s2 + $0x40] sm:$0xff] }
 0x521   :  { %v1703_v57 = vadd.f32 %v6122_v53, %v1702_v56  ;;  %v2443_v53 = vld [vmem:[#allocation4] sm:$0xff]  ;;  %v2595_v56 = vld [vmem:[#allocation4 + $0x38] sm:$0xff] }
 0x523   :  { %1705 = vst.msk [vmem:[#allocation2 + $0x20] sm:$0xff] %vm213_vm2, %v1703_v57  ;;  %5631 = vmatmul.mubr.msk.f32.vlgmr.msra.gmra.mxu1 %vm213_vm2, %v1703_v57  ;;  %5642 = vmatmul.mubr.msk.f32.vlgmr.msra.gmra.mxu0 %vm213_vm2, %v1703_v57 }
 0x524   :  { %5645 = vmatpush3.msra.mxu1 %v6415_v15  ;;  %5652 = vmatprep.mubr.msk.f32.mxu1 %vm6293_vm1, %v6292_v12 }
 0x525   :  { %5646 = vmatprep.subr.mxu1 %v6292_v12  ;;  %5656 = vmatpush3.msra.mxu0 %v6421_v16 }
 0x526   :  { %5647 = vmatpush3.msra.mxu1 %v6437_v18  ;;  %5657 = vmatprep.subr.mxu0 %v6292_v12 }
 0x527   :  { %5648 = vmatprep.subr.mxu1 %v6292_v12  ;;  %5658 = vmatpush3.msra.mxu0 %v6431_v17 }
 0x528   :  { %5649 = vmatpush3.msra.mxu1 %v6466_v21  ;;  %5659 = vmatprep.subr.mxu0 %v6292_v12 }
 0x529   :  { %5650 = vmatprep.subr.mxu1 %v6292_v12  ;;  %5660 = vmatpush3.msra.mxu0 %v6445_v19 }
 0x52a   :  { %5651 = vmatpush3.msra.mxu1 %v6475_v22  ;;  %5661 = vmatprep.subr.mxu0 %v6292_v12 }
 0x52b   :  { %5653 = vmatmul.mubr.msk.f32.vlgmr.msra.gmra.mxu1 %vm213_vm2, %v1703_v57  ;;  %5666 = vmatprep.subr.mxu1 %v6292_v12 }
 0x52c   :  { %5667 = vmatpush3.msra.mxu1 %v6490_v23  ;;  %5662 = vmatpush3.msra.mxu0 %v6455_v20 }
 0x52d   :  { %5668 = vmatprep.subr.mxu1 %v6292_v12  ;;  %5663 = vmatprep.mubr.msk.f32.mxu0 %vm6293_vm1, %v6292_v12 }
 0x52e   :  { %5669 = vmatpush3.msra.mxu1 %v6498_v24  ;;  %5674 = vmatprep.mubr.msk.f32.mxu1 %vm6293_vm1, %v6292_v12 }
 0x52f   :  { %5670 = vmatprep.subr.mxu1 %v6292_v12  ;;  %5677 = vmatprep.subr.mxu0 %v6292_v12 }
 0x530   :  { %5671 = vmatpush3.msra.mxu1 %v6508_v25 }
 0x531   :  { %5672 = vmatprep.subr.mxu1 %v6292_v12 }
 0x532   :  { %5673 = vmatpush3.msra.mxu1 %v6517_v26 }
 0x533   :  { %5688 = vmatprep.subr.mxu1 %v6292_v12 }
 0x5e3   :  { %v1775_v58 = vpop.f32.mrf.mxu1  ;;  %v1845_v60 = vpop.f32.mrf.mxu0 }
 0x5e4   :  { %v1921_v61 = vadd.f32 %v1920_v59, %v1775_v58  ;;  %v1931_v4 = vadd.f32 %v1930_v3, %v1845_v60  ;;  %v6831_v58 = vld [vmem:[#allocation2 + $0x10] sm:$0xff]  ;;  %v2593_v60 = vld [vmem:[#allocation4 + $0x28] sm:$0xff] }
 0x5e5   :  { %v5632_v62 = vpop.f32.mrf.mxu1  ;;  %v5643_v63 = vpop.f32.mrf.mxu0  ;;  %v2594_v59 = vld [vmem:[#allocation4 + $0x30] sm:$0xff] }
 0x5e6   :  { %v5003_v0 = vmul.f32 -1.442695, %v1921_v61  ;;  %v5004_v5 = vmul.f32 -1.442695, %v1931_v4  ;;  %v6837_v61 = vld [vmem:[#allocation2 + $0x18] sm:$0xff]  ;;  %v6841_v62 = vld [vmem:[#allocation2 + $0x20] sm:$0xff] }
 0x5e7   :  { %v2592_v63 = vld [vmem:[#allocation4 + $0x20] sm:$0xff]  ;;  %v6868_v3 = vld [vmem:[#allocation6 + $0x10] sm:$0xff]  ;;  %v2721_v4 = vld [vmem:[#allocation4 + $0x58] sm:$0xff] }
 0x5e8   :  { %6125 = vpow2.f32 %v5003_v0 }
 0x5e9   :  { %6127 = vpow2.f32 %v5004_v5  ;;  %v2720_v5 = vld [vmem:[#allocation4 + $0x50] sm:$0xff] }
 0x5eb   :  { %v1915_v1 = vpop.f32.mrf.mxu1 }
 0x5ec   :  { %v1916_v9 = vadd.f32 %v6577_v41, %v1915_v1 }
 0x5ed   :  { %v5654_v2 = vpop.f32.mrf.mxu1 }
 0x5ee   :  { %v6866_v2 = vld [vmem:[#allocation6 + $0x18] sm:$0xff] }
 0x5f5   :  { %v6126_v6 = vpop.eup %6125 }
 0x5f6   :  { %v1925_v7 = vadd.f32 1.0, %v6126_v6  ;;  %v6128_v8 = vpop.eup %6127  ;;  %v6872_v6 = vld [vmem:[#allocation6 + $0x8] sm:$0xff] }
 0x5f7   :  { %v1935_v14 = vadd.f32 1.0, %v6128_v8  ;;  %v6878_v8 = vld [vmem:[#allocation6] sm:$0xff] }
 0x5f8   :  { %6129 = vrcp.f32 %v1925_v7  ;;  %v2719_v7 = vld [vmem:[#allocation4 + $0x48] sm:$0xff] }
 0x605   :  { %v6130_v10 = vpop.eup %6129 }
 0x606   :  { %v1941_v11 = vmul.f32 %v6130_v10, %v1916_v9  ;;  %v2718_v9 = vld [vmem:[#allocation4 + $0x40] sm:$0xff] }
 0x608   :  { %v1942_v27 = vadd.f32 %v1941_v11, %v1940_v13  ;;  %v2406_v11 = vld [vmem:[#allocation3 + $0x38] sm:$0xff] }
 0x60a   :  { %6131 = vtanh.f32 %v1942_v27 }
 0x60b   :  { %6133 = vrcp.f32 %v1935_v14 }
 0x617   :  { %v6132_v28 = vpop.eup %6131 }
 0x618   :  { %v1944_v29 = vsub.f32 %v1703_v57, %v6132_v28  ;;  %v6134_v30 = vpop.eup %6133  ;;  %v6825_v57 = vld [vmem:[#allocation2 + $0x8] sm:$0xff] }
 0x61a   :  { %v1945_v31 = vmul.f32 %v6134_v30, %v1944_v29  ;;  %v6886_v30 = vld [vmem:[%s7321_s7] ss:$0 sm:$0xff] }
 0x61c   :  { %v6755_v32 = vadd.f32 %v6132_v28, %v1945_v31 }
 0x61e   :  { %1948 = vst.msk [vmem:[#allocation2 + $0x28] sm:$0xff] %vm213_vm2, %v6755_v32  ;;  %5664 = vmatmul.mubr.msk.f32.vlgmr.msra.gmra.mxu0 %vm213_vm2, %v6755_v32  ;;  %5675 = vmatmul.mubr.msk.f32.vlgmr.msra.gmra.mxu1 %vm213_vm2, %v6755_v32 }
 0x61f   :  { %5678 = vmatpush3.msra.mxu0 %v6415_v15  ;;  %5685 = vmatprep.mubr.msk.f32.mxu0 %vm6293_vm1, %v6292_v12  ;;  %v2446_v15 = vld [vmem:[#allocation4 + $0x18] sm:$0xff] }
 0x620   :  { %5679 = vmatprep.subr.mxu0 %v6292_v12  ;;  %5689 = vmatpush3.msra.mxu1 %v6421_v16 }
 0x621   :  { %5680 = vmatpush3.msra.mxu0 %v6437_v18  ;;  %5690 = vmatprep.subr.mxu1 %v6292_v12 }
 0x622   :  { %5681 = vmatprep.subr.mxu0 %v6292_v12  ;;  %5691 = vmatpush3.msra.mxu1 %v6431_v17  ;;  %v2163_v17 = vld [vmem:[#allocation3 + $0x30] sm:$0xff] }
 0x623   :  { %5682 = vmatpush3.msra.mxu0 %v6466_v21  ;;  %5692 = vmatprep.subr.mxu1 %v6292_v12 }
 0x624   :  { %5683 = vmatprep.subr.mxu0 %v6292_v12  ;;  %5693 = vmatpush3.msra.mxu1 %v6445_v19 }
 0x625   :  { %5684 = vmatpush3.msra.mxu0 %v6475_v22  ;;  %5694 = vmatprep.subr.mxu1 %v6292_v12  ;;  %v6845_v0 = vld [vmem:[#allocation2 + $0x28] sm:$0xff] }
 0x626   :  { %5686 = vmatmul.mubr.msk.f32.vlgmr.msra.gmra.mxu0 %vm213_vm2, %v6755_v32  ;;  %5699 = vmatprep.subr.mxu0 %v6292_v12 }
 0x627   :  { %5700 = vmatpush3.msra.mxu0 %v6490_v23  ;;  %5695 = vmatpush3.msra.mxu1 %v6455_v20 }
 0x628   :  { %5701 = vmatprep.subr.mxu0 %v6292_v12  ;;  %5696 = vmatprep.mubr.msk.f32.mxu1 %vm6293_vm1, %v6292_v12 }
 0x629   :  { %5702 = vmatpush3.msra.mxu0 %v6498_v24  ;;  %5707 = vmatprep.mubr.msk.f32.mxu0 %vm6293_vm1, %v6292_v12 }
 0x62a   :  { %5703 = vmatprep.subr.mxu0 %v6292_v12  ;;  %5710 = vmatprep.subr.mxu1 %v6292_v12 }
 0x62b   :  { %5704 = vmatpush3.msra.mxu0 %v6508_v25 }
 0x62c   :  { %5705 = vmatprep.subr.mxu0 %v6292_v12 }
 0x62d   :  { %5706 = vmatpush3.msra.mxu0 %v6517_v26 }
 0x62e   :  { %5721 = vmatprep.subr.mxu0 %v2446_v15 }
 0x6de   :  { %v2018_v16 = vpop.f32.mrf.mxu0  ;;  %v2088_v18 = vpop.f32.mrf.mxu1 }
 0x6df   :  { %v2164_v19 = vadd.f32 %v2163_v17, %v2018_v16  ;;  %v2174_v34 = vadd.f32 %v2173_v33, %v2088_v18  ;;  %v2416_v16 = vld [vmem:[#allocation3 + $0x78] sm:$0xff] }
 0x6e0   :  { %v5665_v20 = vpop.f32.mrf.mxu0  ;;  %v5676_v21 = vpop.f32.mrf.mxu1 }
 0x6e1   :  { %v5008_v22 = vmul.f32 -1.442695, %v2164_v19  ;;  %v5009_v35 = vmul.f32 -1.442695, %v2174_v34  ;;  %v6898_v34 = vld [vmem:[%s7321_s7 + $0x1] ss:$0 sm:$0xff] }
 0x6e3   :  { %6135 = vpow2.f32 %v5008_v22 }
 0x6e4   :  { %6137 = vpow2.f32 %v5009_v35 }
 0x6e6   :  { %v2158_v23 = vpop.f32.mrf.mxu0 }
 0x6e7   :  { %v2159_v37 = vadd.f32 %v6577_v41, %v2158_v23  ;;  %v6235_v41 = vld [vmem:[%s7316_s2 + $0x58] sm:$0xff] }
 0x6e8   :  { %v5687_v24 = vpop.f32.mrf.mxu0 }
 0x6f0   :  { %v6136_v25 = vpop.eup %6135 }
 0x6f1   :  { %v2168_v36 = vadd.f32 1.0, %v6136_v25  ;;  %v6138_v26 = vpop.eup %6137 }
 0x6f2   :  { %v2178_v42 = vadd.f32 1.0, %v6138_v26 }
 0x6f3   :  { %6139 = vrcp.f32 %v2168_v36 }
 0x700   :  { %v6140_v38 = vpop.eup %6139 }
 0x701   :  { %v2184_v39 = vmul.f32 %v6140_v38, %v2159_v37 }
 0x703   :  { %v2185_v43 = vadd.f32 %v2184_v39, %v2183_v40 }
 0x705   :  { %6141 = vtanh.f32 %v2185_v43 }
 0x706   :  { %6143 = vrcp.f32 %v2178_v42 }
 0x712   :  { %v6142_v44 = vpop.eup %6141 }
 0x713   :  { %v2187_v45 = vsub.f32 %v6755_v32, %v6142_v44  ;;  %v6144_v46 = vpop.eup %6143 }
 0x715   :  { %v2188_v47 = vmul.f32 %v6144_v46, %v2187_v45 }
 0x717   :  { %v6796_v48 = vadd.f32 %v6142_v44, %v2188_v47 }
 0x719   :  { %2191 = vst.msk [vmem:[#allocation2 + $0x30] sm:$0xff] %vm213_vm2, %v6796_v48  ;;  %5697 = vmatmul.mubr.msk.f32.vlgmr.msra.gmra.mxu1 %vm213_vm2, %v6796_v48  ;;  %5708 = vmatmul.mubr.msk.f32.vlgmr.msra.gmra.mxu0 %vm213_vm2, %v6796_v48 }
 0x71a   :  { %5711 = vmatpush3.msra.mxu1 %v6235_v41  ;;  %5722 = vmatpush3.msra.mxu0 %v2446_v15 }
 0x71b   :  { %5712 = vmatprep.subr.mxu1 %v6292_v12  ;;  %5723 = vmatprep.subr.mxu0 %v2445_v49 }
 0x71c   :  { %5729 = vmatprep.mubr.msk.f32.mxu0 %vm213_vm2, %v6808_v50  ;;  %5713 = vmatpush3.msra.mxu1 %v6236_v52 }
 0x71d   :  { %5724 = vmatpush3.msra.mxu0 %v2445_v49  ;;  %5714 = vmatprep.subr.mxu1 %v6292_v12 }
 0x71e   :  { %5725 = vmatprep.subr.mxu0 %v2444_v51  ;;  %5715 = vmatpush3.msra.mxu1 %v6237_v54  ;;  %v6239_v54 = vld [vmem:[%s7318_s4] ss:$0 sm:$0xff] }
 0x71f   :  { %5726 = vmatpush3.msra.mxu0 %v2444_v51  ;;  %5716 = vmatprep.subr.mxu1 %v6292_v12 }
 0x720   :  { %5727 = vmatprep.subr.mxu0 %v2443_v53  ;;  %5717 = vmatpush3.msra.mxu1 %v6238_v55  ;;  %v6849_v1 = vld [vmem:[#allocation2 + $0x30] sm:$0xff] }
 0x721   :  { %5718 = vmatprep.mubr.msk.f32.mxu1 %vm6293_vm1, %v6292_v12  ;;  %5728 = vmatpush3.msra.mxu0 %v2443_v53 }
 0x722   :  { %5719 = vmatmul.mubr.msk.f32.vlgmr.msra.gmra.mxu1 %vm213_vm2, %v6796_v48  ;;  %5730 = vmatmul.mubr.msk.f32.vlgmr.msra.gmra.mxu0 %vm213_vm2, %v6825_v57 }
 0x723   :  { %5741 = vmatprep.subr.mxu1 %v2595_v56  ;;  %5732 = vmatprep.mubr.msk.f32.mxu0 %vm213_vm2, %v6831_v58 }
 0x724   :  { %5742 = vmatpush3.msra.mxu1 %v2595_v56  ;;  %5749 = vmatprep.mubr.msk.f32.mxu1 %vm213_vm2, %v6808_v50 }
 0x725   :  { %5743 = vmatprep.subr.mxu1 %v2594_v59  ;;  %5761 = vmatprep.subr.mxu0 %v2721_v4 }
 0x726   :  { %5744 = vmatpush3.msra.mxu1 %v2594_v59  ;;  %5733 = vmatmul.mubr.msk.f32.gmra.mxu0 %vm213_vm2, %v6837_v61 }
 0x727   :  { %5745 = vmatprep.subr.mxu1 %v2593_v60  ;;  %5735 = vmatprep.mubr.msk.f32.mxu0 %vm213_vm2, %v6841_v62 }
 0x728   :  { %5746 = vmatpush3.msra.mxu1 %v2593_v60  ;;  %5762 = vmatpush3.msra.mxu0 %v2721_v4  ;;  %v2426_v60 = vld [vmem:[#allocation3 + $0xb8] sm:$0xff] }
 0x729   :  { %5747 = vmatprep.subr.mxu1 %v2592_v63  ;;  %5763 = vmatprep.subr.mxu0 %v2720_v5 }
 0x72a   :  { %5748 = vmatpush3.msra.mxu1 %v2592_v63  ;;  %5736 = vmatmul.mubr.msk.f32.gmra.mxu0 %vm213_vm2, %v6845_v0 }
 0x72b   :  { %5750 = vmatmul.mubr.msk.f32.vlgmr.msra.gmra.mxu1 %vm213_vm2, %v6825_v57  ;;  %5738 = vmatprep.mubr.msk.f32.mxu0 %vm213_vm2, %v6849_v1 }
 0x72c   :  { %5752 = vmatprep.mubr.msk.f32.mxu1 %vm213_vm2, %v6831_v58  ;;  %5781 = vmatprep.subr.mxu1 %v6292_v12 }
 0x72d   :  { %5782 = vmatpush3.msra.mxu1 %v6866_v2  ;;  %5764 = vmatpush3.msra.mxu0 %v2720_v5 }
 0x72e   :  { %5783 = vmatprep.subr.mxu1 %v6292_v12  ;;  %5765 = vmatprep.subr.mxu0 %v2719_v7 }
 0x72f   :  { %5753 = vmatmul.mubr.msk.f32.gmra.mxu1 %vm213_vm2, %v6837_v61  ;;  %5766 = vmatpush3.msra.mxu0 %v2719_v7 }
 0x730   :  { %5755 = vmatprep.mubr.msk.f32.mxu1 %vm213_vm2, %v6841_v62  ;;  %5784 = vmatpush3.msra.mxu1 %v6868_v3 }
 0x731   :  { %5785 = vmatprep.subr.mxu1 %v6292_v12  ;;  %5767 = vmatprep.subr.mxu0 %v2718_v9 }
 0x732   :  { %5786 = vmatpush3.msra.mxu1 %v6872_v6  ;;  %5768 = vmatpush3.msra.mxu0 %v2718_v9 }
 0x733   :  { %5756 = vmatmul.mubr.msk.f32.gmra.mxu1 %vm213_vm2, %v6845_v0  ;;  %5787 = vmatprep.subr.mxu1 %v6292_v12 }
 0x734   :  { %5758 = vmatprep.mubr.msk.f32.mxu1 %vm213_vm2, %v6849_v1  ;;  %5788 = vmatpush3.msra.mxu1 %v6878_v8 }
 0x735   :  { %5792 = vmatprep.subr.mxu1 %v6292_v12  ;;  %5803 = vmatprep.subr.mxu0 %v6292_v12 }
 0x7d9   :  { %v2261_v10 = vpop.f32.mrf.mxu1  ;;  %v2331_v13 = vpop.f32.mrf.mxu0 }
 0x7da   :  { %v2407_v14 = vadd.f32 %v2406_v11, %v2261_v10  ;;  %v2417_v19 = vadd.f32 %v2416_v16, %v2331_v13 }
 0x7db   :  { %v5698_v27 = vpop.f32.mrf.mxu1  ;;  %v5709_v28 = vpop.f32.mrf.mxu0 }
 0x7dc   :  { %v5013_v29 = vmul.f32 -1.442695, %v2407_v14  ;;  %v5014_v24 = vmul.f32 -1.442695, %v2417_v19  ;;  %v6928_v14 = vld [vmem:[#allocation6 + $0x38] sm:$0xff]  ;;  %v6952_v28 = vld [vmem:[#allocation6 + $0x50] sm:$0xff] }
 0x7dd   :  { %v6935_v27 = vld [vmem:[#allocation6 + $0x58] sm:$0xff] }
 0x7de   :  { %6145 = vpow2.f32 %v5013_v29 }
 0x7df   :  { %6147 = vpow2.f32 %v5014_v24 }
 0x7e2   :  { %v2401_v31 = vpop.f32.mrf.mxu1  ;;  %v5731_v32 = vpop.f32.mrf.mxu0 }
 0x7e3   :  { %v2550_v15 = vadd.f32 %v5731_v32, %v6886_v30  ;;  %v2402_v55 = vadd.f32 %v6239_v54, %v2401_v31 }
 0x7e4   :  { %v5720_v17 = vpop.f32.mrf.mxu1  ;;  %v2544_v18 = vpop.f32.mrf.mxu0 }
 0x7e5   :  { %2584 = vst.msk [vmem:[#allocation3 + $0x8] sm:$0xff] %vm213_vm2, %v2550_v15  ;;  %v2545_v20 = vadd.f32 %v6886_v30, %v2544_v18  ;;  %v5035_v15 = vld [vmem:[%s7321_s7 + $0x2] ss:$0 sm:$0xff] }
 0x7e6   :  { %v5734_v21 = vpop.f32.mrf.mxu0 }
 0x7e7   :  { %2583 = vst.msk [vmem:[#allocation3] sm:$0xff] %vm213_vm2, %v2545_v20  ;;  %v2560_v22 = vadd.f32 %v5734_v21, %v6886_v30 }
 0x7e8   :  { %v2554_v23 = vpop.f32.mrf.mxu0 }
 0x7e9   :  { %2586 = vst.msk [vmem:[#allocation3 + $0x18] sm:$0xff] %vm213_vm2, %v2560_v22  ;;  %v2555_v33 = vadd.f32 %v6886_v30, %v2554_v23 }
 0x7ea   :  { %v5737_v35 = vpop.f32.mrf.mxu0 }
 0x7eb   :  { %v6146_v25 = vpop.eup %6145  ;;  %2585 = vst.msk [vmem:[#allocation3 + $0x10] sm:$0xff] %vm213_vm2, %v2555_v33  ;;  %v2570_v36 = vadd.f32 %v5737_v35, %v6886_v30  ;;  %v5751_v26 = vpop.f32.mrf.mxu1 }
 0x7ec   :  { %v2411_v37 = vadd.f32 1.0, %v6146_v25  ;;  %v2676_v38 = vadd.f32 %v5751_v26, %v6898_v34  ;;  %v2564_v39 = vpop.f32.mrf.mxu0  ;;  %v6148_v53 = vpop.eup %6147 }
 0x7ed   :  { %2588 = vst.msk [vmem:[#allocation3 + $0x28] sm:$0xff] %vm213_vm2, %v2570_v36  ;;  %v2565_v40 = vadd.f32 %v6886_v30, %v2564_v39  ;;  %v2670_v42 = vpop.f32.mrf.mxu1  ;;  %v2421_v63 = vadd.f32 1.0, %v6148_v53 }
 0x7ee   :  { %6149 = vrcp.f32 %v2411_v37  ;;  %2710 = vst.msk [vmem:[#allocation3 + $0x48] sm:$0xff] %vm213_vm2, %v2676_v38  ;;  %v2671_v43 = vadd.f32 %v6898_v34, %v2670_v42  ;;  %v3074_v20 = vld [vmem:[#allocation3] sm:$0xff] }
 0x7ef   :  { %2587 = vst.msk [vmem:[#allocation3 + $0x20] sm:$0xff] %vm213_vm2, %v2565_v40  ;;  %v5754_v44 = vpop.f32.mrf.mxu1 }
 0x7f0   :  { %2709 = vst.msk [vmem:[#allocation3 + $0x40] sm:$0xff] %vm213_vm2, %v2671_v43  ;;  %v2686_v45 = vadd.f32 %v5754_v44, %v6898_v34 }
 0x7f1   :  { %v2680_v46 = vpop.f32.mrf.mxu1 }
 0x7f2   :  { %2712 = vst.msk [vmem:[#allocation3 + $0x58] sm:$0xff] %vm213_vm2, %v2686_v45  ;;  %v2681_v47 = vadd.f32 %v6898_v34, %v2680_v46 }
 0x7f3   :  { %v5757_v49 = vpop.f32.mrf.mxu1 }
 0x7f4   :  { %2711 = vst.msk [vmem:[#allocation3 + $0x50] sm:$0xff] %vm213_vm2, %v2681_v47  ;;  %v2696_v41 = vadd.f32 %v5757_v49, %v6898_v34 }
 0x7f5   :  { %v2690_v51 = vpop.f32.mrf.mxu1 }
 0x7f6   :  { %2714 = vst.msk [vmem:[#allocation3 + $0x68] sm:$0xff] %vm213_vm2, %v2696_v41  ;;  %v2691_v52 = vadd.f32 %v6898_v34, %v2690_v51 }
 0x7f7   :  { %v3082_v42 = vld [vmem:[#allocation3 + $0x40] sm:$0xff] }
 0x7f8   :  { %2713 = vst.msk [vmem:[#allocation3 + $0x60] sm:$0xff] %vm213_vm2, %v2691_v52 }
 0x7fb   :  { %v6150_v56 = vpop.eup %6149 }
 0x7fc   :  { %v2427_v59 = vmul.f32 %v6150_v56, %v2402_v55  ;;  %v7022_v55 = vld [vmem:[%s7322_s8] ss:$0 sm:$0xff] }
 0x7fe   :  { %v2428_v4 = vadd.f32 %v2427_v59, %v2426_v60 }
 0x800   :  { %6151 = vtanh.f32 %v2428_v4 }
 0x801   :  { %6153 = vrcp.f32 %v2421_v63 }
 0x80d   :  { %v6152_v5 = vpop.eup %6151 }
 0x80e   :  { %v2430_v7 = vsub.f32 %v6796_v48, %v6152_v5  ;;  %v6154_v9 = vpop.eup %6153  ;;  %v6933_v48 = vld [vmem:[#allocation6 + $0x30] sm:$0xff] }
 0x810   :  { %v2431_v10 = vmul.f32 %v6154_v9, %v2430_v7 }
 0x812   :  { %v2432_v11 = vadd.f32 %v6152_v5, %v2431_v10 }
 0x814   :  { %2434 = vst.msk [vmem:[#allocation2 + $0x38] sm:$0xff] %vm213_vm2, %v2432_v11 }
 0x81b   :  { %v2442_v13 = vld [vmem:[#allocation2 + $0x38] sm:$0xff] }
 0x81c   :  { %5739 = vmatmul.mubr.msk.f32.gmra.mxu0 %vm213_vm2, %v2442_v13  ;;  %5759 = vmatmul.mubr.msk.f32.gmra.mxu1 %vm213_vm2, %v2442_v13 }
 0x81d   :  { %5769 = vmatprep.mubr.msk.f32.mxu0 %vm213_vm2, %v6808_v50  ;;  %5789 = vmatprep.mubr.msk.f32.mxu1 %vm6293_vm1, %v6292_v12  ;;  %v6941_v50 = vld [vmem:[#allocation6 + $0x28] sm:$0xff] }
 0x820   :  { %5770 = vmatmul.mubr.msk.f32.vlgmr.msra.gmra.mxu0 %vm213_vm2, %v6825_v57  ;;  %5790 = vmatmul.mubr.f32.vlgmr.msra.gmra.mxu1 %v6292_v12  ;;  %v6950_v57 = vld [vmem:[#allocation6 + $0x20] sm:$0xff] }
 0x821   :  { %5793 = vmatpush3.msra.mxu1 %v6928_v14  ;;  %5772 = vmatprep.mubr.msk.f32.mxu0 %vm213_vm2, %v6831_v58  ;;  %v6961_v58 = vld [vmem:[#allocation6 + $0x48] sm:$0xff] }
 0x822   :  { %5794 = vmatprep.subr.mxu1 %v6292_v12  ;;  %5800 = vmatprep.mubr.msk.f32.mxu1 %vm6293_vm1, %v6292_v12 }
 0x823   :  { %5795 = vmatpush3.msra.mxu1 %v6933_v48  ;;  %5804 = vmatpush3.msra.mxu0 %v6935_v27 }
 0x824   :  { %5796 = vmatprep.subr.mxu1 %v6292_v12  ;;  %5773 = vmatmul.mubr.msk.f32.gmra.mxu0 %vm213_vm2, %v6837_v61  ;;  %v6970_v61 = vld [vmem:[#allocation6 + $0x40] sm:$0xff] }
 0x825   :  { %5797 = vmatpush3.msra.mxu1 %v6941_v50  ;;  %5775 = vmatprep.mubr.msk.f32.mxu0 %vm213_vm2, %v6841_v62 }
 0x826   :  { %5798 = vmatprep.subr.mxu1 %v6292_v12  ;;  %5805 = vmatprep.subr.mxu0 %v6292_v12 }
 0x827   :  { %5799 = vmatpush3.msra.mxu1 %v6950_v57  ;;  %5806 = vmatpush3.msra.mxu0 %v6952_v28 }
 0x828   :  { %5801 = vmatmul.mubr.f32.vlgmr.msra.gmra.mxu1 %v6292_v12  ;;  %5776 = vmatmul.mubr.msk.f32.gmra.mxu0 %vm213_vm2, %v6845_v0 }
 0x829   :  { %5778 = vmatprep.mubr.msk.f32.mxu0 %vm213_vm2, %v6849_v1  ;;  %5807 = vmatprep.subr.mxu0 %v6292_v12 }
 0x82a   :  { %5808 = vmatpush3.msra.mxu0 %v6961_v58  ;;  %5814 = vmatprep.subr.mxu1 %v6292_v12 }
 0x82b   :  { %5809 = vmatprep.subr.mxu0 %v6292_v12  ;;  %5815 = vmatpush3.msra.mxu1 %v6866_v2 }
 0x82c   :  { %5779 = vmatmul.mubr.msk.f32.gmra.mxu0 %vm213_vm2, %v2442_v13  ;;  %5816 = vmatprep.subr.mxu1 %v6292_v12 }
 0x82d   :  { %5810 = vmatpush3.msra.mxu0 %v6970_v61  ;;  %5811 = vmatprep.mubr.msk.f32.mxu0 %vm6293_vm1, %v6292_v12 }
 0x82e   :  { %5825 = vmatprep.subr.mxu0 %v6292_v12  ;;  %5817 = vmatpush3.msra.mxu1 %v6868_v3 }
 0x82f   :  { %5818 = vmatprep.subr.mxu1 %v6292_v12  ;;  %5822 = vmatprep.mubr.msk.f32.mxu1 %vm6293_vm1, %v6292_v12 }
 0x830   :  { %5812 = vmatmul.mubr.f32.vlgmr.msra.gmra.mxu0 %v6292_v12  ;;  %5819 = vmatpush3.msra.mxu1 %v6872_v6 }
 0x831   :  { %5826 = vmatpush3.msra.mxu0 %v6928_v14  ;;  %5820 = vmatprep.subr.mxu1 %v6292_v12 }
 0x832   :  { %5827 = vmatprep.subr.mxu0 %v6292_v12  ;;  %5821 = vmatpush3.msra.mxu1 %v6878_v8 }
 0x833   :  { %5828 = vmatpush3.msra.mxu0 %v6933_v48  ;;  %5833 = vmatprep.mubr.msk.f32.mxu0 %vm6293_vm1, %v6292_v12 }
 0x834   :  { %5829 = vmatprep.subr.mxu0 %v6292_v12  ;;  %5836 = vmatprep.subr.mxu1 %v6292_v12 }
 0x835   :  { %5830 = vmatpush3.msra.mxu0 %v6941_v50 }
 0x836   :  { %5831 = vmatprep.subr.mxu0 %v6292_v12 }
 0x837   :  { %5832 = vmatpush3.msra.mxu0 %v6950_v57 }
 0x838   :  { %5847 = vmatprep.subr.mxu0 %v6292_v12 }
 0x8dc   :  { %v5740_v62 = vpop.f32.mrf.mxu0  ;;  %v5760_v0 = vpop.f32.mrf.mxu1 }
 0x8dd   :  { %v2580_v1 = vadd.f32 %v5740_v62, %v6886_v30  ;;  %v2706_v29 = vadd.f32 %v5760_v0, %v6898_v34 }
 0x8de   :  { %v2574_v31 = vpop.f32.mrf.mxu0  ;;  %v2700_v32 = vpop.f32.mrf.mxu1 }
 0x8df   :  { %2590 = vst.msk [vmem:[#allocation3 + $0x38] sm:$0xff] %vm213_vm2, %v2580_v1  ;;  %2716 = vst.msk [vmem:[#allocation3 + $0x78] sm:$0xff] %vm213_vm2, %v2706_v29  ;;  %v2575_v16 = vadd.f32 %v6886_v30, %v2574_v31  ;;  %v2701_v17 = vadd.f32 %v6898_v34, %v2700_v32  ;;  %v3311_v1 = vld [vmem:[#allocation3 + $0x8] sm:$0xff] }
 0x8e0   :  { %v5771_v18 = vpop.f32.mrf.mxu0  ;;  %v2924_v19 = vpop.f32.mrf.mxu1 }
 0x8e1   :  { %2589 = vst.msk [vmem:[#allocation3 + $0x30] sm:$0xff] %vm213_vm2, %v2575_v16  ;;  %2715 = vst.msk [vmem:[#allocation3 + $0x70] sm:$0xff] %vm213_vm2, %v2701_v17  ;;  %v2802_v21 = vadd.f32 %v5771_v18, %v5035_v15  ;;  %v3075_v22 = vadd.f32 %v3074_v20, %v2924_v19  ;;  %v3319_v19 = vld [vmem:[#allocation3 + $0x48] sm:$0xff] }
 0x8e2   :  { %v2796_v23 = vpop.f32.mrf.mxu0  ;;  %v5791_v24 = vpop.f32.mrf.mxu1 }
 0x8e3   :  { %2836 = vst.msk [vmem:[#allocation3 + $0x88] sm:$0xff] %vm213_vm2, %v2802_v21  ;;  %v5045_v33 = vmul.f32 -1.442695, %v3075_v22  ;;  %v2797_v35 = vadd.f32 %v5035_v15, %v2796_v23 }
 0x8e4   :  { %v5774_v25 = vpop.f32.mrf.mxu0 }
 0x8e5   :  { %6155 = vpow2.f32 %v5045_v33  ;;  %2835 = vst.msk [vmem:[#allocation3 + $0x80] sm:$0xff] %vm213_vm2, %v2797_v35  ;;  %v2812_v30 = vadd.f32 %v5774_v25, %v5035_v15 }
 0x8e6   :  { %v2806_v34 = vpop.f32.mrf.mxu0 }
 0x8e7   :  { %2838 = vst.msk [vmem:[#allocation3 + $0x98] sm:$0xff] %vm213_vm2, %v2812_v30  ;;  %v2807_v36 = vadd.f32 %v5035_v15, %v2806_v34 }
 0x8e8   :  { %v2994_v26 = vpop.f32.mrf.mxu1  ;;  %v5777_v37 = vpop.f32.mrf.mxu0 }
 0x8e9   :  { %2837 = vst.msk [vmem:[#allocation3 + $0x90] sm:$0xff] %vm213_vm2, %v2807_v36  ;;  %v2822_v38 = vadd.f32 %v5777_v37, %v5035_v15  ;;  %v3083_v44 = vadd.f32 %v3082_v42, %v2994_v26 }
 0x8ea   :  { %v2816_v39 = vpop.f32.mrf.mxu0  ;;  %v5802_v40 = vpop.f32.mrf.mxu1  ;;  %v3327_v30 = vld [vmem:[#allocation3 + $0x88] sm:$0xff] }
 0x8eb   :  { %2840 = vst.msk [vmem:[#allocation3 + $0xa8] sm:$0xff] %vm213_vm2, %v2822_v38  ;;  %v2817_v43 = vadd.f32 %v5035_v15, %v2816_v39  ;;  %v5046_v41 = vmul.f32 -1.442695, %v3083_v44 }
 0x8ec   :  { %v5780_v45 = vpop.f32.mrf.mxu0  ;;  %v3090_v4 = vld [vmem:[#allocation3 + $0x80] sm:$0xff] }
 0x8ed   :  { %2839 = vst.msk [vmem:[#allocation3 + $0xa0] sm:$0xff] %vm213_vm2, %v2817_v43  ;;  %v2832_v46 = vadd.f32 %v5780_v45, %v5035_v15  ;;  %6157 = vpow2.f32 %v5046_v41  ;;  %v3548_v43 = vld [vmem:[#allocation3 + $0x10] sm:$0xff] }
 0x8ee   :  { %v2826_v47 = vpop.f32.mrf.mxu0 }
 0x8ef   :  { %2842 = vst.msk [vmem:[#allocation3 + $0xb8] sm:$0xff] %vm213_vm2, %v2832_v46  ;;  %v2827_v49 = vadd.f32 %v5035_v15, %v2826_v47 }
 0x8f0   :  { %v3070_v51 = vpop.f32.mrf.mxu0 }
 0x8f1   :  { %2841 = vst.msk [vmem:[#allocation3 + $0xb0] sm:$0xff] %vm213_vm2, %v2827_v49  ;;  %v3071_v56 = vadd.f32 %v7022_v55, %v3070_v51 }
 0x8f2   :  { %v6156_v52 = vpop.eup %6155  ;;  %v5813_v53 = vpop.f32.mrf.mxu0 }
 0x8f3   :  { %v3079_v54 = vadd.f32 1.0, %v6156_v52  ;;  %v3556_v52 = vld [vmem:[#allocation3 + $0x50] sm:$0xff] }
 0x8f5   :  { %6159 = vrcp.f32 %v3079_v54 }
 0x8fa   :  { %v6158_v59 = vpop.eup %6157 }
 0x8fb   :  { %v3087_v5 = vadd.f32 1.0, %v6158_v59 }
 0x902   :  { %v6160_v60 = vpop.eup %6159 }
 0x903   :  { %v3091_v63 = vmul.f32 %v6160_v60, %v3071_v56 }
 0x905   :  { %v3092_v7 = vadd.f32 %v3091_v63, %v3090_v4 }
 0x907   :  { %6161 = vtanh.f32 %v3092_v7  ;;  %v3564_v7 = vld [vmem:[#allocation3 + $0x90] sm:$0xff] }
 0x908   :  { %6163 = vrcp.f32 %v3087_v5 }
 0x914   :  { %v6162_v9 = vpop.eup %6161 }
 0x915   :  { %v3094_v10 = vsub.f32 0.0, %v6162_v9  ;;  %v6164_v11 = vpop.eup %6163 }
 0x917   :  { %v3095_v13 = vmul.f32 %v6164_v11, %v3094_v10 }
 0x919   :  { %v3096_v62 = vadd.f32 %v6162_v9, %v3095_v13 }
 0x91b   :  { %3097 = vst.msk [vmem:[#allocation2] sm:$0xff] %vm213_vm2, %v3096_v62  ;;  %5823 = vmatmul.mubr.msk.f32.vlgmr.msra.gmra.mxu1 %vm213_vm2, %v3096_v62  ;;  %5834 = vmatmul.mubr.msk.f32.vlgmr.msra.gmra.mxu0 %vm213_vm2, %v3096_v62 }
 0x91c   :  { %5837 = vmatpush3.msra.mxu1 %v6935_v27  ;;  %5844 = vmatprep.mubr.msk.f32.mxu1 %vm6293_vm1, %v6292_v12 }
 0x91d   :  { %5838 = vmatprep.subr.mxu1 %v6292_v12  ;;  %5848 = vmatpush3.msra.mxu0 %v6866_v2 }
 0x91e   :  { %5839 = vmatpush3.msra.mxu1 %v6952_v28  ;;  %5849 = vmatprep.subr.mxu0 %v6292_v12 }
 0x91f   :  { %5840 = vmatprep.subr.mxu1 %v6292_v12  ;;  %5850 = vmatpush3.msra.mxu0 %v6868_v3 }
 0x920   :  { %5841 = vmatpush3.msra.mxu1 %v6961_v58  ;;  %5851 = vmatprep.subr.mxu0 %v6292_v12 }
 0x921   :  { %5842 = vmatprep.subr.mxu1 %v6292_v12  ;;  %5852 = vmatpush3.msra.mxu0 %v6872_v6 }
 0x922   :  { %5843 = vmatpush3.msra.mxu1 %v6970_v61  ;;  %5853 = vmatprep.subr.mxu0 %v6292_v12 }
 0x923   :  { %5845 = vmatmul.mubr.msk.f32.vlgmr.msra.gmra.mxu1 %vm213_vm2, %v3096_v62  ;;  %5858 = vmatprep.subr.mxu1 %v6292_v12 }
 0x924   :  { %5859 = vmatpush3.msra.mxu1 %v6928_v14  ;;  %5854 = vmatpush3.msra.mxu0 %v6878_v8 }
 0x925   :  { %5860 = vmatprep.subr.mxu1 %v6292_v12  ;;  %5855 = vmatprep.mubr.msk.f32.mxu0 %vm6293_vm1, %v6292_v12 }
 0x926   :  { %5861 = vmatpush3.msra.mxu1 %v6933_v48  ;;  %5866 = vmatprep.mubr.msk.f32.mxu1 %vm6293_vm1, %v6292_v12 }
 0x927   :  { %5862 = vmatprep.subr.mxu1 %v6292_v12  ;;  %5869 = vmatprep.subr.mxu0 %v6292_v12 }
 0x928   :  { %5863 = vmatpush3.msra.mxu1 %v6941_v50 }
 0x929   :  { %5864 = vmatprep.subr.mxu1 %v6292_v12 }
 0x92a   :  { %5865 = vmatpush3.msra.mxu1 %v6950_v57 }
 0x92b   :  { %5880 = vmatprep.subr.mxu1 %v6292_v12 }
 0x9db   :  { %v3167_v0 = vpop.f32.mrf.mxu1  ;;  %v3237_v29 = vpop.f32.mrf.mxu0 }
 0x9dc   :  { %v3312_v31 = vadd.f32 %v3311_v1, %v3167_v0  ;;  %v3320_v20 = vadd.f32 %v3319_v19, %v3237_v29 }
 0x9dd   :  { %v5824_v32 = vpop.f32.mrf.mxu1  ;;  %v5835_v15 = vpop.f32.mrf.mxu0 }
 0x9de   :  { %v5050_v16 = vmul.f32 -1.442695, %v3312_v31  ;;  %v5051_v21 = vmul.f32 -1.442695, %v3320_v20  ;;  %v3785_v31 = vld [vmem:[#allocation3 + $0x18] sm:$0xff] }
 0x9e0   :  { %6165 = vpow2.f32 %v5050_v16 }
 0x9e1   :  { %6167 = vpow2.f32 %v5051_v21  ;;  %v3793_v21 = vld [vmem:[#allocation3 + $0x58] sm:$0xff] }
 0x9e3   :  { %v3307_v17 = vpop.f32.mrf.mxu1 }
 0x9e4   :  { %v3308_v33 = vadd.f32 %v7022_v55, %v3307_v17 }
 0x9e5   :  { %v5846_v18 = vpop.f32.mrf.mxu1 }
 0x9ed   :  { %v6166_v22 = vpop.eup %6165 }
 0x9ee   :  { %v3316_v23 = vadd.f32 1.0, %v6166_v22  ;;  %v6168_v24 = vpop.eup %6167 }
 0x9ef   :  { %v3324_v34 = vadd.f32 1.0, %v6168_v24 }
 0x9f0   :  { %6169 = vrcp.f32 %v3316_v23 }
 0x9fd   :  { %v6170_v35 = vpop.eup %6169 }
 0x9fe   :  { %v3328_v25 = vmul.f32 %v6170_v35, %v3308_v33 }
 0xa00   :  { %v3329_v36 = vadd.f32 %v3328_v25, %v3327_v30 }
 0xa02   :  { %6171 = vtanh.f32 %v3329_v36  ;;  %v3801_v36 = vld [vmem:[#allocation3 + $0x98] sm:$0xff] }
 0xa03   :  { %6173 = vrcp.f32 %v3324_v34 }
 0xa0f   :  { %v6172_v26 = vpop.eup %6171 }
 0xa10   :  { %v3331_v37 = vsub.f32 %v3096_v62, %v6172_v26  ;;  %v6174_v38 = vpop.eup %6173 }
 0xa12   :  { %v3332_v39 = vmul.f32 %v6174_v38, %v3331_v37 }
 0xa14   :  { %v3333_v40 = vadd.f32 %v6172_v26, %v3332_v39 }
 0xa16   :  { %3334 = vst.msk [vmem:[#allocation2 + $0x8] sm:$0xff] %vm213_vm2, %v3333_v40  ;;  %5856 = vmatmul.mubr.msk.f32.vlgmr.msra.gmra.mxu0 %vm213_vm2, %v3333_v40  ;;  %5867 = vmatmul.mubr.msk.f32.vlgmr.msra.gmra.mxu1 %vm213_vm2, %v3333_v40 }
 0xa17   :  { %5870 = vmatpush3.msra.mxu0 %v6935_v27  ;;  %5877 = vmatprep.mubr.msk.f32.mxu0 %vm6293_vm1, %v6292_v12 }
 0xa18   :  { %5871 = vmatprep.subr.mxu0 %v6292_v12  ;;  %5881 = vmatpush3.msra.mxu1 %v6866_v2 }
 0xa19   :  { %5872 = vmatpush3.msra.mxu0 %v6952_v28  ;;  %5882 = vmatprep.subr.mxu1 %v6292_v12 }
 0xa1a   :  { %5873 = vmatprep.subr.mxu0 %v6292_v12  ;;  %5883 = vmatpush3.msra.mxu1 %v6868_v3 }
 0xa1b   :  { %5874 = vmatpush3.msra.mxu0 %v6961_v58  ;;  %5884 = vmatprep.subr.mxu1 %v6292_v12 }
 0xa1c   :  { %5875 = vmatprep.subr.mxu0 %v6292_v12  ;;  %5885 = vmatpush3.msra.mxu1 %v6872_v6 }
 0xa1d   :  { %5876 = vmatpush3.msra.mxu0 %v6970_v61  ;;  %5886 = vmatprep.subr.mxu1 %v6292_v12 }
 0xa1e   :  { %5878 = vmatmul.mubr.msk.f32.vlgmr.msra.gmra.mxu0 %vm213_vm2, %v3333_v40  ;;  %5891 = vmatprep.subr.mxu0 %v6292_v12 }
 0xa1f   :  { %5892 = vmatpush3.msra.mxu0 %v6928_v14  ;;  %5887 = vmatpush3.msra.mxu1 %v6878_v8 }
 0xa20   :  { %5893 = vmatprep.subr.mxu0 %v6292_v12  ;;  %5888 = vmatprep.mubr.msk.f32.mxu1 %vm6293_vm1, %v6292_v12 }
 0xa21   :  { %5894 = vmatpush3.msra.mxu0 %v6933_v48  ;;  %5899 = vmatprep.mubr.msk.f32.mxu0 %vm6293_vm1, %v6292_v12 }
 0xa22   :  { %5895 = vmatprep.subr.mxu0 %v6292_v12  ;;  %5902 = vmatprep.subr.mxu1 %v6292_v12 }
 0xa23   :  { %5896 = vmatpush3.msra.mxu0 %v6941_v50 }
 0xa24   :  { %5897 = vmatprep.subr.mxu0 %v6292_v12 }
 0xa25   :  { %5898 = vmatpush3.msra.mxu0 %v6950_v57 }
 0xa26   :  { %5913 = vmatprep.subr.mxu0 %v6292_v12 }
 0xad6   :  { %v3404_v42 = vpop.f32.mrf.mxu0  ;;  %v3474_v44 = vpop.f32.mrf.mxu1 }
 0xad7   :  { %v3549_v45 = vadd.f32 %v3548_v43, %v3404_v42  ;;  %v3557_v53 = vadd.f32 %v3556_v52, %v3474_v44 }
 0xad8   :  { %v5857_v46 = vpop.f32.mrf.mxu0  ;;  %v5868_v47 = vpop.f32.mrf.mxu1 }
 0xad9   :  { %v5055_v49 = vmul.f32 -1.442695, %v3549_v45  ;;  %v5056_v54 = vmul.f32 -1.442695, %v3557_v53  ;;  %v4022_v45 = vld [vmem:[#allocation3 + $0x20] sm:$0xff] }
 0xadb   :  { %6175 = vpow2.f32 %v5055_v49 }
 0xadc   :  { %6177 = vpow2.f32 %v5056_v54  ;;  %v4030_v54 = vld [vmem:[#allocation3 + $0x60] sm:$0xff] }
 0xade   :  { %v3544_v41 = vpop.f32.mrf.mxu0 }
 0xadf   :  { %v3545_v63 = vadd.f32 %v7022_v55, %v3544_v41 }
 0xae0   :  { %v5879_v51 = vpop.f32.mrf.mxu0 }
 0xae8   :  { %v6176_v56 = vpop.eup %6175 }
 0xae9   :  { %v3553_v59 = vadd.f32 1.0, %v6176_v56  ;;  %v6178_v60 = vpop.eup %6177 }
 0xaea   :  { %v3561_v9 = vadd.f32 1.0, %v6178_v60 }
 0xaeb   :  { %6179 = vrcp.f32 %v3553_v59 }
 0xaf8   :  { %v6180_v4 = vpop.eup %6179 }
 0xaf9   :  { %v3565_v5 = vmul.f32 %v6180_v4, %v3545_v63 }
 0xafb   :  { %v3566_v10 = vadd.f32 %v3565_v5, %v3564_v7 }
 0xafd   :  { %6181 = vtanh.f32 %v3566_v10  ;;  %v4038_v10 = vld [vmem:[#allocation3 + $0xa0] sm:$0xff] }
 0xafe   :  { %6183 = vrcp.f32 %v3561_v9 }
 0xb0a   :  { %v6182_v11 = vpop.eup %6181 }
 0xb0b   :  { %v3568_v13 = vsub.f32 %v3333_v40, %v6182_v11  ;;  %v6184_v62 = vpop.eup %6183 }
 0xb0d   :  { %v3569_v0 = vmul.f32 %v6184_v62, %v3568_v13 }
 0xb0f   :  { %v3570_v1 = vadd.f32 %v6182_v11, %v3569_v0 }
 0xb11   :  { %3571 = vst.msk [vmem:[#allocation2 + $0x10] sm:$0xff] %vm213_vm2, %v3570_v1  ;;  %5889 = vmatmul.mubr.msk.f32.vlgmr.msra.gmra.mxu1 %vm213_vm2, %v3570_v1  ;;  %5900 = vmatmul.mubr.msk.f32.vlgmr.msra.gmra.mxu0 %vm213_vm2, %v3570_v1 }
 0xb12   :  { %5903 = vmatpush3.msra.mxu1 %v6935_v27  ;;  %5910 = vmatprep.mubr.msk.f32.mxu1 %vm6293_vm1, %v6292_v12 }
 0xb13   :  { %5904 = vmatprep.subr.mxu1 %v6292_v12  ;;  %5914 = vmatpush3.msra.mxu0 %v6866_v2 }
 0xb14   :  { %5905 = vmatpush3.msra.mxu1 %v6952_v28  ;;  %5915 = vmatprep.subr.mxu0 %v6292_v12 }
 0xb15   :  { %5906 = vmatprep.subr.mxu1 %v6292_v12  ;;  %5916 = vmatpush3.msra.mxu0 %v6868_v3 }
 0xb16   :  { %5907 = vmatpush3.msra.mxu1 %v6961_v58  ;;  %5917 = vmatprep.subr.mxu0 %v6292_v12 }
 0xb17   :  { %5908 = vmatprep.subr.mxu1 %v6292_v12  ;;  %5918 = vmatpush3.msra.mxu0 %v6872_v6 }
 0xb18   :  { %5909 = vmatpush3.msra.mxu1 %v6970_v61  ;;  %5919 = vmatprep.subr.mxu0 %v6292_v12 }
 0xb19   :  { %5911 = vmatmul.mubr.msk.f32.vlgmr.msra.gmra.mxu1 %vm213_vm2, %v3570_v1  ;;  %5924 = vmatprep.subr.mxu1 %v6292_v12 }
 0xb1a   :  { %5925 = vmatpush3.msra.mxu1 %v6928_v14  ;;  %5920 = vmatpush3.msra.mxu0 %v6878_v8 }
 0xb1b   :  { %5926 = vmatprep.subr.mxu1 %v6292_v12  ;;  %5921 = vmatprep.mubr.msk.f32.mxu0 %vm6293_vm1, %v6292_v12 }
 0xb1c   :  { %5927 = vmatpush3.msra.mxu1 %v6933_v48  ;;  %5932 = vmatprep.mubr.msk.f32.mxu1 %vm6293_vm1, %v6292_v12 }
 0xb1d   :  { %5928 = vmatprep.subr.mxu1 %v6292_v12  ;;  %5935 = vmatprep.subr.mxu0 %v6292_v12 }
 0xb1e   :  { %5929 = vmatpush3.msra.mxu1 %v6941_v50 }
 0xb1f   :  { %5930 = vmatprep.subr.mxu1 %v6292_v12 }
 0xb20   :  { %5931 = vmatpush3.msra.mxu1 %v6950_v57 }
 0xb21   :  { %5946 = vmatprep.subr.mxu1 %v6292_v12 }
 0xbd1   :  { %v3641_v29 = vpop.f32.mrf.mxu1  ;;  %v3711_v32 = vpop.f32.mrf.mxu0 }
 0xbd2   :  { %v3786_v15 = vadd.f32 %v3785_v31, %v3641_v29  ;;  %v3794_v22 = vadd.f32 %v3793_v21, %v3711_v32 }
 0xbd3   :  { %v5890_v16 = vpop.f32.mrf.mxu1  ;;  %v5901_v17 = vpop.f32.mrf.mxu0 }
 0xbd4   :  { %v5060_v18 = vmul.f32 -1.442695, %v3786_v15  ;;  %v5061_v23 = vmul.f32 -1.442695, %v3794_v22 }
 0xbd6   :  { %6185 = vpow2.f32 %v5060_v18 }
 0xbd7   :  { %6187 = vpow2.f32 %v5061_v23 }
 0xbd9   :  { %v3781_v19 = vpop.f32.mrf.mxu1 }
 0xbda   :  { %v3782_v25 = vadd.f32 %v7022_v55, %v3781_v19  ;;  %v4267_v19 = vld [vmem:[#allocation3 + $0x68] sm:$0xff] }
 0xbdb   :  { %v5912_v20 = vpop.f32.mrf.mxu1 }
 0xbe3   :  { %v6186_v24 = vpop.eup %6185 }
 0xbe4   :  { %v3790_v33 = vadd.f32 1.0, %v6186_v24  ;;  %v6188_v35 = vpop.eup %6187 }
 0xbe5   :  { %v3798_v26 = vadd.f32 1.0, %v6188_v35 }
 0xbe6   :  { %6189 = vrcp.f32 %v3790_v33 }
 0xbf3   :  { %v6190_v30 = vpop.eup %6189 }
 0xbf4   :  { %v3802_v34 = vmul.f32 %v6190_v30, %v3782_v25  ;;  %v4275_v30 = vld [vmem:[#allocation3 + $0xa8] sm:$0xff] }
 0xbf6   :  { %v3803_v37 = vadd.f32 %v3802_v34, %v3801_v36 }
 0xbf8   :  { %6191 = vtanh.f32 %v3803_v37 }
 0xbf9   :  { %6193 = vrcp.f32 %v3798_v26 }
 0xc05   :  { %v6192_v38 = vpop.eup %6191 }
 0xc06   :  { %v3805_v39 = vsub.f32 %v3570_v1, %v6192_v38  ;;  %v6194_v40 = vpop.eup %6193 }
 0xc08   :  { %v3806_v42 = vmul.f32 %v6194_v40, %v3805_v39 }
 0xc0a   :  { %v3807_v43 = vadd.f32 %v6192_v38, %v3806_v42  ;;  %v6240_v42 = vld [vmem:[#allocation6 + $0x18] sm:$0xff] }
 0xc0c   :  { %3808 = vst.msk [vmem:[#allocation2 + $0x18] sm:$0xff] %vm213_vm2, %v3807_v43  ;;  %5922 = vmatmul.mubr.msk.f32.vlgmr.msra.gmra.mxu0 %vm213_vm2, %v3807_v43  ;;  %5933 = vmatmul.mubr.msk.f32.vlgmr.msra.gmra.mxu1 %vm213_vm2, %v3807_v43 }
 0xc0d   :  { %5936 = vmatpush3.msra.mxu0 %v6935_v27  ;;  %5943 = vmatprep.mubr.msk.f32.mxu0 %vm6293_vm1, %v6292_v12 }
 0xc0e   :  { %5937 = vmatprep.subr.mxu0 %v6292_v12  ;;  %5947 = vmatpush3.msra.mxu1 %v6866_v2 }
 0xc0f   :  { %5938 = vmatpush3.msra.mxu0 %v6952_v28  ;;  %5948 = vmatprep.subr.mxu1 %v6292_v12 }
 0xc10   :  { %5939 = vmatprep.subr.mxu0 %v6292_v12  ;;  %5949 = vmatpush3.msra.mxu1 %v6868_v3 }
 0xc11   :  { %5940 = vmatpush3.msra.mxu0 %v6961_v58  ;;  %5950 = vmatprep.subr.mxu1 %v6292_v12 }
 0xc12   :  { %5941 = vmatprep.subr.mxu0 %v6292_v12  ;;  %5951 = vmatpush3.msra.mxu1 %v6872_v6 }
 0xc13   :  { %5942 = vmatpush3.msra.mxu0 %v6970_v61  ;;  %5952 = vmatprep.subr.mxu1 %v6292_v12 }
 0xc14   :  { %5944 = vmatmul.mubr.msk.f32.vlgmr.msra.gmra.mxu0 %vm213_vm2, %v3807_v43  ;;  %5957 = vmatprep.subr.mxu0 %v6292_v12 }
 0xc15   :  { %5958 = vmatpush3.msra.mxu0 %v6928_v14  ;;  %5953 = vmatpush3.msra.mxu1 %v6878_v8 }
 0xc16   :  { %5959 = vmatprep.subr.mxu0 %v6292_v12  ;;  %5954 = vmatprep.mubr.msk.f32.mxu1 %vm6293_vm1, %v6292_v12 }
 0xc17   :  { %5960 = vmatpush3.msra.mxu0 %v6933_v48  ;;  %5965 = vmatprep.mubr.msk.f32.mxu0 %vm6293_vm1, %v6292_v12 }
 0xc18   :  { %5961 = vmatprep.subr.mxu0 %v6292_v12  ;;  %5968 = vmatprep.subr.mxu1 %v6292_v12 }
 0xc19   :  { %5962 = vmatpush3.msra.mxu0 %v6941_v50 }
 0xc1a   :  { %5963 = vmatprep.subr.mxu0 %v6292_v12 }
 0xc1b   :  { %5964 = vmatpush3.msra.mxu0 %v6950_v57 }
 0xc1c   :  { %5979 = vmatprep.subr.mxu0 %v6292_v12 }
 0xccc   :  { %v3878_v44 = vpop.f32.mrf.mxu0  ;;  %v3948_v46 = vpop.f32.mrf.mxu1 }
 0xccd   :  { %v4023_v47 = vadd.f32 %v4022_v45, %v3878_v44  ;;  %v4031_v56 = vadd.f32 %v4030_v54, %v3948_v46  ;;  %v6242_v44 = vld [vmem:[#allocation6 + $0x8] sm:$0xff]  ;;  %v6243_v45 = vld [vmem:[#allocation6] sm:$0xff] }
 0xcce   :  { %v5923_v49 = vpop.f32.mrf.mxu0  ;;  %v5934_v41 = vpop.f32.mrf.mxu1 }
 0xccf   :  { %v5065_v51 = vmul.f32 -1.442695, %v4023_v47  ;;  %v5066_v59 = vmul.f32 -1.442695, %v4031_v56 }
 0xcd1   :  { %6195 = vpow2.f32 %v5065_v51 }
 0xcd2   :  { %6197 = vpow2.f32 %v5066_v59 }
 0xcd4   :  { %v4018_v52 = vpop.f32.mrf.mxu0 }
 0xcd5   :  { %v4019_v5 = vadd.f32 %v7022_v55, %v4018_v52 }
 0xcd6   :  { %v5945_v53 = vpop.f32.mrf.mxu0 }
 0xcde   :  { %v6196_v60 = vpop.eup %6195 }
 0xcdf   :  { %v4027_v63 = vadd.f32 1.0, %v6196_v60  ;;  %v6198_v4 = vpop.eup %6197 }
 0xce0   :  { %v4035_v11 = vadd.f32 1.0, %v6198_v4 }
 0xce1   :  { %6199 = vrcp.f32 %v4027_v63 }
 0xcee   :  { %v6200_v7 = vpop.eup %6199 }
 0xcef   :  { %v4039_v9 = vmul.f32 %v6200_v7, %v4019_v5 }
 0xcf1   :  { %v4040_v13 = vadd.f32 %v4039_v9, %v4038_v10  ;;  %v4512_v9 = vld [vmem:[#allocation3 + $0xb0] sm:$0xff] }
 0xcf3   :  { %6201 = vtanh.f32 %v4040_v13 }
 0xcf4   :  { %6203 = vrcp.f32 %v4035_v11 }
 0xd00   :  { %v6202_v62 = vpop.eup %6201 }
 0xd01   :  { %v4042_v0 = vsub.f32 %v3807_v43, %v6202_v62  ;;  %v6204_v1 = vpop.eup %6203  ;;  %v6241_v43 = vld [vmem:[#allocation6 + $0x10] sm:$0xff] }
 0xd03   :  { %v4043_v29 = vmul.f32 %v6204_v1, %v4042_v0 }
 0xd05   :  { %v4044_v31 = vadd.f32 %v6202_v62, %v4043_v29 }
 0xd07   :  { %4045 = vst.msk [vmem:[#allocation2 + $0x20] sm:$0xff] %vm213_vm2, %v4044_v31  ;;  %5955 = vmatmul.mubr.msk.f32.vlgmr.msra.gmra.mxu1 %vm213_vm2, %v4044_v31  ;;  %5966 = vmatmul.mubr.msk.f32.vlgmr.msra.gmra.mxu0 %vm213_vm2, %v4044_v31 }
 0xd08   :  { %5969 = vmatpush3.msra.mxu1 %v6935_v27  ;;  %5976 = vmatprep.mubr.msk.f32.mxu1 %vm6293_vm1, %v6292_v12 }
 0xd09   :  { %5970 = vmatprep.subr.mxu1 %v6292_v12  ;;  %5980 = vmatpush3.msra.mxu0 %v6866_v2 }
 0xd0a   :  { %5971 = vmatpush3.msra.mxu1 %v6952_v28  ;;  %5981 = vmatprep.subr.mxu0 %v6292_v12 }
 0xd0b   :  { %5972 = vmatprep.subr.mxu1 %v6292_v12  ;;  %5982 = vmatpush3.msra.mxu0 %v6868_v3  ;;  %v4259_v3 = vld [vmem:[#allocation3 + $0x28] sm:$0xff] }
 0xd0c   :  { %5973 = vmatpush3.msra.mxu1 %v6961_v58  ;;  %5983 = vmatprep.subr.mxu0 %v6292_v12 }
 0xd0d   :  { %5974 = vmatprep.subr.mxu1 %v6292_v12  ;;  %5984 = vmatpush3.msra.mxu0 %v6872_v6 }
 0xd0e   :  { %5975 = vmatpush3.msra.mxu1 %v6970_v61  ;;  %5985 = vmatprep.subr.mxu0 %v6292_v12 }
 0xd0f   :  { %5977 = vmatmul.mubr.msk.f32.vlgmr.msra.gmra.mxu1 %vm213_vm2, %v4044_v31  ;;  %5990 = vmatprep.subr.mxu1 %v6292_v12 }
 0xd10   :  { %5991 = vmatpush3.msra.mxu1 %v6928_v14  ;;  %5986 = vmatpush3.msra.mxu0 %v6878_v8 }
 0xd11   :  { %5992 = vmatprep.subr.mxu1 %v6292_v12  ;;  %5987 = vmatprep.mubr.msk.f32.mxu0 %vm6293_vm1, %v6292_v12 }
 0xd12   :  { %5993 = vmatpush3.msra.mxu1 %v6933_v48  ;;  %5998 = vmatprep.mubr.msk.f32.mxu1 %vm6293_vm1, %v6292_v12 }
 0xd13   :  { %5994 = vmatprep.subr.mxu1 %v6292_v12  ;;  %6001 = vmatprep.subr.mxu0 %v6292_v12 }
 0xd14   :  { %5995 = vmatpush3.msra.mxu1 %v6941_v50 }
 0xd15   :  { %5996 = vmatprep.subr.mxu1 %v6292_v12 }
 0xd16   :  { %5997 = vmatpush3.msra.mxu1 %v6950_v57 }
 0xd17   :  { %6012 = vmatprep.subr.mxu1 %v6292_v12 }
 0xdc7   :  { %v4115_v2 = vpop.f32.mrf.mxu1  ;;  %v4185_v6 = vpop.f32.mrf.mxu0 }
 0xdc8   :  { %v4260_v8 = vadd.f32 %v4259_v3, %v4115_v2  ;;  %v4268_v20 = vadd.f32 %v4267_v19, %v4185_v6  ;;  %v4757_v2 = vld [vmem:[#allocation2] sm:$0xff]  ;;  %v4766_v3 = vld [vmem:[%s7323_s9 + $0x8] sm:$0xff]  ;;  %v4759_v6 = vld [vmem:[#allocation2 + $0x10] sm:$0xff] }
 0xdc9   :  { %v5956_v32 = vpop.f32.mrf.mxu1  ;;  %v5967_v15 = vpop.f32.mrf.mxu0 }
 0xdca   :  { %v5070_v16 = vmul.f32 -1.442695, %v4260_v8  ;;  %v5071_v21 = vmul.f32 -1.442695, %v4268_v20  ;;  %v4761_v8 = vld [vmem:[#allocation2 + $0x20] sm:$0xff]  ;;  %v4733_v15 = vld [vmem:[#allocation3 + $0x38] sm:$0xff] }
 0xdcc   :  { %6205 = vpow2.f32 %v5070_v16 }
 0xdcd   :  { %6207 = vpow2.f32 %v5071_v21  ;;  %v5082_v21 = vld [vmem:[%s7324_s10] ss:$0 sm:$0xff] }
 0xdcf   :  { %v4255_v17 = vpop.f32.mrf.mxu1 }
 0xdd0   :  { %v4256_v33 = vadd.f32 %v7022_v55, %v4255_v17 }
 0xdd1   :  { %v5978_v18 = vpop.f32.mrf.mxu1 }
 0xdd9   :  { %v6206_v22 = vpop.eup %6205 }
 0xdda   :  { %v4264_v23 = vadd.f32 1.0, %v6206_v22  ;;  %v6208_v24 = vpop.eup %6207 }
 0xddb   :  { %v4272_v34 = vadd.f32 1.0, %v6208_v24 }
 0xddc   :  { %6209 = vrcp.f32 %v4264_v23 }
 0xde9   :  { %v6210_v35 = vpop.eup %6209 }
 0xdea   :  { %v4276_v25 = vmul.f32 %v6210_v35, %v4256_v33  ;;  %v4741_v33 = vld [vmem:[#allocation3 + $0x78] sm:$0xff] }
 0xdec   :  { %v4277_v36 = vadd.f32 %v4276_v25, %v4275_v30 }
 0xdee   :  { %6211 = vtanh.f32 %v4277_v36 }
 0xdef   :  { %6213 = vrcp.f32 %v4272_v34 }
 0xdfb   :  { %v6212_v26 = vpop.eup %6211 }
 0xdfc   :  { %v4279_v37 = vsub.f32 %v4044_v31, %v6212_v26  ;;  %v6214_v38 = vpop.eup %6213  ;;  %v4767_v31 = vld [vmem:[%s7323_s9 + $0x10] sm:$0xff] }
 0xdfe   :  { %v4280_v39 = vmul.f32 %v6214_v38, %v4279_v37 }
 0xe00   :  { %v7200_v40 = vadd.f32 %v6212_v26, %v4280_v39 }
 0xe02   :  { %4282 = vst.msk [vmem:[#allocation2 + $0x28] sm:$0xff] %vm213_vm2, %v7200_v40  ;;  %5988 = vmatmul.mubr.msk.f32.vlgmr.msra.gmra.mxu0 %vm213_vm2, %v7200_v40  ;;  %5999 = vmatmul.mubr.msk.f32.vlgmr.msra.gmra.mxu1 %vm213_vm2, %v7200_v40 }
 0xe03   :  { %6002 = vmatpush3.msra.mxu0 %v6935_v27  ;;  %6009 = vmatprep.mubr.msk.f32.mxu0 %vm6293_vm1, %v6292_v12 }
 0xe04   :  { %6003 = vmatprep.subr.mxu0 %v6292_v12  ;;  %6013 = vmatpush3.msra.mxu1 %v6240_v42 }
 0xe05   :  { %6004 = vmatpush3.msra.mxu0 %v6952_v28  ;;  %6014 = vmatprep.subr.mxu1 %v6292_v12 }
 0xe06   :  { %6005 = vmatprep.subr.mxu0 %v6292_v12  ;;  %6015 = vmatpush3.msra.mxu1 %v6241_v43 }
 0xe07   :  { %6006 = vmatpush3.msra.mxu0 %v6961_v58  ;;  %6016 = vmatprep.subr.mxu1 %v6292_v12 }
 0xe08   :  { %6007 = vmatprep.subr.mxu0 %v6292_v12  ;;  %6017 = vmatpush3.msra.mxu1 %v6242_v44 }
 0xe09   :  { %6008 = vmatpush3.msra.mxu0 %v6970_v61  ;;  %6018 = vmatprep.subr.mxu1 %v6292_v12 }
 0xe0a   :  { %6010 = vmatmul.mubr.msk.f32.vlgmr.msra.gmra.mxu0 %vm213_vm2, %v7200_v40  ;;  %6023 = vmatprep.subr.mxu0 %v6292_v12 }
 0xe0b   :  { %6024 = vmatpush3.msra.mxu0 %v6928_v14  ;;  %6019 = vmatpush3.msra.mxu1 %v6243_v45  ;;  %v4768_v14 = vld [vmem:[%s7323_s9 + $0x18] sm:$0xff] }
 0xe0c   :  { %6025 = vmatprep.subr.mxu0 %v6292_v12  ;;  %6020 = vmatprep.mubr.msk.f32.mxu1 %vm6293_vm1, %v6292_v12 }
 0xe0d   :  { %6026 = vmatpush3.msra.mxu0 %v6933_v48  ;;  %6031 = vmatprep.mubr.msk.f32.mxu0 %vm6293_vm1, %v6292_v12  ;;  %v4496_v48 = vld [vmem:[#allocation3 + $0x30] sm:$0xff] }
 0xe0e   :  { %6027 = vmatprep.subr.mxu0 %v6292_v12  ;;  %6034 = vmatprep.subr.mxu1 %v6292_v12 }
 0xe0f   :  { %6028 = vmatpush3.msra.mxu0 %v6941_v50  ;;  %v4504_v50 = vld [vmem:[#allocation3 + $0x70] sm:$0xff] }
 0xe10   :  { %6029 = vmatprep.subr.mxu0 %v6292_v12 }
 0xe11   :  { %6030 = vmatpush3.msra.mxu0 %v6950_v57 }
 0xe12   :  { %6045 = vmatprep.subr.mxu0 %v4768_v14 }
 0xec2   :  { %v4352_v46 = vpop.f32.mrf.mxu0  ;;  %v4422_v47 = vpop.f32.mrf.mxu1 }
 0xec3   :  { %v4497_v49 = vadd.f32 %v4496_v48, %v4352_v46  ;;  %v4505_v56 = vadd.f32 %v4504_v50, %v4422_v47 }
 0xec4   :  { %v5989_v41 = vpop.f32.mrf.mxu0  ;;  %v6000_v51 = vpop.f32.mrf.mxu1 }
 0xec5   :  { %v5075_v52 = vmul.f32 -1.442695, %v4497_v49  ;;  %v5076_v59 = vmul.f32 -1.442695, %v4505_v56  ;;  %v4749_v41 = vld [vmem:[#allocation3 + $0xb8] sm:$0xff] }
 0xec7   :  { %6215 = vpow2.f32 %v5075_v52 }
 0xec8   :  { %6217 = vpow2.f32 %v5076_v59 }
 0xeca   :  { %v4492_v53 = vpop.f32.mrf.mxu0 }
 0xecb   :  { %v4493_v4 = vadd.f32 %v7022_v55, %v4492_v53 }
 0xecc   :  { %v6011_v54 = vpop.f32.mrf.mxu0 }
 0xed4   :  { %v6216_v60 = vpop.eup %6215 }
 0xed5   :  { %v4501_v57 = vadd.f32 1.0, %v6216_v60  ;;  %v6218_v63 = vpop.eup %6217 }
 0xed6   :  { %v4509_v10 = vadd.f32 1.0, %v6218_v63 }
 0xed7   :  { %6219 = vrcp.f32 %v4501_v57 }
 0xee4   :  { %v6220_v5 = vpop.eup %6219 }
 0xee5   :  { %v4513_v7 = vmul.f32 %v6220_v5, %v4493_v4 }
 0xee7   :  { %v4514_v11 = vadd.f32 %v4513_v7, %v4512_v9 }
 0xee9   :  { %6221 = vtanh.f32 %v4514_v11 }
 0xeea   :  { %6223 = vrcp.f32 %v4509_v10 }
 0xef6   :  { %v6222_v13 = vpop.eup %6221 }
 0xef7   :  { %v4516_v62 = vsub.f32 %v7200_v40, %v6222_v13  ;;  %v6224_v0 = vpop.eup %6223 }
 0xef9   :  { %v4517_v1 = vmul.f32 %v6224_v0, %v4516_v62 }
 0xefb   :  { %v7240_v29 = vadd.f32 %v6222_v13, %v4517_v1 }
 0xefd   :  { %4519 = vst.msk [vmem:[#allocation2 + $0x30] sm:$0xff] %vm213_vm2, %v7240_v29  ;;  %6021 = vmatmul.mubr.msk.f32.vlgmr.msra.gmra.mxu1 %vm213_vm2, %v7240_v29  ;;  %6032 = vmatmul.mubr.msk.f32.vlgmr.msra.gmra.mxu0 %vm213_vm2, %v7240_v29 }
 0xefe   :  { %6035 = vmatpush3.msra.mxu1 %v6935_v27  ;;  %6046 = vmatpush3.msra.mxu0 %v4768_v14  ;;  %v4765_v27 = vld [vmem:[%s7323_s9] sm:$0xff] }
 0xeff   :  { %6036 = vmatprep.subr.mxu1 %v6292_v12  ;;  %6047 = vmatprep.subr.mxu0 %v4767_v31 }
 0xf00   :  { %6053 = vmatprep.mubr.msk.f32.mxu0 %vm213_vm2, %v4757_v2  ;;  %6037 = vmatpush3.msra.mxu1 %v6952_v28  ;;  %v4758_v28 = vld [vmem:[#allocation2 + $0x8] sm:$0xff] }
 0xf01   :  { %6048 = vmatpush3.msra.mxu0 %v4767_v31  ;;  %6038 = vmatprep.subr.mxu1 %v6292_v12 }
 0xf02   :  { %6049 = vmatprep.subr.mxu0 %v4766_v3  ;;  %6039 = vmatpush3.msra.mxu1 %v6961_v58  ;;  %v4760_v58 = vld [vmem:[#allocation2 + $0x18] sm:$0xff] }
 0xf03   :  { %6050 = vmatpush3.msra.mxu0 %v4766_v3  ;;  %6040 = vmatprep.subr.mxu1 %v6292_v12 }
 0xf04   :  { %6051 = vmatprep.subr.mxu0 %v4765_v27  ;;  %6041 = vmatpush3.msra.mxu1 %v6970_v61  ;;  %v4762_v61 = vld [vmem:[#allocation2 + $0x28] sm:$0xff] }
 0xf05   :  { %6042 = vmatprep.mubr.msk.f32.mxu1 %vm6293_vm1, %v6292_v12  ;;  %6052 = vmatpush3.msra.mxu0 %v4765_v27  ;;  %v4763_v12 = vld [vmem:[#allocation2 + $0x30] sm:$0xff] }
 0xf06   :  { %6043 = vmatmul.mubr.msk.f32.vlgmr.msra.gmra.mxu1 %vm213_vm2, %v7240_v29  ;;  %6054 = vmatmul.mubr.msk.f32.vlgmr.msra.gmra.mxu0 %vm213_vm2, %v4758_v28 }
 0xf07   :  { %6056 = vmatprep.mubr.msk.f32.mxu0 %vm213_vm2, %v4759_v6 }
 0xf0a   :  { %6057 = vmatmul.mubr.msk.f32.gmra.mxu0 %vm213_vm2, %v4760_v58 }
 0xf0b   :  { %6059 = vmatprep.mubr.msk.f32.mxu0 %vm213_vm2, %v4761_v8 }
 0xf0e   :  { %6060 = vmatmul.mubr.msk.f32.gmra.mxu0 %vm213_vm2, %v4762_v61 }
 0xf0f   :  { %6062 = vmatprep.mubr.msk.f32.mxu0 %vm213_vm2, %v4763_v12 }
 0xfbd   :  { %v4589_v32 = vpop.f32.mrf.mxu1  ;;  %v4659_v16 = vpop.f32.mrf.mxu0 }
 0xfbe   :  { %v4734_v17 = vadd.f32 %v4733_v15, %v4589_v32  ;;  %v4742_v30 = vadd.f32 %v4741_v33, %v4659_v16 }
 0xfbf   :  { %v6022_v18 = vpop.f32.mrf.mxu1  ;;  %v6033_v19 = vpop.f32.mrf.mxu0 }
 0xfc0   :  { %v5080_v20 = vmul.f32 -1.442695, %v4734_v17  ;;  %v5081_v38 = vmul.f32 -1.442695, %v4742_v30 }
 0xfc2   :  { %6225 = vpow2.f32 %v5080_v20 }
 0xfc3   :  { %6227 = vpow2.f32 %v5081_v38 }
 0xfc6   :  { %v4729_v22 = vpop.f32.mrf.mxu1  ;;  %v6055_v23 = vpop.f32.mrf.mxu0 }
 0xfc7   :  { %v4872_v24 = vadd.f32 %v6055_v23, %v5082_v21  ;;  %v4730_v48 = vadd.f32 %v7022_v55, %v4729_v22 }
 0xfc8   :  { %v6044_v35 = vpop.f32.mrf.mxu1  ;;  %v4866_v25 = vpop.f32.mrf.mxu0 }
 0xfc9   :  { %4907 = vst.msk [vmem:[%s7325_s11 + $0x8] sm:$0xff] %vm4905_vm3, %v4872_v24  ;;  %v4867_v34 = vadd.f32 %v5082_v21, %v4866_v25 }
 0xfca   :  { %v6058_v36 = vpop.f32.mrf.mxu0 }
 0xfcb   :  { %4906 = vst.msk [vmem:[%s7325_s11] sm:$0xff] %vm4905_vm3, %v4867_v34  ;;  %v4882_v26 = vadd.f32 %v6058_v36, %v5082_v21 }
 0xfcc   :  { %v4876_v37 = vpop.f32.mrf.mxu0 }
 0xfcd   :  { %4909 = vst.msk [vmem:[%s7325_s11 + $0x18] sm:$0xff] %vm4905_vm3, %v4882_v26  ;;  %v4877_v39 = vadd.f32 %v5082_v21, %v4876_v37 }
 0xfce   :  { %v6061_v40 = vpop.f32.mrf.mxu0 }
 0xfcf   :  { %v6226_v42 = vpop.eup %6225  ;;  %4908 = vst.msk [vmem:[%s7325_s11 + $0x10] sm:$0xff] %vm4905_vm3, %v4877_v39  ;;  %v4892_v43 = vadd.f32 %v6061_v40, %v5082_v21 }
 0xfd0   :  { %v4738_v44 = vadd.f32 1.0, %v6226_v42  ;;  %v4886_v45 = vpop.f32.mrf.mxu0  ;;  %v6228_v46 = vpop.eup %6227 }
 0xfd1   :  { %4911 = vst.msk [vmem:[%s7325_s11 + $0x28] sm:$0xff] %vm4905_vm3, %v4892_v43  ;;  %v4887_v14 = vadd.f32 %v5082_v21, %v4886_v45  ;;  %v4746_v51 = vadd.f32 1.0, %v6228_v46 }
 0xfd2   :  { %6229 = vrcp.f32 %v4738_v44 }
 0xfd3   :  { %4910 = vst.msk [vmem:[%s7325_s11 + $0x20] sm:$0xff] %vm4905_vm3, %v4887_v14 }
 0xfdf   :  { %v6230_v47 = vpop.eup %6229 }
 0xfe0   :  { %v4750_v49 = vmul.f32 %v6230_v47, %v4730_v48 }
 0xfe2   :  { %v4751_v52 = vadd.f32 %v4750_v49, %v4749_v41 }
 0xfe4   :  { %6231 = vtanh.f32 %v4751_v52 }
 0xfe5   :  { %6233 = vrcp.f32 %v4746_v51 }
 0xff1   :  { %v6232_v53 = vpop.eup %6231 }
 0xff2   :  { %v4753_v54 = vsub.f32 %v7240_v29, %v6232_v53  ;;  %v6234_v50 = vpop.eup %6233 }
 0xff4   :  { %v4754_v56 = vmul.f32 %v6234_v50, %v4753_v54 }
 0xff6   :  { %v4755_v59 = vadd.f32 %v6232_v53, %v4754_v56 }
 0xff8   :  { %4756 = vst.msk [vmem:[#allocation2 + $0x38] sm:$0xff] %vm213_vm2, %v4755_v59 }
 0xfff   :  { %v4764_v60 = vld [vmem:[#allocation2 + $0x38] sm:$0xff] }
0x1000   :  { %6063 = vmatmul.mubr.msk.f32.gmra.mxu0 %vm213_vm2, %v4764_v60 }
0x10c0   :  { %v6064_v57 = vpop.f32.mrf.mxu0 }
0x10c1   :  { %v4902_v55 = vadd.f32 %v6064_v57, %v5082_v21 }
0x10c2   :  { %v4896_v63 = vpop.f32.mrf.mxu0 }
0x10c3   :  { %4913 = vst.msk [vmem:[%s7325_s11 + $0x38] sm:$0xff] %vm4905_vm3, %v4902_v55  ;;  %v4897_v4 = vadd.f32 %v5082_v21, %v4896_v63 }
0x10c5   :  { %4912 = vst.msk [vmem:[%s7325_s11 + $0x30] sm:$0xff] %vm4905_vm3, %v4897_v4 }
0x10c6   :  { %4918 = vsyncpa [#allocation5], 1 }
0x10c7   :  { %4919 = vsyncpa [#allocation7], 1 }

</bundles_post_ra>
